<compile_context>
chip_gen: v7x
topology: tpu7x:2x2x1
jax: 0.10.0
libtpu: 0.0.40
codegen_flags: <defaults>
</compile_context>

<pallas_src>
import math
import functools

import jax
import jax.numpy as jnp
from jax import lax
from jax.experimental import pallas as pl
from jax.experimental.pallas import tpu as pltpu

# ---------------- hyperparameters (small, consistent with the module) --------
BATCH = 2
NUM_ATOMS = 10            # stand-in molecule size for NeuralFingerprint input
ATOM_FEAT_DIM = 16        # stand-in atom feature dim
DRUG_EMB_DIM = 32
GENE_EMB_DIM = 32         # must equal DRUG_EMB_DIM (assert in MultiDCP)
GENE_INPUT_DIM = 8
NUM_GENE = 16
CELL_ID_INPUT_DIM = 64
CELL_ID_EMB_DIM = 50      # LinearEncoder output size (fixed by module)
PERT_IDOSE_INPUT_DIM = 4
PERT_IDOSE_EMB_DIM = 8
HID_DIM = 32
N_HEADS = 4
PF_DIM = 512
N_ATTN_LAYERS = 2
LINEAR_DIM = DRUG_EMB_DIM + GENE_EMB_DIM + CELL_ID_EMB_DIM + PERT_IDOSE_EMB_DIM  # 122


# ------------------------------ fused kernel ----------------------------------
def _make_forward_kernel(job_id):
    head_dim = GENE_EMB_DIM // N_HEADS
    scale = 1.0 / math.sqrt(head_dim)

    def kernel(atom_ref, mask_ref, gene_ref, cell_ref, pert_ref,
               fp_w, fp_b, ge_w, ge_b,
               attn_w, attn_b, ln_g, ln_b,
               pf_w1, pf_b1, pf_w2, pf_b2,
               ce_w1, ce_b1, ce_w2, ce_b2, ce_w3, ce_b3,
               pi_w, pi_b,
               l1_wa, l1_wb, l1_wc, l1_wd, l1_b,
               *rest):
        head_w = rest[:-2]
        out_ref, cell_out_ref = rest[-2], rest[-1]

        def relu(v):
            return jnp.maximum(v, 0.0)

        def mm(x, w):  # bf16 MXU matmul, f32 accumulation
            return jnp.dot(x.astype(jnp.bfloat16), w,
                           preferred_element_type=jnp.float32)

        def layer_norm(v, idx):
            mu = jnp.mean(v, axis=-1, keepdims=True)
            var = jnp.mean((v - mu) ** 2, axis=-1, keepdims=True)
            return (v - mu) * lax.rsqrt(var + 1e-5) * ln_g[idx] + ln_b[idx]

        # per-head lane masks over the 32-wide embedding (hoisted, VPU-only)
        col = lax.broadcasted_iota(jnp.int32, (1, GENE_EMB_DIM), 1)
        head_masks = [
            ((col >= h * head_dim) & (col < (h + 1) * head_dim)).astype(jnp.float32)
            for h in range(N_HEADS)
        ]

        def mha(q, kv, bias, base):
            Q = mm(q, attn_w[base + 0]) + attn_b[base + 0]
            K = mm(kv, attn_w[base + 1]) + attn_b[base + 1]
            V = mm(kv, attn_w[base + 2]) + attn_b[base + 2]
            Qs = Q * scale
            o = None
            for m in head_masks:
                s = lax.dot_general(Qs * m, K, (((1,), (1,)), ((), ())),
                                    preferred_element_type=jnp.float32)
                if bias is not None:
                    s = s + bias
                s = s - jnp.max(s, axis=-1, keepdims=True)
                p = jnp.exp(s)
                p = p * pl.reciprocal(jnp.sum(p, axis=-1, keepdims=True),
                                      approx=True)
                contrib = jnp.dot(p, V * m, preferred_element_type=jnp.float32)
                o = contrib if o is None else o + contrib
            return mm(o, attn_w[base + 3]) + attn_b[base + 3]

        # ---- drug fingerprint
        # TODO(synk): NeuralFingerprint (graph convolution) source not provided;
        # stand-in = per-atom Linear + ReLU, then sum over atoms.
        drug_atom = relu(mm(atom_ref[0], fp_w[...]) + fp_b[...])        # (A, E)
        drug_sum = jnp.sum(drug_atom, axis=0, keepdims=True)            # (1, E)

        # ---- gene embedding
        x = mm(gene_ref[...], ge_w[...]) + ge_b[...]                    # (G, E)

        # ---- DrugGeneAttention
        # TODO(synk): exact DrugGeneAttention source not provided; implemented
        # as a 2-layer post-LN decoder (self-attn, cross-attn, FFN), 4 heads,
        # pf_dim=512, dropout = identity (eval mode).
        src_bias = jnp.where(mask_ref[0] > 0, 0.0, -1e9)                # (1, A)
        for l in range(N_ATTN_LAYERS):
            sa_base = (l * 2) * 4
            ea_base = (l * 2 + 1) * 4
            x = layer_norm(x + mha(x, x, None, sa_base), l * 3)
            x = layer_norm(x + mha(x, drug_atom, src_bias, ea_base), l * 3 + 1)
            ff = mm(relu(mm(x, pf_w1[l]) + pf_b1[l]), pf_w2[l]) + pf_b2[l]
            x = layer_norm(x + ff, l * 3 + 2)

        # ---- cell encoder (LinearEncoder: in -> 200 -> 100 -> 50, ReLU each)
        c = relu(mm(cell_ref[0], ce_w1[...]) + ce_b1[...])
        c = relu(mm(c, ce_w2[...]) + ce_b2[...])
        c = relu(mm(c, ce_w3[...]) + ce_b3[...])                        # (1, 50)
        cell_out_ref[0] = c

        # ---- pert_idose embedding
        pe = mm(pert_ref[0], pi_w[...]) + pi_b[...]                     # (1, 8)

        # ---- relu(concat(dg, drug, cell, pert)) @ linear_1, via row-split W.
        h = (mm(relu(x), l1_wa[...])
             + mm(relu(drug_sum), l1_wb[...])
             + mm(relu(c), l1_wc[...])
             + mm(relu(pe), l1_wd[...])
             + l1_b[...])                                               # (G, H)
        h = relu(h)

        if job_id == 'perturbed':
            lf_w, lf_b = head_w
            out_ref[0] = mm(h, lf_w[...]) + lf_b[...]                   # (G, 1)
        else:
            (t_w1, t_b1, t_w2, t_b2, t_w3, t_b3,
             g_w1t, g_b1, g_w2t, g_b2, g_w3t, g_b3) = head_w
            t = relu(mm(h, t_w1[...]) + t_b1[...])
            t = relu(mm(t, t_w2[...]) + t_b2[...])
            t = mm(t, t_w3[...]) + t_b3[...]                            # (G, 1)

            # genes_linear in column form (weights pre-transposed on the host)
            # so the gene axis stays on sublanes; avoids an in-kernel transpose.
            def mm_col(wT, v):
                return jnp.dot(wT, v.astype(jnp.bfloat16),
                               preferred_element_type=jnp.float32)

            z = relu(mm_col(g_w1t[...], t) + g_b1[...])                 # (G/2,1)
            z = relu(mm_col(g_w2t[...], z) + g_b2[...])                 # (G/2,1)
            out_ref[0] = mm_col(g_w3t[...], z) + g_b3[...]              # (1, 1)

    return kernel


# ------------------------------ parameters ------------------------------------
def dense(key, in_dim, out_dim):
    kw, kb = jax.random.split(key)
    bound = 1.0 / math.sqrt(in_dim)
    W = jax.random.uniform(kw, (in_dim, out_dim), jnp.float32, -bound, bound)
    b = jax.random.uniform(kb, (1, out_dim), jnp.float32, -bound, bound)
    return W, b


def init_params(key):
    keys = iter(jax.random.split(key, 128))
    bf16 = jnp.bfloat16
    p = {}

    W, b = dense(next(keys), ATOM_FEAT_DIM, DRUG_EMB_DIM)
    p['fp_w'], p['fp_b'] = W.astype(bf16), b
    W, b = dense(next(keys), GENE_INPUT_DIM, GENE_EMB_DIM)
    p['ge_w'], p['ge_b'] = W.astype(bf16), b

    attn_w, attn_b, ln_g, ln_b = [], [], [], []
    pf_w1, pf_b1, pf_w2, pf_b2 = [], [], [], []
    for _ in range(N_ATTN_LAYERS):
        for _attn in range(2):            # self-attn, cross-attn
            for _j in range(4):           # q, k, v, o
                W, b = dense(next(keys), GENE_EMB_DIM, GENE_EMB_DIM)
                attn_w.append(W)
                attn_b.append(b)
        for _j in range(3):               # ln1, ln2, ln3
            ln_g.append(jnp.ones((1, GENE_EMB_DIM), jnp.float32))
            ln_b.append(jnp.zeros((1, GENE_EMB_DIM), jnp.float32))
        W, b = dense(next(keys), GENE_EMB_DIM, PF_DIM)
        pf_w1.append(W); pf_b1.append(b)
        W, b = dense(next(keys), PF_DIM, GENE_EMB_DIM)
        pf_w2.append(W); pf_b2.append(b)
    p['attn_w'] = jnp.stack(attn_w).astype(bf16)    # (16, E, E)
    p['attn_b'] = jnp.stack(attn_b)                 # (16, 1, E)
    p['ln_g'] = jnp.stack(ln_g)                     # (6, 1, E)
    p['ln_b'] = jnp.stack(ln_b)
    p['pf_w1'] = jnp.stack(pf_w1).astype(bf16)      # (2, E, PF)
    p['pf_b1'] = jnp.stack(pf_b1)                   # (2, 1, PF)
    p['pf_w2'] = jnp.stack(pf_w2).astype(bf16)      # (2, PF, E)
    p['pf_b2'] = jnp.stack(pf_b2)                   # (2, 1, E)

    # LinearEncoder: in -> 200 -> 100 -> 50
    for i, (din, dout) in enumerate([(CELL_ID_INPUT_DIM, 200), (200, 100), (100, 50)], 1):
        W, b = dense(next(keys), din, dout)
        p[f'ce_w{i}'], p[f'ce_b{i}'] = W.astype(bf16), b

    W, b = dense(next(keys), PERT_IDOSE_INPUT_DIM, PERT_IDOSE_EMB_DIM)
    p['pi_w'], p['pi_b'] = W.astype(bf16), b

    # linear_1: split rows to match concat order (attn_out | drug | cell | pert)
    W, b = dense(next(keys), LINEAR_DIM, HID_DIM)
    Wb = W.astype(bf16)
    o1 = GENE_EMB_DIM
    o2 = o1 + DRUG_EMB_DIM
    o3 = o2 + CELL_ID_EMB_DIM
    p['l1_wa'] = Wb[:o1]
    p['l1_wb'] = Wb[o1:o2]
    p['l1_wc'] = Wb[o2:o3]
    p['l1_wd'] = Wb[o3:]
    p['l1_b'] = b

    # perturbed head
    W, b = dense(next(keys), HID_DIM, 1)
    p['lf_w'], p['lf_b'] = W.astype(bf16), b
    # ehill task head
    W, b = dense(next(keys), HID_DIM, HID_DIM // 2)
    p['t_w1'], p['t_b1'] = W.astype(bf16), b
    W, b = dense(next(keys), HID_DIM // 2, HID_DIM // 2)
    p['t_w2'], p['t_b2'] = W.astype(bf16), b
    W, b = dense(next(keys), HID_DIM // 2, 1)
    p['t_w3'], p['t_b3'] = W.astype(bf16), b
    # genes head, stored transposed (column form) for in-kernel use
    W, b = dense(next(keys), NUM_GENE, NUM_GENE // 2)
    p['g_w1t'], p['g_b1'] = W.T.astype(bf16), b.T
    W, b = dense(next(keys), NUM_GENE // 2, NUM_GENE // 2)
    p['g_w2t'], p['g_b2'] = W.T.astype(bf16), b.T
    W, b = dense(next(keys), NUM_GENE // 2, 1)
    p['g_w3t'], p['g_b3'] = W.T.astype(bf16), b.T
    return p


# ------------------------------ full forward -----------------------------------
def multidcp_ehill_forward(params, atom_feats, input_gene, mask,
                           input_cell_gex, input_pert_idose, job_id='perturbed'):
    B, A, F = atom_feats.shape
    G = NUM_GENE

    mask3 = mask.reshape(B, 1, A).astype(jnp.float32)
    cell3 = input_cell_gex.reshape(B, 1, CELL_ID_INPUT_DIM)
    pert3 = input_pert_idose.reshape(B, 1, PERT_IDOSE_INPUT_DIM)

    weight_names = ['fp_w', 'fp_b', 'ge_w', 'ge_b',
                    'attn_w', 'attn_b', 'ln_g', 'ln_b',
                    'pf_w1', 'pf_b1', 'pf_w2', 'pf_b2',
                    'ce_w1', 'ce_b1', 'ce_w2', 'ce_b2', 'ce_w3', 'ce_b3',
                    'pi_w', 'pi_b',
                    'l1_wa', 'l1_wb', 'l1_wc', 'l1_wd', 'l1_b']
    if job_id == 'perturbed':
        weight_names += ['lf_w', 'lf_b']
        out_rows = G
    else:
        weight_names += ['t_w1', 't_b1', 't_w2', 't_b2', 't_w3', 't_b3',
                         'g_w1t', 'g_b1', 'g_w2t', 'g_b2', 'g_w3t', 'g_b3']
        out_rows = 1
    weights = [params[n] for n in weight_names]

    def rep_spec(a):
        if a.ndim == 2:
            return pl.BlockSpec(a.shape, lambda b: (0, 0))
        return pl.BlockSpec(a.shape, lambda b: (0, 0, 0))

    in_specs = [
        pl.BlockSpec((1, A, F), lambda b: (b, 0, 0)),
        pl.BlockSpec((1, 1, A), lambda b: (b, 0, 0)),
        pl.BlockSpec((G, GENE_INPUT_DIM), lambda b: (0, 0)),
        pl.BlockSpec((1, 1, CELL_ID_INPUT_DIM), lambda b: (b, 0, 0)),
        pl.BlockSpec((1, 1, PERT_IDOSE_INPUT_DIM), lambda b: (b, 0, 0)),
    ] + [rep_spec(w) for w in weights]

    out_shape = (jax.ShapeDtypeStruct((B, out_rows, 1), jnp.float32),
                 jax.ShapeDtypeStruct((B, 1, CELL_ID_EMB_DIM), jnp.float32))
    out_specs = (pl.BlockSpec((1, out_rows, 1), lambda b: (b, 0, 0)),
                 pl.BlockSpec((1, 1, CELL_ID_EMB_DIM), lambda b: (b, 0, 0)))

    kernel = _make_forward_kernel(job_id)
    out, cell_hidden = pl.pallas_call(
        kernel,
        out_shape=out_shape,
        grid=(B,),
        in_specs=in_specs,
        out_specs=out_specs,
        compiler_params=pltpu.CompilerParams(dimension_semantics=("parallel",)),
    )(atom_feats, mask3, input_gene, cell3, pert3, *weights)

    out = out.reshape(B, out_rows)
    cell_hidden = cell_hidden.reshape(B, CELL_ID_EMB_DIM)
    return out, cell_hidden


# ----------------------------------- main ---------------------------------------
if __name__ == "__main__":
    key = jax.random.PRNGKey(0)
    pkey, dkey = jax.random.split(key)
    params = init_params(pkey)

    ks = jax.random.split(dkey, 4)
    atom_feats = jax.random.normal(ks[0], (BATCH, NUM_ATOMS, ATOM_FEAT_DIM), jnp.float32)
    input_gene = jax.random.normal(ks[1], (NUM_GENE, GENE_INPUT_DIM), jnp.float32)
    # atom padding mask (second molecule has 3 padded atoms)
    valid = jnp.array([[NUM_ATOMS], [NUM_ATOMS - 3]], jnp.int32)
    mask = (jnp.arange(NUM_ATOMS)[None, :] < valid).astype(jnp.float32)   # (B, A)
    input_cell_gex = jax.random.normal(ks[2], (BATCH, CELL_ID_INPUT_DIM), jnp.float32)
    input_pert_idose = jax.random.normal(ks[3], (BATCH, PERT_IDOSE_INPUT_DIM), jnp.float32)

    fwd_perturbed = jax.jit(functools.partial(multidcp_ehill_forward, job_id='perturbed'))
    fwd_ehill = jax.jit(functools.partial(multidcp_ehill_forward, job_id='ehill'))

    out_p, cell_hidden = fwd_perturbed(params, atom_feats, input_gene, mask,
                                       input_cell_gex, input_pert_idose)
    out_e, _ = fwd_ehill(params, atom_feats, input_gene, mask,
                         input_cell_gex, input_pert_idose)
    jax.block_until_ready((out_p, out_e, cell_hidden))

    assert out_p.shape == (BATCH, NUM_GENE)
    assert out_e.shape == (BATCH, 1)
    assert cell_hidden.shape == (BATCH, CELL_ID_EMB_DIM)
    assert jnp.all(jnp.isfinite(out_p)) and jnp.all(jnp.isfinite(out_e))
    print("KERNEL_OK")
</pallas_src>

<mosaic_0001>
module attributes {stable_mosaic.version = 11 : i64} {
  func.func @kernel(%arg0: i32, %arg1: memref<1x10x16xf32, #tpu.memory_space<vmem>>, %arg2: memref<1x1x10xf32, #tpu.memory_space<vmem>>, %arg3: memref<16x8xf32, #tpu.memory_space<vmem>>, %arg4: memref<1x1x64xf32, #tpu.memory_space<vmem>>, %arg5: memref<1x1x4xf32, #tpu.memory_space<vmem>>, %arg6: memref<16x32xbf16, #tpu.memory_space<vmem>>, %arg7: memref<1x32xf32, #tpu.memory_space<vmem>>, %arg8: memref<8x32xbf16, #tpu.memory_space<vmem>>, %arg9: memref<1x32xf32, #tpu.memory_space<vmem>>, %arg10: memref<16x32x32xbf16, #tpu.memory_space<vmem>>, %arg11: memref<16x1x32xf32, #tpu.memory_space<vmem>>, %arg12: memref<6x1x32xf32, #tpu.memory_space<vmem>>, %arg13: memref<6x1x32xf32, #tpu.memory_space<vmem>>, %arg14: memref<2x32x512xbf16, #tpu.memory_space<vmem>>, %arg15: memref<2x1x512xf32, #tpu.memory_space<vmem>>, %arg16: memref<2x512x32xbf16, #tpu.memory_space<vmem>>, %arg17: memref<2x1x32xf32, #tpu.memory_space<vmem>>, %arg18: memref<64x200xbf16, #tpu.memory_space<vmem>>, %arg19: memref<1x200xf32, #tpu.memory_space<vmem>>, %arg20: memref<200x100xbf16, #tpu.memory_space<vmem>>, %arg21: memref<1x100xf32, #tpu.memory_space<vmem>>, %arg22: memref<100x50xbf16, #tpu.memory_space<vmem>>, %arg23: memref<1x50xf32, #tpu.memory_space<vmem>>, %arg24: memref<4x8xbf16, #tpu.memory_space<vmem>>, %arg25: memref<1x8xf32, #tpu.memory_space<vmem>>, %arg26: memref<32x32xbf16, #tpu.memory_space<vmem>>, %arg27: memref<32x32xbf16, #tpu.memory_space<vmem>>, %arg28: memref<50x32xbf16, #tpu.memory_space<vmem>>, %arg29: memref<8x32xbf16, #tpu.memory_space<vmem>>, %arg30: memref<1x32xf32, #tpu.memory_space<vmem>>, %arg31: memref<32x1xbf16, #tpu.memory_space<vmem>>, %arg32: memref<1x1xf32, #tpu.memory_space<vmem>>, %arg33: memref<1x16x1xf32, #tpu.memory_space<vmem>>, %arg34: memref<1x1x50xf32, #tpu.memory_space<vmem>>) attributes {dimension_semantics = [#tpu.dimension_semantics<parallel>], iteration_bounds = array<i64: 2>, scalar_prefetch = 0 : i64, scratch_operands = 0 : i64, tpu.core_type = #tpu.core_type<tc>, window_params = [{transform_indices = @transform_0, window_bounds = array<i64: 1, 10, 16>}, {transform_indices = @transform_1, window_bounds = array<i64: 1, 1, 10>}, {pipeline_mode = #tpu.pipeline_mode<synchronous>, transform_indices = @transform_2, window_bounds = array<i64: 16, 8>}, {transform_indices = @transform_3, window_bounds = array<i64: 1, 1, 64>}, {transform_indices = @transform_4, window_bounds = array<i64: 1, 1, 4>}, {pipeline_mode = #tpu.pipeline_mode<synchronous>, transform_indices = @transform_5, window_bounds = array<i64: 16, 32>}, {pipeline_mode = #tpu.pipeline_mode<synchronous>, transform_indices = @transform_6, window_bounds = array<i64: 1, 32>}, {pipeline_mode = #tpu.pipeline_mode<synchronous>, transform_indices = @transform_7, window_bounds = array<i64: 8, 32>}, {pipeline_mode = #tpu.pipeline_mode<synchronous>, transform_indices = @transform_8, window_bounds = array<i64: 1, 32>}, {pipeline_mode = #tpu.pipeline_mode<synchronous>, transform_indices = @transform_9, window_bounds = array<i64: 16, 32, 32>}, {pipeline_mode = #tpu.pipeline_mode<synchronous>, transform_indices = @transform_10, window_bounds = array<i64: 16, 1, 32>}, {pipeline_mode = #tpu.pipeline_mode<synchronous>, transform_indices = @transform_11, window_bounds = array<i64: 6, 1, 32>}, {pipeline_mode = #tpu.pipeline_mode<synchronous>, transform_indices = @transform_12, window_bounds = array<i64: 6, 1, 32>}, {pipeline_mode = #tpu.pipeline_mode<synchronous>, transform_indices = @transform_13, window_bounds = array<i64: 2, 32, 512>}, {pipeline_mode = #tpu.pipeline_mode<synchronous>, transform_indices = @transform_14, window_bounds = array<i64: 2, 1, 512>}, {pipeline_mode = #tpu.pipeline_mode<synchronous>, transform_indices = @transform_15, window_bounds = array<i64: 2, 512, 32>}, {pipeline_mode = #tpu.pipeline_mode<synchronous>, transform_indices = @transform_16, window_bounds = array<i64: 2, 1, 32>}, {pipeline_mode = #tpu.pipeline_mode<synchronous>, transform_indices = @transform_17, window_bounds = array<i64: 64, 200>}, {pipeline_mode = #tpu.pipeline_mode<synchronous>, transform_indices = @transform_18, window_bounds = array<i64: 1, 200>}, {pipeline_mode = #tpu.pipeline_mode<synchronous>, transform_indices = @transform_19, window_bounds = array<i64: 200, 100>}, {pipeline_mode = #tpu.pipeline_mode<synchronous>, transform_indices = @transform_20, window_bounds = array<i64: 1, 100>}, {pipeline_mode = #tpu.pipeline_mode<synchronous>, transform_indices = @transform_21, window_bounds = array<i64: 100, 50>}, {pipeline_mode = #tpu.pipeline_mode<synchronous>, transform_indices = @transform_22, window_bounds = array<i64: 1, 50>}, {pipeline_mode = #tpu.pipeline_mode<synchronous>, transform_indices = @transform_23, window_bounds = array<i64: 4, 8>}, {pipeline_mode = #tpu.pipeline_mode<synchronous>, transform_indices = @transform_24, window_bounds = array<i64: 1, 8>}, {pipeline_mode = #tpu.pipeline_mode<synchronous>, transform_indices = @transform_25, window_bounds = array<i64: 32, 32>}, {pipeline_mode = #tpu.pipeline_mode<synchronous>, transform_indices = @transform_26, window_bounds = array<i64: 32, 32>}, {pipeline_mode = #tpu.pipeline_mode<synchronous>, transform_indices = @transform_27, window_bounds = array<i64: 50, 32>}, {pipeline_mode = #tpu.pipeline_mode<synchronous>, transform_indices = @transform_28, window_bounds = array<i64: 8, 32>}, {pipeline_mode = #tpu.pipeline_mode<synchronous>, transform_indices = @transform_29, window_bounds = array<i64: 1, 32>}, {pipeline_mode = #tpu.pipeline_mode<synchronous>, transform_indices = @transform_30, window_bounds = array<i64: 32, 1>}, {pipeline_mode = #tpu.pipeline_mode<synchronous>, transform_indices = @transform_31, window_bounds = array<i64: 1, 1>}, {transform_indices = @transform_32, window_bounds = array<i64: 1, 16, 1>}, {transform_indices = @transform_33, window_bounds = array<i64: 1, 1, 50>}]} {
    %0 = tpu.iota {dimensions = array<i32: 1>} : vector<1x32xi32>
    %c0_i32 = arith.constant 0 : i32
    %1 = vector.broadcast %c0_i32 : i32 to vector<1x32xi32>
    %2 = arith.cmpi sge, %0, %1 : vector<1x32xi32>
    %c8_i32 = arith.constant 8 : i32
    %3 = vector.broadcast %c8_i32 : i32 to vector<1x32xi32>
    %4 = arith.cmpi slt, %0, %3 : vector<1x32xi32>
    %5 = arith.andi %2, %4 : vector<1x32xi1>
    %6 = arith.extui %5 : vector<1x32xi1> to vector<1x32xi32>
    %7 = arith.sitofp %6 : vector<1x32xi32> to vector<1x32xf32>
    %c8_i32_0 = arith.constant 8 : i32
    %8 = vector.broadcast %c8_i32_0 : i32 to vector<1x32xi32>
    %9 = arith.cmpi sge, %0, %8 : vector<1x32xi32>
    %c16_i32 = arith.constant 16 : i32
    %10 = vector.broadcast %c16_i32 : i32 to vector<1x32xi32>
    %11 = arith.cmpi slt, %0, %10 : vector<1x32xi32>
    %12 = arith.andi %9, %11 : vector<1x32xi1>
    %13 = arith.extui %12 : vector<1x32xi1> to vector<1x32xi32>
    %14 = arith.sitofp %13 : vector<1x32xi32> to vector<1x32xf32>
    %c16_i32_1 = arith.constant 16 : i32
    %15 = vector.broadcast %c16_i32_1 : i32 to vector<1x32xi32>
    %16 = arith.cmpi sge, %0, %15 : vector<1x32xi32>
    %c24_i32 = arith.constant 24 : i32
    %17 = vector.broadcast %c24_i32 : i32 to vector<1x32xi32>
    %18 = arith.cmpi slt, %0, %17 : vector<1x32xi32>
    %19 = arith.andi %16, %18 : vector<1x32xi1>
    %20 = arith.extui %19 : vector<1x32xi1> to vector<1x32xi32>
    %21 = arith.sitofp %20 : vector<1x32xi32> to vector<1x32xf32>
    %c24_i32_2 = arith.constant 24 : i32
    %22 = vector.broadcast %c24_i32_2 : i32 to vector<1x32xi32>
    %23 = arith.cmpi sge, %0, %22 : vector<1x32xi32>
    %c32_i32 = arith.constant 32 : i32
    %24 = vector.broadcast %c32_i32 : i32 to vector<1x32xi32>
    %25 = arith.cmpi slt, %0, %24 : vector<1x32xi32>
    %26 = arith.andi %23, %25 : vector<1x32xi1>
    %27 = arith.extui %26 : vector<1x32xi1> to vector<1x32xi32>
    %28 = arith.sitofp %27 : vector<1x32xi32> to vector<1x32xf32>
    %c0 = arith.constant 0 : index
    %c0_3 = arith.constant 0 : index
    %c0_4 = arith.constant 0 : index
    %29 = vector.load %arg1[%c0, %c0_3, %c0_4] : memref<1x10x16xf32, #tpu.memory_space<vmem>>, vector<1x10x16xf32>
    %30 = vector.shape_cast %29 : vector<1x10x16xf32> to vector<10x16xf32>
    %c0_5 = arith.constant 0 : index
    %c0_6 = arith.constant 0 : index
    %31 = vector.load %arg6[%c0_5, %c0_6] : memref<16x32xbf16, #tpu.memory_space<vmem>>, vector<16x32xbf16>
    %32 = arith.truncf %30 : vector<10x16xf32> to vector<10x16xbf16>
    %cst = arith.constant dense<0.000000e+00> : vector<10x32xf32>
    %33 = tpu.matmul %32, %31, %cst {dimension_numbers = #tpu.dot_dimension_numbers<[1], [0], [0], [1], [0, 0, 1, 1], [], []>} : vector<10x16xbf16>, vector<16x32xbf16>, vector<10x32xf32> -> vector<10x32xf32>
    %c0_7 = arith.constant 0 : index
    %c0_8 = arith.constant 0 : index
    %34 = vector.load %arg7[%c0_7, %c0_8] : memref<1x32xf32, #tpu.memory_space<vmem>>, vector<1x32xf32>
    %35 = vector.broadcast %34 : vector<1x32xf32> to vector<10x32xf32>
    %36 = arith.addf %33, %35 : vector<10x32xf32>
    %cst_9 = arith.constant 0.000000e+00 : f32
    %37 = vector.broadcast %cst_9 : f32 to vector<10x32xf32>
    %38 = arith.maximumf %36, %37 : vector<10x32xf32>
    %cst_10 = arith.constant dense<0.000000e+00> : vector<32xf32>
    %39 = vector.multi_reduction <add>, %38, %cst_10 [0] : vector<10x32xf32> to vector<32xf32>
    %40 = vector.shape_cast %39 : vector<32xf32> to vector<1x32xf32>
    %c0_11 = arith.constant 0 : index
    %c0_12 = arith.constant 0 : index
    %41 = vector.load %arg3[%c0_11, %c0_12] : memref<16x8xf32, #tpu.memory_space<vmem>>, vector<16x8xf32>
    %c0_13 = arith.constant 0 : index
    %c0_14 = arith.constant 0 : index
    %42 = vector.load %arg8[%c0_13, %c0_14] : memref<8x32xbf16, #tpu.memory_space<vmem>>, vector<8x32xbf16>
    %43 = arith.truncf %41 : vector<16x8xf32> to vector<16x8xbf16>
    %cst_15 = arith.constant dense<0.000000e+00> : vector<16x32xf32>
    %44 = tpu.matmul %43, %42, %cst_15 {dimension_numbers = #tpu.dot_dimension_numbers<[1], [0], [0], [1], [0, 0, 1, 1], [], []>} : vector<16x8xbf16>, vector<8x32xbf16>, vector<16x32xf32> -> vector<16x32xf32>
    %c0_16 = arith.constant 0 : index
    %c0_17 = arith.constant 0 : index
    %45 = vector.load %arg9[%c0_16, %c0_17] : memref<1x32xf32, #tpu.memory_space<vmem>>, vector<1x32xf32>
    %46 = vector.broadcast %45 : vector<1x32xf32> to vector<16x32xf32>
    %47 = arith.addf %44, %46 : vector<16x32xf32>
    %c0_18 = arith.constant 0 : index
    %c0_19 = arith.constant 0 : index
    %c0_20 = arith.constant 0 : index
    %48 = vector.load %arg2[%c0_18, %c0_19, %c0_20] : memref<1x1x10xf32, #tpu.memory_space<vmem>>, vector<1x1x10xf32>
    %49 = vector.shape_cast %48 : vector<1x1x10xf32> to vector<1x10xf32>
    %cst_21 = arith.constant 0.000000e+00 : f32
    %50 = vector.broadcast %cst_21 : f32 to vector<1x10xf32>
    %51 = arith.cmpf ogt, %49, %50 : vector<1x10xf32>
    %cst_22 = arith.constant 0.000000e+00 : f32
    %cst_23 = arith.constant -1.000000e+09 : f32
    %52 = vector.broadcast %cst_22 : f32 to vector<1x10xf32>
    %53 = vector.broadcast %cst_23 : f32 to vector<1x10xf32>
    %54 = arith.select %51, %52, %53 : vector<1x10xi1>, vector<1x10xf32>
    %c0_24 = arith.constant 0 : index
    %c0_25 = arith.constant 0 : index
    %c0_26 = arith.constant 0 : index
    %55 = vector.load %arg10[%c0_24, %c0_25, %c0_26] : memref<16x32x32xbf16, #tpu.memory_space<vmem>>, vector<1x32x32xbf16>
    %56 = vector.shape_cast %55 : vector<1x32x32xbf16> to vector<32x32xbf16>
    %57 = arith.truncf %47 : vector<16x32xf32> to vector<16x32xbf16>
    %cst_27 = arith.constant dense<0.000000e+00> : vector<16x32xf32>
    %58 = tpu.matmul %57, %56, %cst_27 {dimension_numbers = #tpu.dot_dimension_numbers<[1], [0], [0], [1], [0, 0, 1, 1], [], []>} : vector<16x32xbf16>, vector<32x32xbf16>, vector<16x32xf32> -> vector<16x32xf32>
    %c0_28 = arith.constant 0 : index
    %c0_29 = arith.constant 0 : index
    %c0_30 = arith.constant 0 : index
    %59 = vector.load %arg11[%c0_28, %c0_29, %c0_30] : memref<16x1x32xf32, #tpu.memory_space<vmem>>, vector<1x1x32xf32>
    %60 = vector.shape_cast %59 : vector<1x1x32xf32> to vector<1x32xf32>
    %61 = vector.broadcast %60 : vector<1x32xf32> to vector<16x32xf32>
    %62 = arith.addf %58, %61 : vector<16x32xf32>
    %c1 = arith.constant 1 : index
    %c0_31 = arith.constant 0 : index
    %c0_32 = arith.constant 0 : index
    %63 = vector.load %arg10[%c1, %c0_31, %c0_32] : memref<16x32x32xbf16, #tpu.memory_space<vmem>>, vector<1x32x32xbf16>
    %64 = vector.shape_cast %63 : vector<1x32x32xbf16> to vector<32x32xbf16>
    %65 = arith.truncf %47 : vector<16x32xf32> to vector<16x32xbf16>
    %cst_33 = arith.constant dense<0.000000e+00> : vector<16x32xf32>
    %66 = tpu.matmul %65, %64, %cst_33 {dimension_numbers = #tpu.dot_dimension_numbers<[1], [0], [0], [1], [0, 0, 1, 1], [], []>} : vector<16x32xbf16>, vector<32x32xbf16>, vector<16x32xf32> -> vector<16x32xf32>
    %c1_34 = arith.constant 1 : index
    %c0_35 = arith.constant 0 : index
    %c0_36 = arith.constant 0 : index
    %67 = vector.load %arg11[%c1_34, %c0_35, %c0_36] : memref<16x1x32xf32, #tpu.memory_space<vmem>>, vector<1x1x32xf32>
    %68 = vector.shape_cast %67 : vector<1x1x32xf32> to vector<1x32xf32>
    %69 = vector.broadcast %68 : vector<1x32xf32> to vector<16x32xf32>
    %70 = arith.addf %66, %69 : vector<16x32xf32>
    %c2 = arith.constant 2 : index
    %c0_37 = arith.constant 0 : index
    %c0_38 = arith.constant 0 : index
    %71 = vector.load %arg10[%c2, %c0_37, %c0_38] : memref<16x32x32xbf16, #tpu.memory_space<vmem>>, vector<1x32x32xbf16>
    %72 = vector.shape_cast %71 : vector<1x32x32xbf16> to vector<32x32xbf16>
    %73 = arith.truncf %47 : vector<16x32xf32> to vector<16x32xbf16>
    %cst_39 = arith.constant dense<0.000000e+00> : vector<16x32xf32>
    %74 = tpu.matmul %73, %72, %cst_39 {dimension_numbers = #tpu.dot_dimension_numbers<[1], [0], [0], [1], [0, 0, 1, 1], [], []>} : vector<16x32xbf16>, vector<32x32xbf16>, vector<16x32xf32> -> vector<16x32xf32>
    %c2_40 = arith.constant 2 : index
    %c0_41 = arith.constant 0 : index
    %c0_42 = arith.constant 0 : index
    %75 = vector.load %arg11[%c2_40, %c0_41, %c0_42] : memref<16x1x32xf32, #tpu.memory_space<vmem>>, vector<1x1x32xf32>
    %76 = vector.shape_cast %75 : vector<1x1x32xf32> to vector<1x32xf32>
    %77 = vector.broadcast %76 : vector<1x32xf32> to vector<16x32xf32>
    %78 = arith.addf %74, %77 : vector<16x32xf32>
    %cst_43 = arith.constant 0.353553385 : f32
    %79 = vector.broadcast %cst_43 : f32 to vector<16x32xf32>
    %80 = arith.mulf %62, %79 : vector<16x32xf32>
    %81 = vector.broadcast %7 : vector<1x32xf32> to vector<16x32xf32>
    %82 = arith.mulf %80, %81 : vector<16x32xf32>
    %cst_44 = arith.constant dense<0.000000e+00> : vector<16x16xf32>
    %83 = tpu.matmul %82, %70, %cst_44 {dimension_numbers = #tpu.dot_dimension_numbers<[1], [1], [0], [0], [0, 0, 1, 0], [], []>} : vector<16x32xf32>, vector<16x32xf32>, vector<16x16xf32> -> vector<16x16xf32>
    %cst_45 = arith.constant dense<0xFF800000> : vector<16xf32>
    %84 = vector.multi_reduction <maximumf>, %83, %cst_45 [1] : vector<16x16xf32> to vector<16xf32>
    %85 = vector.shape_cast %84 : vector<16xf32> to vector<16x1xf32>
    %86 = vector.broadcast %85 : vector<16x1xf32> to vector<16x16xf32>
    %87 = arith.subf %83, %86 : vector<16x16xf32>
    %88 = math.exp %87 : vector<16x16xf32>
    %cst_46 = arith.constant dense<0.000000e+00> : vector<16xf32>
    %89 = vector.multi_reduction <add>, %88, %cst_46 [1] : vector<16x16xf32> to vector<16xf32>
    %90 = vector.shape_cast %89 : vector<16xf32> to vector<16x1xf32>
    %91 = tpu.reciprocal %90 {approx = true} : vector<16x1xf32> -> vector<16x1xf32>
    %92 = vector.broadcast %91 : vector<16x1xf32> to vector<16x16xf32>
    %93 = arith.mulf %88, %92 : vector<16x16xf32>
    %94 = vector.broadcast %7 : vector<1x32xf32> to vector<16x32xf32>
    %95 = arith.mulf %78, %94 : vector<16x32xf32>
    %cst_47 = arith.constant dense<0.000000e+00> : vector<16x32xf32>
    %96 = tpu.matmul %93, %95, %cst_47 {dimension_numbers = #tpu.dot_dimension_numbers<[1], [0], [0], [1], [0, 0, 1, 1], [], []>} : vector<16x16xf32>, vector<16x32xf32>, vector<16x32xf32> -> vector<16x32xf32>
    %97 = vector.broadcast %14 : vector<1x32xf32> to vector<16x32xf32>
    %98 = arith.mulf %80, %97 : vector<16x32xf32>
    %cst_48 = arith.constant dense<0.000000e+00> : vector<16x16xf32>
    %99 = tpu.matmul %98, %70, %cst_48 {dimension_numbers = #tpu.dot_dimension_numbers<[1], [1], [0], [0], [0, 0, 1, 0], [], []>} : vector<16x32xf32>, vector<16x32xf32>, vector<16x16xf32> -> vector<16x16xf32>
    %cst_49 = arith.constant dense<0xFF800000> : vector<16xf32>
    %100 = vector.multi_reduction <maximumf>, %99, %cst_49 [1] : vector<16x16xf32> to vector<16xf32>
    %101 = vector.shape_cast %100 : vector<16xf32> to vector<16x1xf32>
    %102 = vector.broadcast %101 : vector<16x1xf32> to vector<16x16xf32>
    %103 = arith.subf %99, %102 : vector<16x16xf32>
    %104 = math.exp %103 : vector<16x16xf32>
    %cst_50 = arith.constant dense<0.000000e+00> : vector<16xf32>
    %105 = vector.multi_reduction <add>, %104, %cst_50 [1] : vector<16x16xf32> to vector<16xf32>
    %106 = vector.shape_cast %105 : vector<16xf32> to vector<16x1xf32>
    %107 = tpu.reciprocal %106 {approx = true} : vector<16x1xf32> -> vector<16x1xf32>
    %108 = vector.broadcast %107 : vector<16x1xf32> to vector<16x16xf32>
    %109 = arith.mulf %104, %108 : vector<16x16xf32>
    %110 = vector.broadcast %14 : vector<1x32xf32> to vector<16x32xf32>
    %111 = arith.mulf %78, %110 : vector<16x32xf32>
    %cst_51 = arith.constant dense<0.000000e+00> : vector<16x32xf32>
    %112 = tpu.matmul %109, %111, %cst_51 {dimension_numbers = #tpu.dot_dimension_numbers<[1], [0], [0], [1], [0, 0, 1, 1], [], []>} : vector<16x16xf32>, vector<16x32xf32>, vector<16x32xf32> -> vector<16x32xf32>
    %113 = arith.addf %96, %112 : vector<16x32xf32>
    %114 = vector.broadcast %21 : vector<1x32xf32> to vector<16x32xf32>
    %115 = arith.mulf %80, %114 : vector<16x32xf32>
    %cst_52 = arith.constant dense<0.000000e+00> : vector<16x16xf32>
    %116 = tpu.matmul %115, %70, %cst_52 {dimension_numbers = #tpu.dot_dimension_numbers<[1], [1], [0], [0], [0, 0, 1, 0], [], []>} : vector<16x32xf32>, vector<16x32xf32>, vector<16x16xf32> -> vector<16x16xf32>
    %cst_53 = arith.constant dense<0xFF800000> : vector<16xf32>
    %117 = vector.multi_reduction <maximumf>, %116, %cst_53 [1] : vector<16x16xf32> to vector<16xf32>
    %118 = vector.shape_cast %117 : vector<16xf32> to vector<16x1xf32>
    %119 = vector.broadcast %118 : vector<16x1xf32> to vector<16x16xf32>
    %120 = arith.subf %116, %119 : vector<16x16xf32>
    %121 = math.exp %120 : vector<16x16xf32>
    %cst_54 = arith.constant dense<0.000000e+00> : vector<16xf32>
    %122 = vector.multi_reduction <add>, %121, %cst_54 [1] : vector<16x16xf32> to vector<16xf32>
    %123 = vector.shape_cast %122 : vector<16xf32> to vector<16x1xf32>
    %124 = tpu.reciprocal %123 {approx = true} : vector<16x1xf32> -> vector<16x1xf32>
    %125 = vector.broadcast %124 : vector<16x1xf32> to vector<16x16xf32>
    %126 = arith.mulf %121, %125 : vector<16x16xf32>
    %127 = vector.broadcast %21 : vector<1x32xf32> to vector<16x32xf32>
    %128 = arith.mulf %78, %127 : vector<16x32xf32>
    %cst_55 = arith.constant dense<0.000000e+00> : vector<16x32xf32>
    %129 = tpu.matmul %126, %128, %cst_55 {dimension_numbers = #tpu.dot_dimension_numbers<[1], [0], [0], [1], [0, 0, 1, 1], [], []>} : vector<16x16xf32>, vector<16x32xf32>, vector<16x32xf32> -> vector<16x32xf32>
    %130 = arith.addf %113, %129 : vector<16x32xf32>
    %131 = vector.broadcast %28 : vector<1x32xf32> to vector<16x32xf32>
    %132 = arith.mulf %80, %131 : vector<16x32xf32>
    %cst_56 = arith.constant dense<0.000000e+00> : vector<16x16xf32>
    %133 = tpu.matmul %132, %70, %cst_56 {dimension_numbers = #tpu.dot_dimension_numbers<[1], [1], [0], [0], [0, 0, 1, 0], [], []>} : vector<16x32xf32>, vector<16x32xf32>, vector<16x16xf32> -> vector<16x16xf32>
    %cst_57 = arith.constant dense<0xFF800000> : vector<16xf32>
    %134 = vector.multi_reduction <maximumf>, %133, %cst_57 [1] : vector<16x16xf32> to vector<16xf32>
    %135 = vector.shape_cast %134 : vector<16xf32> to vector<16x1xf32>
    %136 = vector.broadcast %135 : vector<16x1xf32> to vector<16x16xf32>
    %137 = arith.subf %133, %136 : vector<16x16xf32>
    %138 = math.exp %137 : vector<16x16xf32>
    %cst_58 = arith.constant dense<0.000000e+00> : vector<16xf32>
    %139 = vector.multi_reduction <add>, %138, %cst_58 [1] : vector<16x16xf32> to vector<16xf32>
    %140 = vector.shape_cast %139 : vector<16xf32> to vector<16x1xf32>
    %141 = tpu.reciprocal %140 {approx = true} : vector<16x1xf32> -> vector<16x1xf32>
    %142 = vector.broadcast %141 : vector<16x1xf32> to vector<16x16xf32>
    %143 = arith.mulf %138, %142 : vector<16x16xf32>
    %144 = vector.broadcast %28 : vector<1x32xf32> to vector<16x32xf32>
    %145 = arith.mulf %78, %144 : vector<16x32xf32>
    %cst_59 = arith.constant dense<0.000000e+00> : vector<16x32xf32>
    %146 = tpu.matmul %143, %145, %cst_59 {dimension_numbers = #tpu.dot_dimension_numbers<[1], [0], [0], [1], [0, 0, 1, 1], [], []>} : vector<16x16xf32>, vector<16x32xf32>, vector<16x32xf32> -> vector<16x32xf32>
    %147 = arith.addf %130, %146 : vector<16x32xf32>
    %c3 = arith.constant 3 : index
    %c0_60 = arith.constant 0 : index
    %c0_61 = arith.constant 0 : index
    %148 = vector.load %arg10[%c3, %c0_60, %c0_61] : memref<16x32x32xbf16, #tpu.memory_space<vmem>>, vector<1x32x32xbf16>
    %149 = vector.shape_cast %148 : vector<1x32x32xbf16> to vector<32x32xbf16>
    %150 = arith.truncf %147 : vector<16x32xf32> to vector<16x32xbf16>
    %cst_62 = arith.constant dense<0.000000e+00> : vector<16x32xf32>
    %151 = tpu.matmul %150, %149, %cst_62 {dimension_numbers = #tpu.dot_dimension_numbers<[1], [0], [0], [1], [0, 0, 1, 1], [], []>} : vector<16x32xbf16>, vector<32x32xbf16>, vector<16x32xf32> -> vector<16x32xf32>
    %c3_63 = arith.constant 3 : index
    %c0_64 = arith.constant 0 : index
    %c0_65 = arith.constant 0 : index
    %152 = vector.load %arg11[%c3_63, %c0_64, %c0_65] : memref<16x1x32xf32, #tpu.memory_space<vmem>>, vector<1x1x32xf32>
    %153 = vector.shape_cast %152 : vector<1x1x32xf32> to vector<1x32xf32>
    %154 = vector.broadcast %153 : vector<1x32xf32> to vector<16x32xf32>
    %155 = arith.addf %151, %154 : vector<16x32xf32>
    %156 = arith.addf %47, %155 : vector<16x32xf32>
    %cst_66 = arith.constant dense<0.000000e+00> : vector<16xf32>
    %157 = vector.multi_reduction <add>, %156, %cst_66 [1] : vector<16x32xf32> to vector<16xf32>
    %158 = vector.shape_cast %157 : vector<16xf32> to vector<16x1xf32>
    %cst_67 = arith.constant 3.200000e+01 : f32
    %159 = vector.broadcast %cst_67 : f32 to vector<16x1xf32>
    %160 = arith.divf %158, %159 : vector<16x1xf32>
    %161 = vector.broadcast %160 : vector<16x1xf32> to vector<16x32xf32>
    %162 = arith.subf %156, %161 : vector<16x32xf32>
    %163 = arith.mulf %162, %162 : vector<16x32xf32>
    %cst_68 = arith.constant dense<0.000000e+00> : vector<16xf32>
    %164 = vector.multi_reduction <add>, %163, %cst_68 [1] : vector<16x32xf32> to vector<16xf32>
    %165 = vector.shape_cast %164 : vector<16xf32> to vector<16x1xf32>
    %cst_69 = arith.constant 3.200000e+01 : f32
    %166 = vector.broadcast %cst_69 : f32 to vector<16x1xf32>
    %167 = arith.divf %165, %166 : vector<16x1xf32>
    %168 = vector.broadcast %160 : vector<16x1xf32> to vector<16x32xf32>
    %169 = arith.subf %156, %168 : vector<16x32xf32>
    %cst_70 = arith.constant 9.99999974E-6 : f32
    %170 = vector.broadcast %cst_70 : f32 to vector<16x1xf32>
    %171 = arith.addf %167, %170 : vector<16x1xf32>
    %172 = math.rsqrt %171 : vector<16x1xf32>
    %173 = vector.broadcast %172 : vector<16x1xf32> to vector<16x32xf32>
    %174 = arith.mulf %169, %173 : vector<16x32xf32>
    %c0_71 = arith.constant 0 : index
    %c0_72 = arith.constant 0 : index
    %c0_73 = arith.constant 0 : index
    %175 = vector.load %arg12[%c0_71, %c0_72, %c0_73] : memref<6x1x32xf32, #tpu.memory_space<vmem>>, vector<1x1x32xf32>
    %176 = vector.shape_cast %175 : vector<1x1x32xf32> to vector<1x32xf32>
    %177 = vector.broadcast %176 : vector<1x32xf32> to vector<16x32xf32>
    %178 = arith.mulf %174, %177 : vector<16x32xf32>
    %c0_74 = arith.constant 0 : index
    %c0_75 = arith.constant 0 : index
    %c0_76 = arith.constant 0 : index
    %179 = vector.load %arg13[%c0_74, %c0_75, %c0_76] : memref<6x1x32xf32, #tpu.memory_space<vmem>>, vector<1x1x32xf32>
    %180 = vector.shape_cast %179 : vector<1x1x32xf32> to vector<1x32xf32>
    %181 = vector.broadcast %180 : vector<1x32xf32> to vector<16x32xf32>
    %182 = arith.addf %178, %181 : vector<16x32xf32>
    %c4 = arith.constant 4 : index
    %c0_77 = arith.constant 0 : index
    %c0_78 = arith.constant 0 : index
    %183 = vector.load %arg10[%c4, %c0_77, %c0_78] : memref<16x32x32xbf16, #tpu.memory_space<vmem>>, vector<1x32x32xbf16>
    %184 = vector.shape_cast %183 : vector<1x32x32xbf16> to vector<32x32xbf16>
    %185 = arith.truncf %182 : vector<16x32xf32> to vector<16x32xbf16>
    %cst_79 = arith.constant dense<0.000000e+00> : vector<16x32xf32>
    %186 = tpu.matmul %185, %184, %cst_79 {dimension_numbers = #tpu.dot_dimension_numbers<[1], [0], [0], [1], [0, 0, 1, 1], [], []>} : vector<16x32xbf16>, vector<32x32xbf16>, vector<16x32xf32> -> vector<16x32xf32>
    %c4_80 = arith.constant 4 : index
    %c0_81 = arith.constant 0 : index
    %c0_82 = arith.constant 0 : index
    %187 = vector.load %arg11[%c4_80, %c0_81, %c0_82] : memref<16x1x32xf32, #tpu.memory_space<vmem>>, vector<1x1x32xf32>
    %188 = vector.shape_cast %187 : vector<1x1x32xf32> to vector<1x32xf32>
    %189 = vector.broadcast %188 : vector<1x32xf32> to vector<16x32xf32>
    %190 = arith.addf %186, %189 : vector<16x32xf32>
    %c5 = arith.constant 5 : index
    %c0_83 = arith.constant 0 : index
    %c0_84 = arith.constant 0 : index
    %191 = vector.load %arg10[%c5, %c0_83, %c0_84] : memref<16x32x32xbf16, #tpu.memory_space<vmem>>, vector<1x32x32xbf16>
    %192 = vector.shape_cast %191 : vector<1x32x32xbf16> to vector<32x32xbf16>
    %193 = arith.truncf %38 : vector<10x32xf32> to vector<10x32xbf16>
    %cst_85 = arith.constant dense<0.000000e+00> : vector<10x32xf32>
    %194 = tpu.matmul %193, %192, %cst_85 {dimension_numbers = #tpu.dot_dimension_numbers<[1], [0], [0], [1], [0, 0, 1, 1], [], []>} : vector<10x32xbf16>, vector<32x32xbf16>, vector<10x32xf32> -> vector<10x32xf32>
    %c5_86 = arith.constant 5 : index
    %c0_87 = arith.constant 0 : index
    %c0_88 = arith.constant 0 : index
    %195 = vector.load %arg11[%c5_86, %c0_87, %c0_88] : memref<16x1x32xf32, #tpu.memory_space<vmem>>, vector<1x1x32xf32>
    %196 = vector.shape_cast %195 : vector<1x1x32xf32> to vector<1x32xf32>
    %197 = vector.broadcast %196 : vector<1x32xf32> to vector<10x32xf32>
    %198 = arith.addf %194, %197 : vector<10x32xf32>
    %c6 = arith.constant 6 : index
    %c0_89 = arith.constant 0 : index
    %c0_90 = arith.constant 0 : index
    %199 = vector.load %arg10[%c6, %c0_89, %c0_90] : memref<16x32x32xbf16, #tpu.memory_space<vmem>>, vector<1x32x32xbf16>
    %200 = vector.shape_cast %199 : vector<1x32x32xbf16> to vector<32x32xbf16>
    %201 = arith.truncf %38 : vector<10x32xf32> to vector<10x32xbf16>
    %cst_91 = arith.constant dense<0.000000e+00> : vector<10x32xf32>
    %202 = tpu.matmul %201, %200, %cst_91 {dimension_numbers = #tpu.dot_dimension_numbers<[1], [0], [0], [1], [0, 0, 1, 1], [], []>} : vector<10x32xbf16>, vector<32x32xbf16>, vector<10x32xf32> -> vector<10x32xf32>
    %c6_92 = arith.constant 6 : index
    %c0_93 = arith.constant 0 : index
    %c0_94 = arith.constant 0 : index
    %203 = vector.load %arg11[%c6_92, %c0_93, %c0_94] : memref<16x1x32xf32, #tpu.memory_space<vmem>>, vector<1x1x32xf32>
    %204 = vector.shape_cast %203 : vector<1x1x32xf32> to vector<1x32xf32>
    %205 = vector.broadcast %204 : vector<1x32xf32> to vector<10x32xf32>
    %206 = arith.addf %202, %205 : vector<10x32xf32>
    %cst_95 = arith.constant 0.353553385 : f32
    %207 = vector.broadcast %cst_95 : f32 to vector<16x32xf32>
    %208 = arith.mulf %190, %207 : vector<16x32xf32>
    %209 = vector.broadcast %7 : vector<1x32xf32> to vector<16x32xf32>
    %210 = arith.mulf %208, %209 : vector<16x32xf32>
    %cst_96 = arith.constant dense<0.000000e+00> : vector<16x10xf32>
    %211 = tpu.matmul %210, %198, %cst_96 {dimension_numbers = #tpu.dot_dimension_numbers<[1], [1], [0], [0], [0, 0, 1, 0], [], []>} : vector<16x32xf32>, vector<10x32xf32>, vector<16x10xf32> -> vector<16x10xf32>
    %212 = vector.broadcast %54 : vector<1x10xf32> to vector<16x10xf32>
    %213 = arith.addf %211, %212 : vector<16x10xf32>
    %cst_97 = arith.constant dense<0xFF800000> : vector<16xf32>
    %214 = vector.multi_reduction <maximumf>, %213, %cst_97 [1] : vector<16x10xf32> to vector<16xf32>
    %215 = vector.shape_cast %214 : vector<16xf32> to vector<16x1xf32>
    %216 = vector.broadcast %215 : vector<16x1xf32> to vector<16x10xf32>
    %217 = arith.subf %213, %216 : vector<16x10xf32>
    %218 = math.exp %217 : vector<16x10xf32>
    %cst_98 = arith.constant dense<0.000000e+00> : vector<16xf32>
    %219 = vector.multi_reduction <add>, %218, %cst_98 [1] : vector<16x10xf32> to vector<16xf32>
    %220 = vector.shape_cast %219 : vector<16xf32> to vector<16x1xf32>
    %221 = tpu.reciprocal %220 {approx = true} : vector<16x1xf32> -> vector<16x1xf32>
    %222 = vector.broadcast %221 : vector<16x1xf32> to vector<16x10xf32>
    %223 = arith.mulf %218, %222 : vector<16x10xf32>
    %224 = vector.broadcast %7 : vector<1x32xf32> to vector<10x32xf32>
    %225 = arith.mulf %206, %224 : vector<10x32xf32>
    %cst_99 = arith.constant dense<0.000000e+00> : vector<16x32xf32>
    %226 = tpu.matmul %223, %225, %cst_99 {dimension_numbers = #tpu.dot_dimension_numbers<[1], [0], [0], [1], [0, 0, 1, 1], [], []>} : vector<16x10xf32>, vector<10x32xf32>, vector<16x32xf32> -> vector<16x32xf32>
    %227 = vector.broadcast %14 : vector<1x32xf32> to vector<16x32xf32>
    %228 = arith.mulf %208, %227 : vector<16x32xf32>
    %cst_100 = arith.constant dense<0.000000e+00> : vector<16x10xf32>
    %229 = tpu.matmul %228, %198, %cst_100 {dimension_numbers = #tpu.dot_dimension_numbers<[1], [1], [0], [0], [0, 0, 1, 0], [], []>} : vector<16x32xf32>, vector<10x32xf32>, vector<16x10xf32> -> vector<16x10xf32>
    %230 = vector.broadcast %54 : vector<1x10xf32> to vector<16x10xf32>
    %231 = arith.addf %229, %230 : vector<16x10xf32>
    %cst_101 = arith.constant dense<0xFF800000> : vector<16xf32>
    %232 = vector.multi_reduction <maximumf>, %231, %cst_101 [1] : vector<16x10xf32> to vector<16xf32>
    %233 = vector.shape_cast %232 : vector<16xf32> to vector<16x1xf32>
    %234 = vector.broadcast %233 : vector<16x1xf32> to vector<16x10xf32>
    %235 = arith.subf %231, %234 : vector<16x10xf32>
    %236 = math.exp %235 : vector<16x10xf32>
    %cst_102 = arith.constant dense<0.000000e+00> : vector<16xf32>
    %237 = vector.multi_reduction <add>, %236, %cst_102 [1] : vector<16x10xf32> to vector<16xf32>
    %238 = vector.shape_cast %237 : vector<16xf32> to vector<16x1xf32>
    %239 = tpu.reciprocal %238 {approx = true} : vector<16x1xf32> -> vector<16x1xf32>
    %240 = vector.broadcast %239 : vector<16x1xf32> to vector<16x10xf32>
    %241 = arith.mulf %236, %240 : vector<16x10xf32>
    %242 = vector.broadcast %14 : vector<1x32xf32> to vector<10x32xf32>
    %243 = arith.mulf %206, %242 : vector<10x32xf32>
    %cst_103 = arith.constant dense<0.000000e+00> : vector<16x32xf32>
    %244 = tpu.matmul %241, %243, %cst_103 {dimension_numbers = #tpu.dot_dimension_numbers<[1], [0], [0], [1], [0, 0, 1, 1], [], []>} : vector<16x10xf32>, vector<10x32xf32>, vector<16x32xf32> -> vector<16x32xf32>
    %245 = arith.addf %226, %244 : vector<16x32xf32>
    %246 = vector.broadcast %21 : vector<1x32xf32> to vector<16x32xf32>
    %247 = arith.mulf %208, %246 : vector<16x32xf32>
    %cst_104 = arith.constant dense<0.000000e+00> : vector<16x10xf32>
    %248 = tpu.matmul %247, %198, %cst_104 {dimension_numbers = #tpu.dot_dimension_numbers<[1], [1], [0], [0], [0, 0, 1, 0], [], []>} : vector<16x32xf32>, vector<10x32xf32>, vector<16x10xf32> -> vector<16x10xf32>
    %249 = vector.broadcast %54 : vector<1x10xf32> to vector<16x10xf32>
    %250 = arith.addf %248, %249 : vector<16x10xf32>
    %cst_105 = arith.constant dense<0xFF800000> : vector<16xf32>
    %251 = vector.multi_reduction <maximumf>, %250, %cst_105 [1] : vector<16x10xf32> to vector<16xf32>
    %252 = vector.shape_cast %251 : vector<16xf32> to vector<16x1xf32>
    %253 = vector.broadcast %252 : vector<16x1xf32> to vector<16x10xf32>
    %254 = arith.subf %250, %253 : vector<16x10xf32>
    %255 = math.exp %254 : vector<16x10xf32>
    %cst_106 = arith.constant dense<0.000000e+00> : vector<16xf32>
    %256 = vector.multi_reduction <add>, %255, %cst_106 [1] : vector<16x10xf32> to vector<16xf32>
    %257 = vector.shape_cast %256 : vector<16xf32> to vector<16x1xf32>
    %258 = tpu.reciprocal %257 {approx = true} : vector<16x1xf32> -> vector<16x1xf32>
    %259 = vector.broadcast %258 : vector<16x1xf32> to vector<16x10xf32>
    %260 = arith.mulf %255, %259 : vector<16x10xf32>
    %261 = vector.broadcast %21 : vector<1x32xf32> to vector<10x32xf32>
    %262 = arith.mulf %206, %261 : vector<10x32xf32>
    %cst_107 = arith.constant dense<0.000000e+00> : vector<16x32xf32>
    %263 = tpu.matmul %260, %262, %cst_107 {dimension_numbers = #tpu.dot_dimension_numbers<[1], [0], [0], [1], [0, 0, 1, 1], [], []>} : vector<16x10xf32>, vector<10x32xf32>, vector<16x32xf32> -> vector<16x32xf32>
    %264 = arith.addf %245, %263 : vector<16x32xf32>
    %265 = vector.broadcast %28 : vector<1x32xf32> to vector<16x32xf32>
    %266 = arith.mulf %208, %265 : vector<16x32xf32>
    %cst_108 = arith.constant dense<0.000000e+00> : vector<16x10xf32>
    %267 = tpu.matmul %266, %198, %cst_108 {dimension_numbers = #tpu.dot_dimension_numbers<[1], [1], [0], [0], [0, 0, 1, 0], [], []>} : vector<16x32xf32>, vector<10x32xf32>, vector<16x10xf32> -> vector<16x10xf32>
    %268 = vector.broadcast %54 : vector<1x10xf32> to vector<16x10xf32>
    %269 = arith.addf %267, %268 : vector<16x10xf32>
    %cst_109 = arith.constant dense<0xFF800000> : vector<16xf32>
    %270 = vector.multi_reduction <maximumf>, %269, %cst_109 [1] : vector<16x10xf32> to vector<16xf32>
    %271 = vector.shape_cast %270 : vector<16xf32> to vector<16x1xf32>
    %272 = vector.broadcast %271 : vector<16x1xf32> to vector<16x10xf32>
    %273 = arith.subf %269, %272 : vector<16x10xf32>
    %274 = math.exp %273 : vector<16x10xf32>
    %cst_110 = arith.constant dense<0.000000e+00> : vector<16xf32>
    %275 = vector.multi_reduction <add>, %274, %cst_110 [1] : vector<16x10xf32> to vector<16xf32>
    %276 = vector.shape_cast %275 : vector<16xf32> to vector<16x1xf32>
    %277 = tpu.reciprocal %276 {approx = true} : vector<16x1xf32> -> vector<16x1xf32>
    %278 = vector.broadcast %277 : vector<16x1xf32> to vector<16x10xf32>
    %279 = arith.mulf %274, %278 : vector<16x10xf32>
    %280 = vector.broadcast %28 : vector<1x32xf32> to vector<10x32xf32>
    %281 = arith.mulf %206, %280 : vector<10x32xf32>
    %cst_111 = arith.constant dense<0.000000e+00> : vector<16x32xf32>
    %282 = tpu.matmul %279, %281, %cst_111 {dimension_numbers = #tpu.dot_dimension_numbers<[1], [0], [0], [1], [0, 0, 1, 1], [], []>} : vector<16x10xf32>, vector<10x32xf32>, vector<16x32xf32> -> vector<16x32xf32>
    %283 = arith.addf %264, %282 : vector<16x32xf32>
    %c7 = arith.constant 7 : index
    %c0_112 = arith.constant 0 : index
    %c0_113 = arith.constant 0 : index
    %284 = vector.load %arg10[%c7, %c0_112, %c0_113] : memref<16x32x32xbf16, #tpu.memory_space<vmem>>, vector<1x32x32xbf16>
    %285 = vector.shape_cast %284 : vector<1x32x32xbf16> to vector<32x32xbf16>
    %286 = arith.truncf %283 : vector<16x32xf32> to vector<16x32xbf16>
    %cst_114 = arith.constant dense<0.000000e+00> : vector<16x32xf32>
    %287 = tpu.matmul %286, %285, %cst_114 {dimension_numbers = #tpu.dot_dimension_numbers<[1], [0], [0], [1], [0, 0, 1, 1], [], []>} : vector<16x32xbf16>, vector<32x32xbf16>, vector<16x32xf32> -> vector<16x32xf32>
    %c7_115 = arith.constant 7 : index
    %c0_116 = arith.constant 0 : index
    %c0_117 = arith.constant 0 : index
    %288 = vector.load %arg11[%c7_115, %c0_116, %c0_117] : memref<16x1x32xf32, #tpu.memory_space<vmem>>, vector<1x1x32xf32>
    %289 = vector.shape_cast %288 : vector<1x1x32xf32> to vector<1x32xf32>
    %290 = vector.broadcast %289 : vector<1x32xf32> to vector<16x32xf32>
    %291 = arith.addf %287, %290 : vector<16x32xf32>
    %292 = arith.addf %182, %291 : vector<16x32xf32>
    %cst_118 = arith.constant dense<0.000000e+00> : vector<16xf32>
    %293 = vector.multi_reduction <add>, %292, %cst_118 [1] : vector<16x32xf32> to vector<16xf32>
    %294 = vector.shape_cast %293 : vector<16xf32> to vector<16x1xf32>
    %cst_119 = arith.constant 3.200000e+01 : f32
    %295 = vector.broadcast %cst_119 : f32 to vector<16x1xf32>
    %296 = arith.divf %294, %295 : vector<16x1xf32>
    %297 = vector.broadcast %296 : vector<16x1xf32> to vector<16x32xf32>
    %298 = arith.subf %292, %297 : vector<16x32xf32>
    %299 = arith.mulf %298, %298 : vector<16x32xf32>
    %cst_120 = arith.constant dense<0.000000e+00> : vector<16xf32>
    %300 = vector.multi_reduction <add>, %299, %cst_120 [1] : vector<16x32xf32> to vector<16xf32>
    %301 = vector.shape_cast %300 : vector<16xf32> to vector<16x1xf32>
    %cst_121 = arith.constant 3.200000e+01 : f32
    %302 = vector.broadcast %cst_121 : f32 to vector<16x1xf32>
    %303 = arith.divf %301, %302 : vector<16x1xf32>
    %304 = vector.broadcast %296 : vector<16x1xf32> to vector<16x32xf32>
    %305 = arith.subf %292, %304 : vector<16x32xf32>
    %cst_122 = arith.constant 9.99999974E-6 : f32
    %306 = vector.broadcast %cst_122 : f32 to vector<16x1xf32>
    %307 = arith.addf %303, %306 : vector<16x1xf32>
    %308 = math.rsqrt %307 : vector<16x1xf32>
    %309 = vector.broadcast %308 : vector<16x1xf32> to vector<16x32xf32>
    %310 = arith.mulf %305, %309 : vector<16x32xf32>
    %c1_123 = arith.constant 1 : index
    %c0_124 = arith.constant 0 : index
    %c0_125 = arith.constant 0 : index
    %311 = vector.load %arg12[%c1_123, %c0_124, %c0_125] : memref<6x1x32xf32, #tpu.memory_space<vmem>>, vector<1x1x32xf32>
    %312 = vector.shape_cast %311 : vector<1x1x32xf32> to vector<1x32xf32>
    %313 = vector.broadcast %312 : vector<1x32xf32> to vector<16x32xf32>
    %314 = arith.mulf %310, %313 : vector<16x32xf32>
    %c1_126 = arith.constant 1 : index
    %c0_127 = arith.constant 0 : index
    %c0_128 = arith.constant 0 : index
    %315 = vector.load %arg13[%c1_126, %c0_127, %c0_128] : memref<6x1x32xf32, #tpu.memory_space<vmem>>, vector<1x1x32xf32>
    %316 = vector.shape_cast %315 : vector<1x1x32xf32> to vector<1x32xf32>
    %317 = vector.broadcast %316 : vector<1x32xf32> to vector<16x32xf32>
    %318 = arith.addf %314, %317 : vector<16x32xf32>
    %c0_129 = arith.constant 0 : index
    %c0_130 = arith.constant 0 : index
    %c0_131 = arith.constant 0 : index
    %319 = vector.load %arg14[%c0_129, %c0_130, %c0_131] : memref<2x32x512xbf16, #tpu.memory_space<vmem>>, vector<1x32x512xbf16>
    %320 = vector.shape_cast %319 : vector<1x32x512xbf16> to vector<32x512xbf16>
    %321 = arith.truncf %318 : vector<16x32xf32> to vector<16x32xbf16>
    %cst_132 = arith.constant dense<0.000000e+00> : vector<16x512xf32>
    %322 = tpu.matmul %321, %320, %cst_132 {dimension_numbers = #tpu.dot_dimension_numbers<[1], [0], [0], [1], [0, 0, 1, 1], [], []>} : vector<16x32xbf16>, vector<32x512xbf16>, vector<16x512xf32> -> vector<16x512xf32>
    %c0_133 = arith.constant 0 : index
    %c0_134 = arith.constant 0 : index
    %c0_135 = arith.constant 0 : index
    %323 = vector.load %arg15[%c0_133, %c0_134, %c0_135] : memref<2x1x512xf32, #tpu.memory_space<vmem>>, vector<1x1x512xf32>
    %324 = vector.shape_cast %323 : vector<1x1x512xf32> to vector<1x512xf32>
    %325 = vector.broadcast %324 : vector<1x512xf32> to vector<16x512xf32>
    %326 = arith.addf %322, %325 : vector<16x512xf32>
    %cst_136 = arith.constant 0.000000e+00 : f32
    %327 = vector.broadcast %cst_136 : f32 to vector<16x512xf32>
    %328 = arith.maximumf %326, %327 : vector<16x512xf32>
    %c0_137 = arith.constant 0 : index
    %c0_138 = arith.constant 0 : index
    %c0_139 = arith.constant 0 : index
    %329 = vector.load %arg16[%c0_137, %c0_138, %c0_139] : memref<2x512x32xbf16, #tpu.memory_space<vmem>>, vector<1x512x32xbf16>
    %330 = vector.shape_cast %329 : vector<1x512x32xbf16> to vector<512x32xbf16>
    %331 = arith.truncf %328 : vector<16x512xf32> to vector<16x512xbf16>
    %cst_140 = arith.constant dense<0.000000e+00> : vector<16x32xf32>
    %332 = tpu.matmul %331, %330, %cst_140 {dimension_numbers = #tpu.dot_dimension_numbers<[1], [0], [0], [1], [0, 0, 1, 1], [], []>} : vector<16x512xbf16>, vector<512x32xbf16>, vector<16x32xf32> -> vector<16x32xf32>
    %c0_141 = arith.constant 0 : index
    %c0_142 = arith.constant 0 : index
    %c0_143 = arith.constant 0 : index
    %333 = vector.load %arg17[%c0_141, %c0_142, %c0_143] : memref<2x1x32xf32, #tpu.memory_space<vmem>>, vector<1x1x32xf32>
    %334 = vector.shape_cast %333 : vector<1x1x32xf32> to vector<1x32xf32>
    %335 = vector.broadcast %334 : vector<1x32xf32> to vector<16x32xf32>
    %336 = arith.addf %332, %335 : vector<16x32xf32>
    %337 = arith.addf %318, %336 : vector<16x32xf32>
    %cst_144 = arith.constant dense<0.000000e+00> : vector<16xf32>
    %338 = vector.multi_reduction <add>, %337, %cst_144 [1] : vector<16x32xf32> to vector<16xf32>
    %339 = vector.shape_cast %338 : vector<16xf32> to vector<16x1xf32>
    %cst_145 = arith.constant 3.200000e+01 : f32
    %340 = vector.broadcast %cst_145 : f32 to vector<16x1xf32>
    %341 = arith.divf %339, %340 : vector<16x1xf32>
    %342 = vector.broadcast %341 : vector<16x1xf32> to vector<16x32xf32>
    %343 = arith.subf %337, %342 : vector<16x32xf32>
    %344 = arith.mulf %343, %343 : vector<16x32xf32>
    %cst_146 = arith.constant dense<0.000000e+00> : vector<16xf32>
    %345 = vector.multi_reduction <add>, %344, %cst_146 [1] : vector<16x32xf32> to vector<16xf32>
    %346 = vector.shape_cast %345 : vector<16xf32> to vector<16x1xf32>
    %cst_147 = arith.constant 3.200000e+01 : f32
    %347 = vector.broadcast %cst_147 : f32 to vector<16x1xf32>
    %348 = arith.divf %346, %347 : vector<16x1xf32>
    %349 = vector.broadcast %341 : vector<16x1xf32> to vector<16x32xf32>
    %350 = arith.subf %337, %349 : vector<16x32xf32>
    %cst_148 = arith.constant 9.99999974E-6 : f32
    %351 = vector.broadcast %cst_148 : f32 to vector<16x1xf32>
    %352 = arith.addf %348, %351 : vector<16x1xf32>
    %353 = math.rsqrt %352 : vector<16x1xf32>
    %354 = vector.broadcast %353 : vector<16x1xf32> to vector<16x32xf32>
    %355 = arith.mulf %350, %354 : vector<16x32xf32>
    %c2_149 = arith.constant 2 : index
    %c0_150 = arith.constant 0 : index
    %c0_151 = arith.constant 0 : index
    %356 = vector.load %arg12[%c2_149, %c0_150, %c0_151] : memref<6x1x32xf32, #tpu.memory_space<vmem>>, vector<1x1x32xf32>
    %357 = vector.shape_cast %356 : vector<1x1x32xf32> to vector<1x32xf32>
    %358 = vector.broadcast %357 : vector<1x32xf32> to vector<16x32xf32>
    %359 = arith.mulf %355, %358 : vector<16x32xf32>
    %c2_152 = arith.constant 2 : index
    %c0_153 = arith.constant 0 : index
    %c0_154 = arith.constant 0 : index
    %360 = vector.load %arg13[%c2_152, %c0_153, %c0_154] : memref<6x1x32xf32, #tpu.memory_space<vmem>>, vector<1x1x32xf32>
    %361 = vector.shape_cast %360 : vector<1x1x32xf32> to vector<1x32xf32>
    %362 = vector.broadcast %361 : vector<1x32xf32> to vector<16x32xf32>
    %363 = arith.addf %359, %362 : vector<16x32xf32>
    %c8 = arith.constant 8 : index
    %c0_155 = arith.constant 0 : index
    %c0_156 = arith.constant 0 : index
    %364 = vector.load %arg10[%c8, %c0_155, %c0_156] : memref<16x32x32xbf16, #tpu.memory_space<vmem>>, vector<1x32x32xbf16>
    %365 = vector.shape_cast %364 : vector<1x32x32xbf16> to vector<32x32xbf16>
    %366 = arith.truncf %363 : vector<16x32xf32> to vector<16x32xbf16>
    %cst_157 = arith.constant dense<0.000000e+00> : vector<16x32xf32>
    %367 = tpu.matmul %366, %365, %cst_157 {dimension_numbers = #tpu.dot_dimension_numbers<[1], [0], [0], [1], [0, 0, 1, 1], [], []>} : vector<16x32xbf16>, vector<32x32xbf16>, vector<16x32xf32> -> vector<16x32xf32>
    %c8_158 = arith.constant 8 : index
    %c0_159 = arith.constant 0 : index
    %c0_160 = arith.constant 0 : index
    %368 = vector.load %arg11[%c8_158, %c0_159, %c0_160] : memref<16x1x32xf32, #tpu.memory_space<vmem>>, vector<1x1x32xf32>
    %369 = vector.shape_cast %368 : vector<1x1x32xf32> to vector<1x32xf32>
    %370 = vector.broadcast %369 : vector<1x32xf32> to vector<16x32xf32>
    %371 = arith.addf %367, %370 : vector<16x32xf32>
    %c9 = arith.constant 9 : index
    %c0_161 = arith.constant 0 : index
    %c0_162 = arith.constant 0 : index
    %372 = vector.load %arg10[%c9, %c0_161, %c0_162] : memref<16x32x32xbf16, #tpu.memory_space<vmem>>, vector<1x32x32xbf16>
    %373 = vector.shape_cast %372 : vector<1x32x32xbf16> to vector<32x32xbf16>
    %374 = arith.truncf %363 : vector<16x32xf32> to vector<16x32xbf16>
    %cst_163 = arith.constant dense<0.000000e+00> : vector<16x32xf32>
    %375 = tpu.matmul %374, %373, %cst_163 {dimension_numbers = #tpu.dot_dimension_numbers<[1], [0], [0], [1], [0, 0, 1, 1], [], []>} : vector<16x32xbf16>, vector<32x32xbf16>, vector<16x32xf32> -> vector<16x32xf32>
    %c9_164 = arith.constant 9 : index
    %c0_165 = arith.constant 0 : index
    %c0_166 = arith.constant 0 : index
    %376 = vector.load %arg11[%c9_164, %c0_165, %c0_166] : memref<16x1x32xf32, #tpu.memory_space<vmem>>, vector<1x1x32xf32>
    %377 = vector.shape_cast %376 : vector<1x1x32xf32> to vector<1x32xf32>
    %378 = vector.broadcast %377 : vector<1x32xf32> to vector<16x32xf32>
    %379 = arith.addf %375, %378 : vector<16x32xf32>
    %c10 = arith.constant 10 : index
    %c0_167 = arith.constant 0 : index
    %c0_168 = arith.constant 0 : index
    %380 = vector.load %arg10[%c10, %c0_167, %c0_168] : memref<16x32x32xbf16, #tpu.memory_space<vmem>>, vector<1x32x32xbf16>
    %381 = vector.shape_cast %380 : vector<1x32x32xbf16> to vector<32x32xbf16>
    %382 = arith.truncf %363 : vector<16x32xf32> to vector<16x32xbf16>
    %cst_169 = arith.constant dense<0.000000e+00> : vector<16x32xf32>
    %383 = tpu.matmul %382, %381, %cst_169 {dimension_numbers = #tpu.dot_dimension_numbers<[1], [0], [0], [1], [0, 0, 1, 1], [], []>} : vector<16x32xbf16>, vector<32x32xbf16>, vector<16x32xf32> -> vector<16x32xf32>
    %c10_170 = arith.constant 10 : index
    %c0_171 = arith.constant 0 : index
    %c0_172 = arith.constant 0 : index
    %384 = vector.load %arg11[%c10_170, %c0_171, %c0_172] : memref<16x1x32xf32, #tpu.memory_space<vmem>>, vector<1x1x32xf32>
    %385 = vector.shape_cast %384 : vector<1x1x32xf32> to vector<1x32xf32>
    %386 = vector.broadcast %385 : vector<1x32xf32> to vector<16x32xf32>
    %387 = arith.addf %383, %386 : vector<16x32xf32>
    %cst_173 = arith.constant 0.353553385 : f32
    %388 = vector.broadcast %cst_173 : f32 to vector<16x32xf32>
    %389 = arith.mulf %371, %388 : vector<16x32xf32>
    %390 = vector.broadcast %7 : vector<1x32xf32> to vector<16x32xf32>
    %391 = arith.mulf %389, %390 : vector<16x32xf32>
    %cst_174 = arith.constant dense<0.000000e+00> : vector<16x16xf32>
    %392 = tpu.matmul %391, %379, %cst_174 {dimension_numbers = #tpu.dot_dimension_numbers<[1], [1], [0], [0], [0, 0, 1, 0], [], []>} : vector<16x32xf32>, vector<16x32xf32>, vector<16x16xf32> -> vector<16x16xf32>
    %cst_175 = arith.constant dense<0xFF800000> : vector<16xf32>
    %393 = vector.multi_reduction <maximumf>, %392, %cst_175 [1] : vector<16x16xf32> to vector<16xf32>
    %394 = vector.shape_cast %393 : vector<16xf32> to vector<16x1xf32>
    %395 = vector.broadcast %394 : vector<16x1xf32> to vector<16x16xf32>
    %396 = arith.subf %392, %395 : vector<16x16xf32>
    %397 = math.exp %396 : vector<16x16xf32>
    %cst_176 = arith.constant dense<0.000000e+00> : vector<16xf32>
    %398 = vector.multi_reduction <add>, %397, %cst_176 [1] : vector<16x16xf32> to vector<16xf32>
    %399 = vector.shape_cast %398 : vector<16xf32> to vector<16x1xf32>
    %400 = tpu.reciprocal %399 {approx = true} : vector<16x1xf32> -> vector<16x1xf32>
    %401 = vector.broadcast %400 : vector<16x1xf32> to vector<16x16xf32>
    %402 = arith.mulf %397, %401 : vector<16x16xf32>
    %403 = vector.broadcast %7 : vector<1x32xf32> to vector<16x32xf32>
    %404 = arith.mulf %387, %403 : vector<16x32xf32>
    %cst_177 = arith.constant dense<0.000000e+00> : vector<16x32xf32>
    %405 = tpu.matmul %402, %404, %cst_177 {dimension_numbers = #tpu.dot_dimension_numbers<[1], [0], [0], [1], [0, 0, 1, 1], [], []>} : vector<16x16xf32>, vector<16x32xf32>, vector<16x32xf32> -> vector<16x32xf32>
    %406 = vector.broadcast %14 : vector<1x32xf32> to vector<16x32xf32>
    %407 = arith.mulf %389, %406 : vector<16x32xf32>
    %cst_178 = arith.constant dense<0.000000e+00> : vector<16x16xf32>
    %408 = tpu.matmul %407, %379, %cst_178 {dimension_numbers = #tpu.dot_dimension_numbers<[1], [1], [0], [0], [0, 0, 1, 0], [], []>} : vector<16x32xf32>, vector<16x32xf32>, vector<16x16xf32> -> vector<16x16xf32>
    %cst_179 = arith.constant dense<0xFF800000> : vector<16xf32>
    %409 = vector.multi_reduction <maximumf>, %408, %cst_179 [1] : vector<16x16xf32> to vector<16xf32>
    %410 = vector.shape_cast %409 : vector<16xf32> to vector<16x1xf32>
    %411 = vector.broadcast %410 : vector<16x1xf32> to vector<16x16xf32>
    %412 = arith.subf %408, %411 : vector<16x16xf32>
    %413 = math.exp %412 : vector<16x16xf32>
    %cst_180 = arith.constant dense<0.000000e+00> : vector<16xf32>
    %414 = vector.multi_reduction <add>, %413, %cst_180 [1] : vector<16x16xf32> to vector<16xf32>
    %415 = vector.shape_cast %414 : vector<16xf32> to vector<16x1xf32>
    %416 = tpu.reciprocal %415 {approx = true} : vector<16x1xf32> -> vector<16x1xf32>
    %417 = vector.broadcast %416 : vector<16x1xf32> to vector<16x16xf32>
    %418 = arith.mulf %413, %417 : vector<16x16xf32>
    %419 = vector.broadcast %14 : vector<1x32xf32> to vector<16x32xf32>
    %420 = arith.mulf %387, %419 : vector<16x32xf32>
    %cst_181 = arith.constant dense<0.000000e+00> : vector<16x32xf32>
    %421 = tpu.matmul %418, %420, %cst_181 {dimension_numbers = #tpu.dot_dimension_numbers<[1], [0], [0], [1], [0, 0, 1, 1], [], []>} : vector<16x16xf32>, vector<16x32xf32>, vector<16x32xf32> -> vector<16x32xf32>
    %422 = arith.addf %405, %421 : vector<16x32xf32>
    %423 = vector.broadcast %21 : vector<1x32xf32> to vector<16x32xf32>
    %424 = arith.mulf %389, %423 : vector<16x32xf32>
    %cst_182 = arith.constant dense<0.000000e+00> : vector<16x16xf32>
    %425 = tpu.matmul %424, %379, %cst_182 {dimension_numbers = #tpu.dot_dimension_numbers<[1], [1], [0], [0], [0, 0, 1, 0], [], []>} : vector<16x32xf32>, vector<16x32xf32>, vector<16x16xf32> -> vector<16x16xf32>
    %cst_183 = arith.constant dense<0xFF800000> : vector<16xf32>
    %426 = vector.multi_reduction <maximumf>, %425, %cst_183 [1] : vector<16x16xf32> to vector<16xf32>
    %427 = vector.shape_cast %426 : vector<16xf32> to vector<16x1xf32>
    %428 = vector.broadcast %427 : vector<16x1xf32> to vector<16x16xf32>
    %429 = arith.subf %425, %428 : vector<16x16xf32>
    %430 = math.exp %429 : vector<16x16xf32>
    %cst_184 = arith.constant dense<0.000000e+00> : vector<16xf32>
    %431 = vector.multi_reduction <add>, %430, %cst_184 [1] : vector<16x16xf32> to vector<16xf32>
    %432 = vector.shape_cast %431 : vector<16xf32> to vector<16x1xf32>
    %433 = tpu.reciprocal %432 {approx = true} : vector<16x1xf32> -> vector<16x1xf32>
    %434 = vector.broadcast %433 : vector<16x1xf32> to vector<16x16xf32>
    %435 = arith.mulf %430, %434 : vector<16x16xf32>
    %436 = vector.broadcast %21 : vector<1x32xf32> to vector<16x32xf32>
    %437 = arith.mulf %387, %436 : vector<16x32xf32>
    %cst_185 = arith.constant dense<0.000000e+00> : vector<16x32xf32>
    %438 = tpu.matmul %435, %437, %cst_185 {dimension_numbers = #tpu.dot_dimension_numbers<[1], [0], [0], [1], [0, 0, 1, 1], [], []>} : vector<16x16xf32>, vector<16x32xf32>, vector<16x32xf32> -> vector<16x32xf32>
    %439 = arith.addf %422, %438 : vector<16x32xf32>
    %440 = vector.broadcast %28 : vector<1x32xf32> to vector<16x32xf32>
    %441 = arith.mulf %389, %440 : vector<16x32xf32>
    %cst_186 = arith.constant dense<0.000000e+00> : vector<16x16xf32>
    %442 = tpu.matmul %441, %379, %cst_186 {dimension_numbers = #tpu.dot_dimension_numbers<[1], [1], [0], [0], [0, 0, 1, 0], [], []>} : vector<16x32xf32>, vector<16x32xf32>, vector<16x16xf32> -> vector<16x16xf32>
    %cst_187 = arith.constant dense<0xFF800000> : vector<16xf32>
    %443 = vector.multi_reduction <maximumf>, %442, %cst_187 [1] : vector<16x16xf32> to vector<16xf32>
    %444 = vector.shape_cast %443 : vector<16xf32> to vector<16x1xf32>
    %445 = vector.broadcast %444 : vector<16x1xf32> to vector<16x16xf32>
    %446 = arith.subf %442, %445 : vector<16x16xf32>
    %447 = math.exp %446 : vector<16x16xf32>
    %cst_188 = arith.constant dense<0.000000e+00> : vector<16xf32>
    %448 = vector.multi_reduction <add>, %447, %cst_188 [1] : vector<16x16xf32> to vector<16xf32>
    %449 = vector.shape_cast %448 : vector<16xf32> to vector<16x1xf32>
    %450 = tpu.reciprocal %449 {approx = true} : vector<16x1xf32> -> vector<16x1xf32>
    %451 = vector.broadcast %450 : vector<16x1xf32> to vector<16x16xf32>
    %452 = arith.mulf %447, %451 : vector<16x16xf32>
    %453 = vector.broadcast %28 : vector<1x32xf32> to vector<16x32xf32>
    %454 = arith.mulf %387, %453 : vector<16x32xf32>
    %cst_189 = arith.constant dense<0.000000e+00> : vector<16x32xf32>
    %455 = tpu.matmul %452, %454, %cst_189 {dimension_numbers = #tpu.dot_dimension_numbers<[1], [0], [0], [1], [0, 0, 1, 1], [], []>} : vector<16x16xf32>, vector<16x32xf32>, vector<16x32xf32> -> vector<16x32xf32>
    %456 = arith.addf %439, %455 : vector<16x32xf32>
    %c11 = arith.constant 11 : index
    %c0_190 = arith.constant 0 : index
    %c0_191 = arith.constant 0 : index
    %457 = vector.load %arg10[%c11, %c0_190, %c0_191] : memref<16x32x32xbf16, #tpu.memory_space<vmem>>, vector<1x32x32xbf16>
    %458 = vector.shape_cast %457 : vector<1x32x32xbf16> to vector<32x32xbf16>
    %459 = arith.truncf %456 : vector<16x32xf32> to vector<16x32xbf16>
    %cst_192 = arith.constant dense<0.000000e+00> : vector<16x32xf32>
    %460 = tpu.matmul %459, %458, %cst_192 {dimension_numbers = #tpu.dot_dimension_numbers<[1], [0], [0], [1], [0, 0, 1, 1], [], []>} : vector<16x32xbf16>, vector<32x32xbf16>, vector<16x32xf32> -> vector<16x32xf32>
    %c11_193 = arith.constant 11 : index
    %c0_194 = arith.constant 0 : index
    %c0_195 = arith.constant 0 : index
    %461 = vector.load %arg11[%c11_193, %c0_194, %c0_195] : memref<16x1x32xf32, #tpu.memory_space<vmem>>, vector<1x1x32xf32>
    %462 = vector.shape_cast %461 : vector<1x1x32xf32> to vector<1x32xf32>
    %463 = vector.broadcast %462 : vector<1x32xf32> to vector<16x32xf32>
    %464 = arith.addf %460, %463 : vector<16x32xf32>
    %465 = arith.addf %363, %464 : vector<16x32xf32>
    %cst_196 = arith.constant dense<0.000000e+00> : vector<16xf32>
    %466 = vector.multi_reduction <add>, %465, %cst_196 [1] : vector<16x32xf32> to vector<16xf32>
    %467 = vector.shape_cast %466 : vector<16xf32> to vector<16x1xf32>
    %cst_197 = arith.constant 3.200000e+01 : f32
    %468 = vector.broadcast %cst_197 : f32 to vector<16x1xf32>
    %469 = arith.divf %467, %468 : vector<16x1xf32>
    %470 = vector.broadcast %469 : vector<16x1xf32> to vector<16x32xf32>
    %471 = arith.subf %465, %470 : vector<16x32xf32>
    %472 = arith.mulf %471, %471 : vector<16x32xf32>
    %cst_198 = arith.constant dense<0.000000e+00> : vector<16xf32>
    %473 = vector.multi_reduction <add>, %472, %cst_198 [1] : vector<16x32xf32> to vector<16xf32>
    %474 = vector.shape_cast %473 : vector<16xf32> to vector<16x1xf32>
    %cst_199 = arith.constant 3.200000e+01 : f32
    %475 = vector.broadcast %cst_199 : f32 to vector<16x1xf32>
    %476 = arith.divf %474, %475 : vector<16x1xf32>
    %477 = vector.broadcast %469 : vector<16x1xf32> to vector<16x32xf32>
    %478 = arith.subf %465, %477 : vector<16x32xf32>
    %cst_200 = arith.constant 9.99999974E-6 : f32
    %479 = vector.broadcast %cst_200 : f32 to vector<16x1xf32>
    %480 = arith.addf %476, %479 : vector<16x1xf32>
    %481 = math.rsqrt %480 : vector<16x1xf32>
    %482 = vector.broadcast %481 : vector<16x1xf32> to vector<16x32xf32>
    %483 = arith.mulf %478, %482 : vector<16x32xf32>
    %c3_201 = arith.constant 3 : index
    %c0_202 = arith.constant 0 : index
    %c0_203 = arith.constant 0 : index
    %484 = vector.load %arg12[%c3_201, %c0_202, %c0_203] : memref<6x1x32xf32, #tpu.memory_space<vmem>>, vector<1x1x32xf32>
    %485 = vector.shape_cast %484 : vector<1x1x32xf32> to vector<1x32xf32>
    %486 = vector.broadcast %485 : vector<1x32xf32> to vector<16x32xf32>
    %487 = arith.mulf %483, %486 : vector<16x32xf32>
    %c3_204 = arith.constant 3 : index
    %c0_205 = arith.constant 0 : index
    %c0_206 = arith.constant 0 : index
    %488 = vector.load %arg13[%c3_204, %c0_205, %c0_206] : memref<6x1x32xf32, #tpu.memory_space<vmem>>, vector<1x1x32xf32>
    %489 = vector.shape_cast %488 : vector<1x1x32xf32> to vector<1x32xf32>
    %490 = vector.broadcast %489 : vector<1x32xf32> to vector<16x32xf32>
    %491 = arith.addf %487, %490 : vector<16x32xf32>
    %c12 = arith.constant 12 : index
    %c0_207 = arith.constant 0 : index
    %c0_208 = arith.constant 0 : index
    %492 = vector.load %arg10[%c12, %c0_207, %c0_208] : memref<16x32x32xbf16, #tpu.memory_space<vmem>>, vector<1x32x32xbf16>
    %493 = vector.shape_cast %492 : vector<1x32x32xbf16> to vector<32x32xbf16>
    %494 = arith.truncf %491 : vector<16x32xf32> to vector<16x32xbf16>
    %cst_209 = arith.constant dense<0.000000e+00> : vector<16x32xf32>
    %495 = tpu.matmul %494, %493, %cst_209 {dimension_numbers = #tpu.dot_dimension_numbers<[1], [0], [0], [1], [0, 0, 1, 1], [], []>} : vector<16x32xbf16>, vector<32x32xbf16>, vector<16x32xf32> -> vector<16x32xf32>
    %c12_210 = arith.constant 12 : index
    %c0_211 = arith.constant 0 : index
    %c0_212 = arith.constant 0 : index
    %496 = vector.load %arg11[%c12_210, %c0_211, %c0_212] : memref<16x1x32xf32, #tpu.memory_space<vmem>>, vector<1x1x32xf32>
    %497 = vector.shape_cast %496 : vector<1x1x32xf32> to vector<1x32xf32>
    %498 = vector.broadcast %497 : vector<1x32xf32> to vector<16x32xf32>
    %499 = arith.addf %495, %498 : vector<16x32xf32>
    %c13 = arith.constant 13 : index
    %c0_213 = arith.constant 0 : index
    %c0_214 = arith.constant 0 : index
    %500 = vector.load %arg10[%c13, %c0_213, %c0_214] : memref<16x32x32xbf16, #tpu.memory_space<vmem>>, vector<1x32x32xbf16>
    %501 = vector.shape_cast %500 : vector<1x32x32xbf16> to vector<32x32xbf16>
    %502 = arith.truncf %38 : vector<10x32xf32> to vector<10x32xbf16>
    %cst_215 = arith.constant dense<0.000000e+00> : vector<10x32xf32>
    %503 = tpu.matmul %502, %501, %cst_215 {dimension_numbers = #tpu.dot_dimension_numbers<[1], [0], [0], [1], [0, 0, 1, 1], [], []>} : vector<10x32xbf16>, vector<32x32xbf16>, vector<10x32xf32> -> vector<10x32xf32>
    %c13_216 = arith.constant 13 : index
    %c0_217 = arith.constant 0 : index
    %c0_218 = arith.constant 0 : index
    %504 = vector.load %arg11[%c13_216, %c0_217, %c0_218] : memref<16x1x32xf32, #tpu.memory_space<vmem>>, vector<1x1x32xf32>
    %505 = vector.shape_cast %504 : vector<1x1x32xf32> to vector<1x32xf32>
    %506 = vector.broadcast %505 : vector<1x32xf32> to vector<10x32xf32>
    %507 = arith.addf %503, %506 : vector<10x32xf32>
    %c14 = arith.constant 14 : index
    %c0_219 = arith.constant 0 : index
    %c0_220 = arith.constant 0 : index
    %508 = vector.load %arg10[%c14, %c0_219, %c0_220] : memref<16x32x32xbf16, #tpu.memory_space<vmem>>, vector<1x32x32xbf16>
    %509 = vector.shape_cast %508 : vector<1x32x32xbf16> to vector<32x32xbf16>
    %510 = arith.truncf %38 : vector<10x32xf32> to vector<10x32xbf16>
    %cst_221 = arith.constant dense<0.000000e+00> : vector<10x32xf32>
    %511 = tpu.matmul %510, %509, %cst_221 {dimension_numbers = #tpu.dot_dimension_numbers<[1], [0], [0], [1], [0, 0, 1, 1], [], []>} : vector<10x32xbf16>, vector<32x32xbf16>, vector<10x32xf32> -> vector<10x32xf32>
    %c14_222 = arith.constant 14 : index
    %c0_223 = arith.constant 0 : index
    %c0_224 = arith.constant 0 : index
    %512 = vector.load %arg11[%c14_222, %c0_223, %c0_224] : memref<16x1x32xf32, #tpu.memory_space<vmem>>, vector<1x1x32xf32>
    %513 = vector.shape_cast %512 : vector<1x1x32xf32> to vector<1x32xf32>
    %514 = vector.broadcast %513 : vector<1x32xf32> to vector<10x32xf32>
    %515 = arith.addf %511, %514 : vector<10x32xf32>
    %cst_225 = arith.constant 0.353553385 : f32
    %516 = vector.broadcast %cst_225 : f32 to vector<16x32xf32>
    %517 = arith.mulf %499, %516 : vector<16x32xf32>
    %518 = vector.broadcast %7 : vector<1x32xf32> to vector<16x32xf32>
    %519 = arith.mulf %517, %518 : vector<16x32xf32>
    %cst_226 = arith.constant dense<0.000000e+00> : vector<16x10xf32>
    %520 = tpu.matmul %519, %507, %cst_226 {dimension_numbers = #tpu.dot_dimension_numbers<[1], [1], [0], [0], [0, 0, 1, 0], [], []>} : vector<16x32xf32>, vector<10x32xf32>, vector<16x10xf32> -> vector<16x10xf32>
    %521 = vector.broadcast %54 : vector<1x10xf32> to vector<16x10xf32>
    %522 = arith.addf %520, %521 : vector<16x10xf32>
    %cst_227 = arith.constant dense<0xFF800000> : vector<16xf32>
    %523 = vector.multi_reduction <maximumf>, %522, %cst_227 [1] : vector<16x10xf32> to vector<16xf32>
    %524 = vector.shape_cast %523 : vector<16xf32> to vector<16x1xf32>
    %525 = vector.broadcast %524 : vector<16x1xf32> to vector<16x10xf32>
    %526 = arith.subf %522, %525 : vector<16x10xf32>
    %527 = math.exp %526 : vector<16x10xf32>
    %cst_228 = arith.constant dense<0.000000e+00> : vector<16xf32>
    %528 = vector.multi_reduction <add>, %527, %cst_228 [1] : vector<16x10xf32> to vector<16xf32>
    %529 = vector.shape_cast %528 : vector<16xf32> to vector<16x1xf32>
    %530 = tpu.reciprocal %529 {approx = true} : vector<16x1xf32> -> vector<16x1xf32>
    %531 = vector.broadcast %530 : vector<16x1xf32> to vector<16x10xf32>
    %532 = arith.mulf %527, %531 : vector<16x10xf32>
    %533 = vector.broadcast %7 : vector<1x32xf32> to vector<10x32xf32>
    %534 = arith.mulf %515, %533 : vector<10x32xf32>
    %cst_229 = arith.constant dense<0.000000e+00> : vector<16x32xf32>
    %535 = tpu.matmul %532, %534, %cst_229 {dimension_numbers = #tpu.dot_dimension_numbers<[1], [0], [0], [1], [0, 0, 1, 1], [], []>} : vector<16x10xf32>, vector<10x32xf32>, vector<16x32xf32> -> vector<16x32xf32>
    %536 = vector.broadcast %14 : vector<1x32xf32> to vector<16x32xf32>
    %537 = arith.mulf %517, %536 : vector<16x32xf32>
    %cst_230 = arith.constant dense<0.000000e+00> : vector<16x10xf32>
    %538 = tpu.matmul %537, %507, %cst_230 {dimension_numbers = #tpu.dot_dimension_numbers<[1], [1], [0], [0], [0, 0, 1, 0], [], []>} : vector<16x32xf32>, vector<10x32xf32>, vector<16x10xf32> -> vector<16x10xf32>
    %539 = vector.broadcast %54 : vector<1x10xf32> to vector<16x10xf32>
    %540 = arith.addf %538, %539 : vector<16x10xf32>
    %cst_231 = arith.constant dense<0xFF800000> : vector<16xf32>
    %541 = vector.multi_reduction <maximumf>, %540, %cst_231 [1] : vector<16x10xf32> to vector<16xf32>
    %542 = vector.shape_cast %541 : vector<16xf32> to vector<16x1xf32>
    %543 = vector.broadcast %542 : vector<16x1xf32> to vector<16x10xf32>
    %544 = arith.subf %540, %543 : vector<16x10xf32>
    %545 = math.exp %544 : vector<16x10xf32>
    %cst_232 = arith.constant dense<0.000000e+00> : vector<16xf32>
    %546 = vector.multi_reduction <add>, %545, %cst_232 [1] : vector<16x10xf32> to vector<16xf32>
    %547 = vector.shape_cast %546 : vector<16xf32> to vector<16x1xf32>
    %548 = tpu.reciprocal %547 {approx = true} : vector<16x1xf32> -> vector<16x1xf32>
    %549 = vector.broadcast %548 : vector<16x1xf32> to vector<16x10xf32>
    %550 = arith.mulf %545, %549 : vector<16x10xf32>
    %551 = vector.broadcast %14 : vector<1x32xf32> to vector<10x32xf32>
    %552 = arith.mulf %515, %551 : vector<10x32xf32>
    %cst_233 = arith.constant dense<0.000000e+00> : vector<16x32xf32>
    %553 = tpu.matmul %550, %552, %cst_233 {dimension_numbers = #tpu.dot_dimension_numbers<[1], [0], [0], [1], [0, 0, 1, 1], [], []>} : vector<16x10xf32>, vector<10x32xf32>, vector<16x32xf32> -> vector<16x32xf32>
    %554 = arith.addf %535, %553 : vector<16x32xf32>
    %555 = vector.broadcast %21 : vector<1x32xf32> to vector<16x32xf32>
    %556 = arith.mulf %517, %555 : vector<16x32xf32>
    %cst_234 = arith.constant dense<0.000000e+00> : vector<16x10xf32>
    %557 = tpu.matmul %556, %507, %cst_234 {dimension_numbers = #tpu.dot_dimension_numbers<[1], [1], [0], [0], [0, 0, 1, 0], [], []>} : vector<16x32xf32>, vector<10x32xf32>, vector<16x10xf32> -> vector<16x10xf32>
    %558 = vector.broadcast %54 : vector<1x10xf32> to vector<16x10xf32>
    %559 = arith.addf %557, %558 : vector<16x10xf32>
    %cst_235 = arith.constant dense<0xFF800000> : vector<16xf32>
    %560 = vector.multi_reduction <maximumf>, %559, %cst_235 [1] : vector<16x10xf32> to vector<16xf32>
    %561 = vector.shape_cast %560 : vector<16xf32> to vector<16x1xf32>
    %562 = vector.broadcast %561 : vector<16x1xf32> to vector<16x10xf32>
    %563 = arith.subf %559, %562 : vector<16x10xf32>
    %564 = math.exp %563 : vector<16x10xf32>
    %cst_236 = arith.constant dense<0.000000e+00> : vector<16xf32>
    %565 = vector.multi_reduction <add>, %564, %cst_236 [1] : vector<16x10xf32> to vector<16xf32>
    %566 = vector.shape_cast %565 : vector<16xf32> to vector<16x1xf32>
    %567 = tpu.reciprocal %566 {approx = true} : vector<16x1xf32> -> vector<16x1xf32>
    %568 = vector.broadcast %567 : vector<16x1xf32> to vector<16x10xf32>
    %569 = arith.mulf %564, %568 : vector<16x10xf32>
    %570 = vector.broadcast %21 : vector<1x32xf32> to vector<10x32xf32>
    %571 = arith.mulf %515, %570 : vector<10x32xf32>
    %cst_237 = arith.constant dense<0.000000e+00> : vector<16x32xf32>
    %572 = tpu.matmul %569, %571, %cst_237 {dimension_numbers = #tpu.dot_dimension_numbers<[1], [0], [0], [1], [0, 0, 1, 1], [], []>} : vector<16x10xf32>, vector<10x32xf32>, vector<16x32xf32> -> vector<16x32xf32>
    %573 = arith.addf %554, %572 : vector<16x32xf32>
    %574 = vector.broadcast %28 : vector<1x32xf32> to vector<16x32xf32>
    %575 = arith.mulf %517, %574 : vector<16x32xf32>
    %cst_238 = arith.constant dense<0.000000e+00> : vector<16x10xf32>
    %576 = tpu.matmul %575, %507, %cst_238 {dimension_numbers = #tpu.dot_dimension_numbers<[1], [1], [0], [0], [0, 0, 1, 0], [], []>} : vector<16x32xf32>, vector<10x32xf32>, vector<16x10xf32> -> vector<16x10xf32>
    %577 = vector.broadcast %54 : vector<1x10xf32> to vector<16x10xf32>
    %578 = arith.addf %576, %577 : vector<16x10xf32>
    %cst_239 = arith.constant dense<0xFF800000> : vector<16xf32>
    %579 = vector.multi_reduction <maximumf>, %578, %cst_239 [1] : vector<16x10xf32> to vector<16xf32>
    %580 = vector.shape_cast %579 : vector<16xf32> to vector<16x1xf32>
    %581 = vector.broadcast %580 : vector<16x1xf32> to vector<16x10xf32>
    %582 = arith.subf %578, %581 : vector<16x10xf32>
    %583 = math.exp %582 : vector<16x10xf32>
    %cst_240 = arith.constant dense<0.000000e+00> : vector<16xf32>
    %584 = vector.multi_reduction <add>, %583, %cst_240 [1] : vector<16x10xf32> to vector<16xf32>
    %585 = vector.shape_cast %584 : vector<16xf32> to vector<16x1xf32>
    %586 = tpu.reciprocal %585 {approx = true} : vector<16x1xf32> -> vector<16x1xf32>
    %587 = vector.broadcast %586 : vector<16x1xf32> to vector<16x10xf32>
    %588 = arith.mulf %583, %587 : vector<16x10xf32>
    %589 = vector.broadcast %28 : vector<1x32xf32> to vector<10x32xf32>
    %590 = arith.mulf %515, %589 : vector<10x32xf32>
    %cst_241 = arith.constant dense<0.000000e+00> : vector<16x32xf32>
    %591 = tpu.matmul %588, %590, %cst_241 {dimension_numbers = #tpu.dot_dimension_numbers<[1], [0], [0], [1], [0, 0, 1, 1], [], []>} : vector<16x10xf32>, vector<10x32xf32>, vector<16x32xf32> -> vector<16x32xf32>
    %592 = arith.addf %573, %591 : vector<16x32xf32>
    %c15 = arith.constant 15 : index
    %c0_242 = arith.constant 0 : index
    %c0_243 = arith.constant 0 : index
    %593 = vector.load %arg10[%c15, %c0_242, %c0_243] : memref<16x32x32xbf16, #tpu.memory_space<vmem>>, vector<1x32x32xbf16>
    %594 = vector.shape_cast %593 : vector<1x32x32xbf16> to vector<32x32xbf16>
    %595 = arith.truncf %592 : vector<16x32xf32> to vector<16x32xbf16>
    %cst_244 = arith.constant dense<0.000000e+00> : vector<16x32xf32>
    %596 = tpu.matmul %595, %594, %cst_244 {dimension_numbers = #tpu.dot_dimension_numbers<[1], [0], [0], [1], [0, 0, 1, 1], [], []>} : vector<16x32xbf16>, vector<32x32xbf16>, vector<16x32xf32> -> vector<16x32xf32>
    %c15_245 = arith.constant 15 : index
    %c0_246 = arith.constant 0 : index
    %c0_247 = arith.constant 0 : index
    %597 = vector.load %arg11[%c15_245, %c0_246, %c0_247] : memref<16x1x32xf32, #tpu.memory_space<vmem>>, vector<1x1x32xf32>
    %598 = vector.shape_cast %597 : vector<1x1x32xf32> to vector<1x32xf32>
    %599 = vector.broadcast %598 : vector<1x32xf32> to vector<16x32xf32>
    %600 = arith.addf %596, %599 : vector<16x32xf32>
    %601 = arith.addf %491, %600 : vector<16x32xf32>
    %cst_248 = arith.constant dense<0.000000e+00> : vector<16xf32>
    %602 = vector.multi_reduction <add>, %601, %cst_248 [1] : vector<16x32xf32> to vector<16xf32>
    %603 = vector.shape_cast %602 : vector<16xf32> to vector<16x1xf32>
    %cst_249 = arith.constant 3.200000e+01 : f32
    %604 = vector.broadcast %cst_249 : f32 to vector<16x1xf32>
    %605 = arith.divf %603, %604 : vector<16x1xf32>
    %606 = vector.broadcast %605 : vector<16x1xf32> to vector<16x32xf32>
    %607 = arith.subf %601, %606 : vector<16x32xf32>
    %608 = arith.mulf %607, %607 : vector<16x32xf32>
    %cst_250 = arith.constant dense<0.000000e+00> : vector<16xf32>
    %609 = vector.multi_reduction <add>, %608, %cst_250 [1] : vector<16x32xf32> to vector<16xf32>
    %610 = vector.shape_cast %609 : vector<16xf32> to vector<16x1xf32>
    %cst_251 = arith.constant 3.200000e+01 : f32
    %611 = vector.broadcast %cst_251 : f32 to vector<16x1xf32>
    %612 = arith.divf %610, %611 : vector<16x1xf32>
    %613 = vector.broadcast %605 : vector<16x1xf32> to vector<16x32xf32>
    %614 = arith.subf %601, %613 : vector<16x32xf32>
    %cst_252 = arith.constant 9.99999974E-6 : f32
    %615 = vector.broadcast %cst_252 : f32 to vector<16x1xf32>
    %616 = arith.addf %612, %615 : vector<16x1xf32>
    %617 = math.rsqrt %616 : vector<16x1xf32>
    %618 = vector.broadcast %617 : vector<16x1xf32> to vector<16x32xf32>
    %619 = arith.mulf %614, %618 : vector<16x32xf32>
    %c4_253 = arith.constant 4 : index
    %c0_254 = arith.constant 0 : index
    %c0_255 = arith.constant 0 : index
    %620 = vector.load %arg12[%c4_253, %c0_254, %c0_255] : memref<6x1x32xf32, #tpu.memory_space<vmem>>, vector<1x1x32xf32>
    %621 = vector.shape_cast %620 : vector<1x1x32xf32> to vector<1x32xf32>
    %622 = vector.broadcast %621 : vector<1x32xf32> to vector<16x32xf32>
    %623 = arith.mulf %619, %622 : vector<16x32xf32>
    %c4_256 = arith.constant 4 : index
    %c0_257 = arith.constant 0 : index
    %c0_258 = arith.constant 0 : index
    %624 = vector.load %arg13[%c4_256, %c0_257, %c0_258] : memref<6x1x32xf32, #tpu.memory_space<vmem>>, vector<1x1x32xf32>
    %625 = vector.shape_cast %624 : vector<1x1x32xf32> to vector<1x32xf32>
    %626 = vector.broadcast %625 : vector<1x32xf32> to vector<16x32xf32>
    %627 = arith.addf %623, %626 : vector<16x32xf32>
    %c1_259 = arith.constant 1 : index
    %c0_260 = arith.constant 0 : index
    %c0_261 = arith.constant 0 : index
    %628 = vector.load %arg14[%c1_259, %c0_260, %c0_261] : memref<2x32x512xbf16, #tpu.memory_space<vmem>>, vector<1x32x512xbf16>
    %629 = vector.shape_cast %628 : vector<1x32x512xbf16> to vector<32x512xbf16>
    %630 = arith.truncf %627 : vector<16x32xf32> to vector<16x32xbf16>
    %cst_262 = arith.constant dense<0.000000e+00> : vector<16x512xf32>
    %631 = tpu.matmul %630, %629, %cst_262 {dimension_numbers = #tpu.dot_dimension_numbers<[1], [0], [0], [1], [0, 0, 1, 1], [], []>} : vector<16x32xbf16>, vector<32x512xbf16>, vector<16x512xf32> -> vector<16x512xf32>
    %c1_263 = arith.constant 1 : index
    %c0_264 = arith.constant 0 : index
    %c0_265 = arith.constant 0 : index
    %632 = vector.load %arg15[%c1_263, %c0_264, %c0_265] : memref<2x1x512xf32, #tpu.memory_space<vmem>>, vector<1x1x512xf32>
    %633 = vector.shape_cast %632 : vector<1x1x512xf32> to vector<1x512xf32>
    %634 = vector.broadcast %633 : vector<1x512xf32> to vector<16x512xf32>
    %635 = arith.addf %631, %634 : vector<16x512xf32>
    %cst_266 = arith.constant 0.000000e+00 : f32
    %636 = vector.broadcast %cst_266 : f32 to vector<16x512xf32>
    %637 = arith.maximumf %635, %636 : vector<16x512xf32>
    %c1_267 = arith.constant 1 : index
    %c0_268 = arith.constant 0 : index
    %c0_269 = arith.constant 0 : index
    %638 = vector.load %arg16[%c1_267, %c0_268, %c0_269] : memref<2x512x32xbf16, #tpu.memory_space<vmem>>, vector<1x512x32xbf16>
    %639 = vector.shape_cast %638 : vector<1x512x32xbf16> to vector<512x32xbf16>
    %640 = arith.truncf %637 : vector<16x512xf32> to vector<16x512xbf16>
    %cst_270 = arith.constant dense<0.000000e+00> : vector<16x32xf32>
    %641 = tpu.matmul %640, %639, %cst_270 {dimension_numbers = #tpu.dot_dimension_numbers<[1], [0], [0], [1], [0, 0, 1, 1], [], []>} : vector<16x512xbf16>, vector<512x32xbf16>, vector<16x32xf32> -> vector<16x32xf32>
    %c1_271 = arith.constant 1 : index
    %c0_272 = arith.constant 0 : index
    %c0_273 = arith.constant 0 : index
    %642 = vector.load %arg17[%c1_271, %c0_272, %c0_273] : memref<2x1x32xf32, #tpu.memory_space<vmem>>, vector<1x1x32xf32>
    %643 = vector.shape_cast %642 : vector<1x1x32xf32> to vector<1x32xf32>
    %644 = vector.broadcast %643 : vector<1x32xf32> to vector<16x32xf32>
    %645 = arith.addf %641, %644 : vector<16x32xf32>
    %646 = arith.addf %627, %645 : vector<16x32xf32>
    %cst_274 = arith.constant dense<0.000000e+00> : vector<16xf32>
    %647 = vector.multi_reduction <add>, %646, %cst_274 [1] : vector<16x32xf32> to vector<16xf32>
    %648 = vector.shape_cast %647 : vector<16xf32> to vector<16x1xf32>
    %cst_275 = arith.constant 3.200000e+01 : f32
    %649 = vector.broadcast %cst_275 : f32 to vector<16x1xf32>
    %650 = arith.divf %648, %649 : vector<16x1xf32>
    %651 = vector.broadcast %650 : vector<16x1xf32> to vector<16x32xf32>
    %652 = arith.subf %646, %651 : vector<16x32xf32>
    %653 = arith.mulf %652, %652 : vector<16x32xf32>
    %cst_276 = arith.constant dense<0.000000e+00> : vector<16xf32>
    %654 = vector.multi_reduction <add>, %653, %cst_276 [1] : vector<16x32xf32> to vector<16xf32>
    %655 = vector.shape_cast %654 : vector<16xf32> to vector<16x1xf32>
    %cst_277 = arith.constant 3.200000e+01 : f32
    %656 = vector.broadcast %cst_277 : f32 to vector<16x1xf32>
    %657 = arith.divf %655, %656 : vector<16x1xf32>
    %658 = vector.broadcast %650 : vector<16x1xf32> to vector<16x32xf32>
    %659 = arith.subf %646, %658 : vector<16x32xf32>
    %cst_278 = arith.constant 9.99999974E-6 : f32
    %660 = vector.broadcast %cst_278 : f32 to vector<16x1xf32>
    %661 = arith.addf %657, %660 : vector<16x1xf32>
    %662 = math.rsqrt %661 : vector<16x1xf32>
    %663 = vector.broadcast %662 : vector<16x1xf32> to vector<16x32xf32>
    %664 = arith.mulf %659, %663 : vector<16x32xf32>
    %c5_279 = arith.constant 5 : index
    %c0_280 = arith.constant 0 : index
    %c0_281 = arith.constant 0 : index
    %665 = vector.load %arg12[%c5_279, %c0_280, %c0_281] : memref<6x1x32xf32, #tpu.memory_space<vmem>>, vector<1x1x32xf32>
    %666 = vector.shape_cast %665 : vector<1x1x32xf32> to vector<1x32xf32>
    %667 = vector.broadcast %666 : vector<1x32xf32> to vector<16x32xf32>
    %668 = arith.mulf %664, %667 : vector<16x32xf32>
    %c5_282 = arith.constant 5 : index
    %c0_283 = arith.constant 0 : index
    %c0_284 = arith.constant 0 : index
    %669 = vector.load %arg13[%c5_282, %c0_283, %c0_284] : memref<6x1x32xf32, #tpu.memory_space<vmem>>, vector<1x1x32xf32>
    %670 = vector.shape_cast %669 : vector<1x1x32xf32> to vector<1x32xf32>
    %671 = vector.broadcast %670 : vector<1x32xf32> to vector<16x32xf32>
    %672 = arith.addf %668, %671 : vector<16x32xf32>
    %c0_285 = arith.constant 0 : index
    %c0_286 = arith.constant 0 : index
    %c0_287 = arith.constant 0 : index
    %673 = vector.load %arg4[%c0_285, %c0_286, %c0_287] : memref<1x1x64xf32, #tpu.memory_space<vmem>>, vector<1x1x64xf32>
    %674 = vector.shape_cast %673 : vector<1x1x64xf32> to vector<1x64xf32>
    %c0_288 = arith.constant 0 : index
    %c0_289 = arith.constant 0 : index
    %675 = vector.load %arg18[%c0_288, %c0_289] : memref<64x200xbf16, #tpu.memory_space<vmem>>, vector<64x200xbf16>
    %676 = arith.truncf %674 : vector<1x64xf32> to vector<1x64xbf16>
    %cst_290 = arith.constant dense<0.000000e+00> : vector<1x200xf32>
    %677 = tpu.matmul %676, %675, %cst_290 {dimension_numbers = #tpu.dot_dimension_numbers<[1], [0], [0], [1], [0, 0, 1, 1], [], []>} : vector<1x64xbf16>, vector<64x200xbf16>, vector<1x200xf32> -> vector<1x200xf32>
    %c0_291 = arith.constant 0 : index
    %c0_292 = arith.constant 0 : index
    %678 = vector.load %arg19[%c0_291, %c0_292] : memref<1x200xf32, #tpu.memory_space<vmem>>, vector<1x200xf32>
    %679 = arith.addf %677, %678 : vector<1x200xf32>
    %cst_293 = arith.constant 0.000000e+00 : f32
    %680 = vector.broadcast %cst_293 : f32 to vector<1x200xf32>
    %681 = arith.maximumf %679, %680 : vector<1x200xf32>
    %c0_294 = arith.constant 0 : index
    %c0_295 = arith.constant 0 : index
    %682 = vector.load %arg20[%c0_294, %c0_295] : memref<200x100xbf16, #tpu.memory_space<vmem>>, vector<200x100xbf16>
    %683 = arith.truncf %681 : vector<1x200xf32> to vector<1x200xbf16>
    %cst_296 = arith.constant dense<0.000000e+00> : vector<1x100xf32>
    %684 = tpu.matmul %683, %682, %cst_296 {dimension_numbers = #tpu.dot_dimension_numbers<[1], [0], [0], [1], [0, 0, 1, 1], [], []>} : vector<1x200xbf16>, vector<200x100xbf16>, vector<1x100xf32> -> vector<1x100xf32>
    %c0_297 = arith.constant 0 : index
    %c0_298 = arith.constant 0 : index
    %685 = vector.load %arg21[%c0_297, %c0_298] : memref<1x100xf32, #tpu.memory_space<vmem>>, vector<1x100xf32>
    %686 = arith.addf %684, %685 : vector<1x100xf32>
    %cst_299 = arith.constant 0.000000e+00 : f32
    %687 = vector.broadcast %cst_299 : f32 to vector<1x100xf32>
    %688 = arith.maximumf %686, %687 : vector<1x100xf32>
    %c0_300 = arith.constant 0 : index
    %c0_301 = arith.constant 0 : index
    %689 = vector.load %arg22[%c0_300, %c0_301] : memref<100x50xbf16, #tpu.memory_space<vmem>>, vector<100x50xbf16>
    %690 = arith.truncf %688 : vector<1x100xf32> to vector<1x100xbf16>
    %cst_302 = arith.constant dense<0.000000e+00> : vector<1x50xf32>
    %691 = tpu.matmul %690, %689, %cst_302 {dimension_numbers = #tpu.dot_dimension_numbers<[1], [0], [0], [1], [0, 0, 1, 1], [], []>} : vector<1x100xbf16>, vector<100x50xbf16>, vector<1x50xf32> -> vector<1x50xf32>
    %c0_303 = arith.constant 0 : index
    %c0_304 = arith.constant 0 : index
    %692 = vector.load %arg23[%c0_303, %c0_304] : memref<1x50xf32, #tpu.memory_space<vmem>>, vector<1x50xf32>
    %693 = arith.addf %691, %692 : vector<1x50xf32>
    %cst_305 = arith.constant 0.000000e+00 : f32
    %694 = vector.broadcast %cst_305 : f32 to vector<1x50xf32>
    %695 = arith.maximumf %693, %694 : vector<1x50xf32>
    %c0_306 = arith.constant 0 : index
    %c0_307 = arith.constant 0 : index
    %c0_308 = arith.constant 0 : index
    %696 = vector.load %arg34[%c0_306, %c0_307, %c0_308] : memref<1x1x50xf32, #tpu.memory_space<vmem>>, vector<1x1x50xf32>
    %697 = vector.shape_cast %696 : vector<1x1x50xf32> to vector<1x50xf32>
    %698 = vector.shape_cast %695 : vector<1x50xf32> to vector<1x1x50xf32>
    tpu.vector_store %arg34[%c0_306, %c0_307, %c0_308], %698 {strides = array<i32>} : memref<1x1x50xf32, #tpu.memory_space<vmem>>, vector<1x1x50xf32>,
    %c0_309 = arith.constant 0 : index
    %c0_310 = arith.constant 0 : index
    %c0_311 = arith.constant 0 : index
    %699 = vector.load %arg5[%c0_309, %c0_310, %c0_311] : memref<1x1x4xf32, #tpu.memory_space<vmem>>, vector<1x1x4xf32>
    %700 = vector.shape_cast %699 : vector<1x1x4xf32> to vector<1x4xf32>
    %c0_312 = arith.constant 0 : index
    %c0_313 = arith.constant 0 : index
    %701 = vector.load %arg24[%c0_312, %c0_313] : memref<4x8xbf16, #tpu.memory_space<vmem>>, vector<4x8xbf16>
    %702 = arith.truncf %700 : vector<1x4xf32> to vector<1x4xbf16>
    %cst_314 = arith.constant dense<0.000000e+00> : vector<1x8xf32>
    %703 = tpu.matmul %702, %701, %cst_314 {dimension_numbers = #tpu.dot_dimension_numbers<[1], [0], [0], [1], [0, 0, 1, 1], [], []>} : vector<1x4xbf16>, vector<4x8xbf16>, vector<1x8xf32> -> vector<1x8xf32>
    %c0_315 = arith.constant 0 : index
    %c0_316 = arith.constant 0 : index
    %704 = vector.load %arg25[%c0_315, %c0_316] : memref<1x8xf32, #tpu.memory_space<vmem>>, vector<1x8xf32>
    %705 = arith.addf %703, %704 : vector<1x8xf32>
    %cst_317 = arith.constant 0.000000e+00 : f32
    %706 = vector.broadcast %cst_317 : f32 to vector<16x32xf32>
    %707 = arith.maximumf %672, %706 : vector<16x32xf32>
    %c0_318 = arith.constant 0 : index
    %c0_319 = arith.constant 0 : index
    %708 = vector.load %arg26[%c0_318, %c0_319] : memref<32x32xbf16, #tpu.memory_space<vmem>>, vector<32x32xbf16>
    %709 = arith.truncf %707 : vector<16x32xf32> to vector<16x32xbf16>
    %cst_320 = arith.constant dense<0.000000e+00> : vector<16x32xf32>
    %710 = tpu.matmul %709, %708, %cst_320 {dimension_numbers = #tpu.dot_dimension_numbers<[1], [0], [0], [1], [0, 0, 1, 1], [], []>} : vector<16x32xbf16>, vector<32x32xbf16>, vector<16x32xf32> -> vector<16x32xf32>
    %cst_321 = arith.constant 0.000000e+00 : f32
    %711 = vector.broadcast %cst_321 : f32 to vector<1x32xf32>
    %712 = arith.maximumf %40, %711 : vector<1x32xf32>
    %c0_322 = arith.constant 0 : index
    %c0_323 = arith.constant 0 : index
    %713 = vector.load %arg27[%c0_322, %c0_323] : memref<32x32xbf16, #tpu.memory_space<vmem>>, vector<32x32xbf16>
    %714 = arith.truncf %712 : vector<1x32xf32> to vector<1x32xbf16>
    %cst_324 = arith.constant dense<0.000000e+00> : vector<1x32xf32>
    %715 = tpu.matmul %714, %713, %cst_324 {dimension_numbers = #tpu.dot_dimension_numbers<[1], [0], [0], [1], [0, 0, 1, 1], [], []>} : vector<1x32xbf16>, vector<32x32xbf16>, vector<1x32xf32> -> vector<1x32xf32>
    %716 = vector.broadcast %715 : vector<1x32xf32> to vector<16x32xf32>
    %717 = arith.addf %710, %716 : vector<16x32xf32>
    %cst_325 = arith.constant 0.000000e+00 : f32
    %718 = vector.broadcast %cst_325 : f32 to vector<1x50xf32>
    %719 = arith.maximumf %695, %718 : vector<1x50xf32>
    %c0_326 = arith.constant 0 : index
    %c0_327 = arith.constant 0 : index
    %720 = vector.load %arg28[%c0_326, %c0_327] : memref<50x32xbf16, #tpu.memory_space<vmem>>, vector<50x32xbf16>
    %721 = arith.truncf %719 : vector<1x50xf32> to vector<1x50xbf16>
    %cst_328 = arith.constant dense<0.000000e+00> : vector<1x32xf32>
    %722 = tpu.matmul %721, %720, %cst_328 {dimension_numbers = #tpu.dot_dimension_numbers<[1], [0], [0], [1], [0, 0, 1, 1], [], []>} : vector<1x50xbf16>, vector<50x32xbf16>, vector<1x32xf32> -> vector<1x32xf32>
    %723 = vector.broadcast %722 : vector<1x32xf32> to vector<16x32xf32>
    %724 = arith.addf %717, %723 : vector<16x32xf32>
    %cst_329 = arith.constant 0.000000e+00 : f32
    %725 = vector.broadcast %cst_329 : f32 to vector<1x8xf32>
    %726 = arith.maximumf %705, %725 : vector<1x8xf32>
    %c0_330 = arith.constant 0 : index
    %c0_331 = arith.constant 0 : index
    %727 = vector.load %arg29[%c0_330, %c0_331] : memref<8x32xbf16, #tpu.memory_space<vmem>>, vector<8x32xbf16>
    %728 = arith.truncf %726 : vector<1x8xf32> to vector<1x8xbf16>
    %cst_332 = arith.constant dense<0.000000e+00> : vector<1x32xf32>
    %729 = tpu.matmul %728, %727, %cst_332 {dimension_numbers = #tpu.dot_dimension_numbers<[1], [0], [0], [1], [0, 0, 1, 1], [], []>} : vector<1x8xbf16>, vector<8x32xbf16>, vector<1x32xf32> -> vector<1x32xf32>
    %730 = vector.broadcast %729 : vector<1x32xf32> to vector<16x32xf32>
    %731 = arith.addf %724, %730 : vector<16x32xf32>
    %c0_333 = arith.constant 0 : index
    %c0_334 = arith.constant 0 : index
    %732 = vector.load %arg30[%c0_333, %c0_334] : memref<1x32xf32, #tpu.memory_space<vmem>>, vector<1x32xf32>
    %733 = vector.broadcast %732 : vector<1x32xf32> to vector<16x32xf32>
    %734 = arith.addf %731, %733 : vector<16x32xf32>
    %cst_335 = arith.constant 0.000000e+00 : f32
    %735 = vector.broadcast %cst_335 : f32 to vector<16x32xf32>
    %736 = arith.maximumf %734, %735 : vector<16x32xf32>
    %c0_336 = arith.constant 0 : index
    %c0_337 = arith.constant 0 : index
    %737 = vector.load %arg31[%c0_336, %c0_337] : memref<32x1xbf16, #tpu.memory_space<vmem>>, vector<32x1xbf16>
    %738 = arith.truncf %736 : vector<16x32xf32> to vector<16x32xbf16>
    %cst_338 = arith.constant dense<0.000000e+00> : vector<16x1xf32>
    %739 = tpu.matmul %738, %737, %cst_338 {dimension_numbers = #tpu.dot_dimension_numbers<[1], [0], [0], [1], [0, 0, 1, 1], [], []>} : vector<16x32xbf16>, vector<32x1xbf16>, vector<16x1xf32> -> vector<16x1xf32>
    %c0_339 = arith.constant 0 : index
    %c0_340 = arith.constant 0 : index
    %740 = vector.load %arg32[%c0_339, %c0_340] : memref<1x1xf32, #tpu.memory_space<vmem>>, vector<1x1xf32>
    %741 = vector.broadcast %740 : vector<1x1xf32> to vector<16x1xf32>
    %742 = arith.addf %739, %741 : vector<16x1xf32>
    %c0_341 = arith.constant 0 : index
    %c0_342 = arith.constant 0 : index
    %c0_343 = arith.constant 0 : index
    %743 = vector.load %arg33[%c0_341, %c0_342, %c0_343] : memref<1x16x1xf32, #tpu.memory_space<vmem>>, vector<1x16x1xf32>
    %744 = vector.shape_cast %743 : vector<1x16x1xf32> to vector<16x1xf32>
    %745 = vector.shape_cast %742 : vector<16x1xf32> to vector<1x16x1xf32>
    tpu.vector_store %arg33[%c0_341, %c0_342, %c0_343], %745 {strides = array<i32>} : memref<1x16x1xf32, #tpu.memory_space<vmem>>, vector<1x16x1xf32>,
    return
  }
  func.func @transform_0(%arg0: i32) -> (i32, i32, i32) {
    %c0_i32 = arith.constant 0 : i32
    %c0_i32_0 = arith.constant 0 : i32
    %c0_i32_1 = arith.constant 0 : i32
    return %arg0, %c0_i32, %c0_i32_0 : i32, i32, i32
  }
  func.func @transform_1(%arg0: i32) -> (i32, i32, i32) {
    %c0_i32 = arith.constant 0 : i32
    %c0_i32_0 = arith.constant 0 : i32
    %c0_i32_1 = arith.constant 0 : i32
    return %arg0, %c0_i32, %c0_i32_0 : i32, i32, i32
  }
  func.func @transform_2(%arg0: i32) -> (i32, i32) {
    %c0_i32 = arith.constant 0 : i32
    %c0_i32_0 = arith.constant 0 : i32
    %c0_i32_1 = arith.constant 0 : i32
    return %c0_i32, %c0_i32_0 : i32, i32
  }
  func.func @transform_3(%arg0: i32) -> (i32, i32, i32) {
    %c0_i32 = arith.constant 0 : i32
    %c0_i32_0 = arith.constant 0 : i32
    %c0_i32_1 = arith.constant 0 : i32
    return %arg0, %c0_i32, %c0_i32_0 : i32, i32, i32
  }
  func.func @transform_4(%arg0: i32) -> (i32, i32, i32) {
    %c0_i32 = arith.constant 0 : i32
    %c0_i32_0 = arith.constant 0 : i32
    %c0_i32_1 = arith.constant 0 : i32
    return %arg0, %c0_i32, %c0_i32_0 : i32, i32, i32
  }
  func.func @transform_5(%arg0: i32) -> (i32, i32) {
    %c0_i32 = arith.constant 0 : i32
    %c0_i32_0 = arith.constant 0 : i32
    %c0_i32_1 = arith.constant 0 : i32
    return %c0_i32, %c0_i32_0 : i32, i32
  }
  func.func @transform_6(%arg0: i32) -> (i32, i32) {
    %c0_i32 = arith.constant 0 : i32
    %c0_i32_0 = arith.constant 0 : i32
    %c0_i32_1 = arith.constant 0 : i32
    return %c0_i32, %c0_i32_0 : i32, i32
  }
  func.func @transform_7(%arg0: i32) -> (i32, i32) {
    %c0_i32 = arith.constant 0 : i32
    %c0_i32_0 = arith.constant 0 : i32
    %c0_i32_1 = arith.constant 0 : i32
    return %c0_i32, %c0_i32_0 : i32, i32
  }
  func.func @transform_8(%arg0: i32) -> (i32, i32) {
    %c0_i32 = arith.constant 0 : i32
    %c0_i32_0 = arith.constant 0 : i32
    %c0_i32_1 = arith.constant 0 : i32
    return %c0_i32, %c0_i32_0 : i32, i32
  }
  func.func @transform_9(%arg0: i32) -> (i32, i32, i32) {
    %c0_i32 = arith.constant 0 : i32
    %c0_i32_0 = arith.constant 0 : i32
    %c0_i32_1 = arith.constant 0 : i32
    %c0_i32_2 = arith.constant 0 : i32
    return %c0_i32, %c0_i32_0, %c0_i32_1 : i32, i32, i32
  }
  func.func @transform_10(%arg0: i32) -> (i32, i32, i32) {
    %c0_i32 = arith.constant 0 : i32
    %c0_i32_0 = arith.constant 0 : i32
    %c0_i32_1 = arith.constant 0 : i32
    %c0_i32_2 = arith.constant 0 : i32
    return %c0_i32, %c0_i32_0, %c0_i32_1 : i32, i32, i32
  }
  func.func @transform_11(%arg0: i32) -> (i32, i32, i32) {
    %c0_i32 = arith.constant 0 : i32
    %c0_i32_0 = arith.constant 0 : i32
    %c0_i32_1 = arith.constant 0 : i32
    %c0_i32_2 = arith.constant 0 : i32
    return %c0_i32, %c0_i32_0, %c0_i32_1 : i32, i32, i32
  }
  func.func @transform_12(%arg0: i32) -> (i32, i32, i32) {
    %c0_i32 = arith.constant 0 : i32
    %c0_i32_0 = arith.constant 0 : i32
    %c0_i32_1 = arith.constant 0 : i32
    %c0_i32_2 = arith.constant 0 : i32
    return %c0_i32, %c0_i32_0, %c0_i32_1 : i32, i32, i32
  }
  func.func @transform_13(%arg0: i32) -> (i32, i32, i32) {
    %c0_i32 = arith.constant 0 : i32
    %c0_i32_0 = arith.constant 0 : i32
    %c0_i32_1 = arith.constant 0 : i32
    %c0_i32_2 = arith.constant 0 : i32
    return %c0_i32, %c0_i32_0, %c0_i32_1 : i32, i32, i32
  }
  func.func @transform_14(%arg0: i32) -> (i32, i32, i32) {
    %c0_i32 = arith.constant 0 : i32
    %c0_i32_0 = arith.constant 0 : i32
    %c0_i32_1 = arith.constant 0 : i32
    %c0_i32_2 = arith.constant 0 : i32
    return %c0_i32, %c0_i32_0, %c0_i32_1 : i32, i32, i32
  }
  func.func @transform_15(%arg0: i32) -> (i32, i32, i32) {
    %c0_i32 = arith.constant 0 : i32
    %c0_i32_0 = arith.constant 0 : i32
    %c0_i32_1 = arith.constant 0 : i32
    %c0_i32_2 = arith.constant 0 : i32
    return %c0_i32, %c0_i32_0, %c0_i32_1 : i32, i32, i32
  }
  func.func @transform_16(%arg0: i32) -> (i32, i32, i32) {
    %c0_i32 = arith.constant 0 : i32
    %c0_i32_0 = arith.constant 0 : i32
    %c0_i32_1 = arith.constant 0 : i32
    %c0_i32_2 = arith.constant 0 : i32
    return %c0_i32, %c0_i32_0, %c0_i32_1 : i32, i32, i32
  }
  func.func @transform_17(%arg0: i32) -> (i32, i32) {
    %c0_i32 = arith.constant 0 : i32
    %c0_i32_0 = arith.constant 0 : i32
    %c0_i32_1 = arith.constant 0 : i32
    return %c0_i32, %c0_i32_0 : i32, i32
  }
  func.func @transform_18(%arg0: i32) -> (i32, i32) {
    %c0_i32 = arith.constant 0 : i32
    %c0_i32_0 = arith.constant 0 : i32
    %c0_i32_1 = arith.constant 0 : i32
    return %c0_i32, %c0_i32_0 : i32, i32
  }
  func.func @transform_19(%arg0: i32) -> (i32, i32) {
    %c0_i32 = arith.constant 0 : i32
    %c0_i32_0 = arith.constant 0 : i32
    %c0_i32_1 = arith.constant 0 : i32
    return %c0_i32, %c0_i32_0 : i32, i32
  }
  func.func @transform_20(%arg0: i32) -> (i32, i32) {
    %c0_i32 = arith.constant 0 : i32
    %c0_i32_0 = arith.constant 0 : i32
    %c0_i32_1 = arith.constant 0 : i32
    return %c0_i32, %c0_i32_0 : i32, i32
  }
  func.func @transform_21(%arg0: i32) -> (i32, i32) {
    %c0_i32 = arith.constant 0 : i32
    %c0_i32_0 = arith.constant 0 : i32
    %c0_i32_1 = arith.constant 0 : i32
    return %c0_i32, %c0_i32_0 : i32, i32
  }
  func.func @transform_22(%arg0: i32) -> (i32, i32) {
    %c0_i32 = arith.constant 0 : i32
    %c0_i32_0 = arith.constant 0 : i32
    %c0_i32_1 = arith.constant 0 : i32
    return %c0_i32, %c0_i32_0 : i32, i32
  }
  func.func @transform_23(%arg0: i32) -> (i32, i32) {
    %c0_i32 = arith.constant 0 : i32
    %c0_i32_0 = arith.constant 0 : i32
    %c0_i32_1 = arith.constant 0 : i32
    return %c0_i32, %c0_i32_0 : i32, i32
  }
  func.func @transform_24(%arg0: i32) -> (i32, i32) {
    %c0_i32 = arith.constant 0 : i32
    %c0_i32_0 = arith.constant 0 : i32
    %c0_i32_1 = arith.constant 0 : i32
    return %c0_i32, %c0_i32_0 : i32, i32
  }
  func.func @transform_25(%arg0: i32) -> (i32, i32) {
    %c0_i32 = arith.constant 0 : i32
    %c0_i32_0 = arith.constant 0 : i32
    %c0_i32_1 = arith.constant 0 : i32
    return %c0_i32, %c0_i32_0 : i32, i32
  }
  func.func @transform_26(%arg0: i32) -> (i32, i32) {
    %c0_i32 = arith.constant 0 : i32
    %c0_i32_0 = arith.constant 0 : i32
    %c0_i32_1 = arith.constant 0 : i32
    return %c0_i32, %c0_i32_0 : i32, i32
  }
  func.func @transform_27(%arg0: i32) -> (i32, i32) {
    %c0_i32 = arith.constant 0 : i32
    %c0_i32_0 = arith.constant 0 : i32
    %c0_i32_1 = arith.constant 0 : i32
    return %c0_i32, %c0_i32_0 : i32, i32
  }
  func.func @transform_28(%arg0: i32) -> (i32, i32) {
    %c0_i32 = arith.constant 0 : i32
    %c0_i32_0 = arith.constant 0 : i32
    %c0_i32_1 = arith.constant 0 : i32
    return %c0_i32, %c0_i32_0 : i32, i32
  }
  func.func @transform_29(%arg0: i32) -> (i32, i32) {
    %c0_i32 = arith.constant 0 : i32
    %c0_i32_0 = arith.constant 0 : i32
    %c0_i32_1 = arith.constant 0 : i32
    return %c0_i32, %c0_i32_0 : i32, i32
  }
  func.func @transform_30(%arg0: i32) -> (i32, i32) {
    %c0_i32 = arith.constant 0 : i32
    %c0_i32_0 = arith.constant 0 : i32
    %c0_i32_1 = arith.constant 0 : i32
    return %c0_i32, %c0_i32_0 : i32, i32
  }
  func.func @transform_31(%arg0: i32) -> (i32, i32) {
    %c0_i32 = arith.constant 0 : i32
    %c0_i32_0 = arith.constant 0 : i32
    %c0_i32_1 = arith.constant 0 : i32
    return %c0_i32, %c0_i32_0 : i32, i32
  }
  func.func @transform_32(%arg0: i32) -> (i32, i32, i32) {
    %c0_i32 = arith.constant 0 : i32
    %c0_i32_0 = arith.constant 0 : i32
    %c0_i32_1 = arith.constant 0 : i32
    return %arg0, %c0_i32, %c0_i32_0 : i32, i32, i32
  }
  func.func @transform_33(%arg0: i32) -> (i32, i32, i32) {
    %c0_i32 = arith.constant 0 : i32
    %c0_i32_0 = arith.constant 0 : i32
    %c0_i32_1 = arith.constant 0 : i32
    return %arg0, %c0_i32, %c0_i32_0 : i32, i32, i32
  }
}

</mosaic_0001>

<bundles_post_ra>
// kernel: multidcp_ehill_forward.1
= control target key start
LH: loop header
LB: loop body
LE: loop exit
PB: predicated region body
PF: predicated region fallthrough
CT: control target
= control target key end

     0   :  { %s9535_s6 = smov 1   ;;  %s9536_s10 = smov 2   ;;  %s10790_s0 = inlined_call_operand.smem [shape: u32[34], index: -1, kind: input, shape index: {}] }
   0x1   :  { %s9582_s5 = sld [smem:[%s10790_s0]]   ;;  %s9537_s14 = smov 3  }
   0x2   :  { %s9587_s9 = sld [smem:[%s10790_s0 + %s9535_s6]]   ;;  %s9538_s18 = smov 4  }
   0x3   :  { %s9592_s13 = sld [smem:[%s10790_s0 + %s9536_s10]]   ;;  %s9539_s22 = smov 5  }
   0x4   :  { %s9597_s17 = sld [smem:[%s10790_s0 + %s9537_s14]]   ;;  %s9540_s26 = smov 6  }
   0x5   :  { %s9602_s21 = sld [smem:[%s10790_s0 + %s9538_s18]]   ;;  %s9541_s30 = smov 7  }
   0x6   :  { %s9607_s25 = sld [smem:[%s10790_s0 + %s9539_s22]]   ;;  %s9542_s4 = smov 8  }
   0x7   :  { %10809 = sst [smem:[#allocation6_spill]] %s9582_s5  ;;  %s9543_s10 = smov 9  }
   0x8   :  { %10810 = sst [smem:[#allocation7_spill]] %s9587_s9  ;;  %s9544_s15 = smov 10  }
   0x9   :  { %10811 = sst [smem:[#allocation8_spill]] %s9592_s13  ;;  %s9545_s20 = smov 11  }
   0xa   :  { %10812 = sst [smem:[#allocation9_spill]] %s9597_s17  ;;  %s9547_s1 = smov 13  }
   0xb   :  { %10813 = sst [smem:[#allocation10_spill]] %s9602_s21  ;;  %s9548_s7 = smov 14  }
   0xc   :  { %s9612_s29 = sld [smem:[%s10790_s0 + %s9540_s26]]   ;;  %s9546_s26 = smov 12  }
   0xd   :  { %s9617_s3 = sld [smem:[%s10790_s0 + %s9541_s30]]   ;;  %s9550_s22 = smov 16  }
   0xe   :  { %s9622_s8 = sld [smem:[%s10790_s0 + %s9542_s4]]   ;;  %s9551_s28 = smov 17  }
   0xf   :  { %s9627_s14 = sld [smem:[%s10790_s0 + %s9543_s10]]   ;;  %s9566_s23 = smov 32  }
  0x10   :  { %s9632_s19 = sld [smem:[%s10790_s0 + %s9544_s15]]   ;;  %s9549_s15 = smov 15  }
  0x11   :  { %s9637_s24 = sld [smem:[%s10790_s0 + %s9545_s20]]  }
  0x12   :  { %s9642_s30 = sld [smem:[%s10790_s0 + %s9546_s26]]  }
  0x13   :  { %10814 = sst [smem:[#allocation11_spill]] %s9617_s3 }
  0x14   :  { %10815 = sst [smem:[#allocation12_spill]] %s9622_s8 }
  0x15   :  { %10816 = sst [smem:[#allocation13_spill]] %s9627_s14 }
  0x16   :  { %s9647_s6 = sld [smem:[%s10790_s0 + %s9547_s1]]   ;;  %s9567_s1 = smov 33  }
  0x17   :  { %s9652_s12 = sld [smem:[%s10790_s0 + %s9548_s7]]   ;;  %s9552_s7 = smov 18  }
  0x18   :  { %s9657_s20 = sld [smem:[%s10790_s0 + %s9549_s15]]   ;;  %s9553_s15 = smov 19  }
  0x19   :  { %s9662_s27 = sld [smem:[%s10790_s0 + %s9550_s22]]   ;;  %s9554_s22 = smov 20  }
  0x1a   :  { %s9667_s4 = sld [smem:[%s10790_s0 + %s9551_s28]]   ;;  %s9555_s28 = smov 21  }
  0x1b   :  { %s9672_s21 = sld [smem:[%s10790_s0 + %s9552_s7]]   ;;  %s9556_s7 = smov 22  }
  0x1c   :  { %10817 = sst [smem:[#allocation14_spill]] %s9647_s6 }
  0x1d   :  { %10818 = sst [smem:[#allocation15_spill]] %s9652_s12 }
  0x1e   :  { %s9677_s17 = sld [smem:[%s10790_s0 + %s9553_s15]]   ;;  %s9557_s15 = smov 23  }
  0x1f   :  { %10819 = sst [smem:[#allocation16_spill]] %s9662_s27 }
  0x20   :  { %10820 = sst [smem:[#allocation17_spill]] %s9667_s4 }
  0x21   :  { %10821 = sst [smem:[#allocation18_spill]] %s9672_s21 }
  0x22   :  { %s9682_s27 = sld [smem:[%s10790_s0 + %s9554_s22]]   ;;  %s9558_s22 = smov 24  }
  0x23   :  { %s9687_s4 = sld [smem:[%s10790_s0 + %s9555_s28]]   ;;  %s9559_s28 = smov 25  }
  0x24   :  { %10822 = sst [smem:[#allocation19_spill]] %s9677_s17 }
  0x25   :  { %s9692_s21 = sld [smem:[%s10790_s0 + %s9556_s7]]   ;;  %s9560_s7 = smov 26  }
  0x26   :  { %s9697_s17 = sld [smem:[%s10790_s0 + %s9557_s15]]   ;;  %s9561_s15 = smov 27  }
  0x28   :  { %10823 = sst [smem:[#allocation20_spill]] %s9682_s27 }
  0x29   :  { %10824 = sst [smem:[#allocation21_spill]] %s9687_s4 }
  0x2a   :  { %s9702_s27 = sld [smem:[%s10790_s0 + %s9558_s22]]   ;;  %s9562_s22 = smov 28  }
  0x2b   :  { %10825 = sst [smem:[#allocation22_spill]] %s9692_s21 }
  0x2c   :  { %10826 = sst [smem:[#allocation23_spill]] %s9697_s17 }
  0x2d   :  { %s9707_s4 = sld [smem:[%s10790_s0 + %s9559_s28]]   ;;  %s9563_s28 = smov 29  }
  0x2e   :  { %s9712_s21 = sld [smem:[%s10790_s0 + %s9560_s7]]   ;;  %s9564_s7 = smov 30  }
  0x2f   :  { %s9717_s17 = sld [smem:[%s10790_s0 + %s9561_s15]]   ;;  %s9565_s15 = smov 31  }
  0x30   :  { %10827 = sst [smem:[#allocation24_spill]] %s9702_s27 }
  0x31   :  { %s9722_s27 = sld [smem:[%s10790_s0 + %s9562_s22]]  }
  0x33   :  { %10828 = sst [smem:[#allocation25_spill]] %s9707_s4 }
  0x34   :  { %10829 = sst [smem:[#allocation26_spill]] %s9712_s21 }
  0x35   :  { %10830 = sst [smem:[#allocation27_spill]] %s9717_s17 }
  0x36   :  { %s9727_s4 = sld [smem:[%s10790_s0 + %s9563_s28]]  }
  0x37   :  { %10831 = sst [smem:[#allocation28_spill]] %s9722_s27 }
  0x38   :  { %s9732_s21 = sld [smem:[%s10790_s0 + %s9564_s7]]  }
  0x39   :  { %s7655_s17 = sld [smem:[%s10790_s0 + %s9565_s15]]  }
  0x3a   :  { %s9740_s27 = sld [smem:[%s10790_s0 + %s9566_s23]]  }
  0x3c   :  { %10832 = sst [smem:[#allocation29_spill]] %s9727_s4 }
  0x3d   :  { %s9745_s4 = sld [smem:[%s10790_s0 + %s9567_s1]]  }
  0x3f   :  { %v73_v0 = vstv %s7655_s17 }
  0x40   :  { %74 = vst [vmem:[#allocation2] sm:$0x1] %v73_v0 }
  0x41   :  { %75 = vsyncpa [#allocation4], 0 }
  0x42   :  { %77 = vsyncpa [#allocation4 + $0x1], 0  ;;  %s9747_s7 = smov 0   ;;  %s9749_s10 = smov 0  }
  0x43   :  { %s9751_s11 = smov 0   ;;  %s9753_s15 = smov 0  }
  0x44 LB: > { %s10833_s14 = sld [smem:[#allocation13_spill]]  ;;  %s10834_s13 = sld [smem:[#allocation8_spill]]  ;;  %s9533_s15 = sphi %s9753_s15, %s10868_s15   ;;  %s9529_s11 = sphi %s9751_s11, %s10867_s11   ;;  %s9525_s10 = sphi %s9749_s10, %s10866_s10   ;;  %s9521_s7 = sphi %s9747_s7, %s10865_s7  }
  0x45   : > { %s10835_s12 = sld [smem:[#allocation15_spill]]  ;;  %s10836_s6 = sld [smem:[#allocation14_spill]] }
  0x46   : > { %s9768_s0 = sadd.s32 4294967295, %s9533_s15   ;;  %s7659_s17 = sadd.s32 4294967294, %s9533_s15  }
  0x47   : > { %s9772_s16 = sadd.s32 1, %s9533_s15   ;;  %s808_s18 = sadd.s32 1, %s9529_s11 }
  0x48   : > { %s805_s23 = ssub.s32 %s9533_s15, %s9772_s16  ;;  %p818_p0 = scmp.ne.s32.totalorder %s9529_s11, %s9525_s10 }
  0x49   : > { %p806_p1 = scmp.eq.s32.totalorder %s805_s23, 0  ;;  %p819_p2 = scmp.eq.s32.totalorder %s9768_s0, 1 }
  0x4a   : > { %p824_p3 = scmp.ne.s32.totalorder %s9525_s10, %s9521_s7  ;;  %p825_p4 = scmp.eq.s32.totalorder %s7659_s17, 1 }
  0x4b   : > { %s9783_s22 = scalar_select %p806_p1, %s9529_s11, %s808_s18  }
  0x4c   : > { %p9785_p5 = por %p819_p2, %p818_p0  ;;  %p9789_p6 = por %p825_p4, %p824_p3 }
  0x4d   : > { %p7662_p7 = scmp.ge.s32.totalorder %s9533_s15, 1  ;;  %p953_p8 = scmp.lt.s32.totalorder %s9533_s15, 3 }
  0x4f   : > { %p954_p9 = pnand %p7662_p7, %p953_p8 }
  0x50   : > { %s10839_s3 = sld [smem:[#allocation11_spill]] (!%p954_p9)  ;;  %vm1183_vm0 = vcmask (!%p954_p9), 1043456   ;;  %v1168_v2 = vld [vmem:[%s10834_s13] sm:$0xff] (!%p954_p9)  ;;  %v9568_v3 = vmov (!%p954_p9), 0.0   ;;  %vm9569_vm1 = vmmov (!%p954_p9), 0   ;;  %s10840_s5 = sld [smem:[#allocation6_spill]] (!%p954_p9)  ;;  %v1070_v38 = vlaneseq (!%p954_p9) }
  0x51   : > { %957 = sbr.rel (%p954_p9) target bundleno = 10631 (0x2987), region = 148  ;;  %8455 = vmatprep.subr.bf16.mxu1 (!%p954_p9), %v9568_v3  ;;  %8457 = vmatprep.mubr.msk.bf16.mxu1 (!%p954_p9), %vm9569_vm1, %v9568_v3  ;;  %v1169_v5 = vld [vmem:[%s10834_s13 + $0x8] sm:$0xff] (!%p954_p9)  ;;  %v9156_v6 = vld [vmem:[%s9607_s25] sm:$0xff] (!%p954_p9)   ;;  %vm1179_vm2 = vcmask (!%p954_p9), 64512   ;;  %p1050_p10 = scmp.lt.s32.totalorder (!%p954_p9), %s9768_s0, 1  ;;  %vm1110_vm3 = vcmask (!%p954_p9), 130048  }
  0x52   : > { %v1171_v7 = vpack.c.bf16 (!%p954_p9), %v1169_v5, %v1168_v2  ;;  %8449 = vmatprep.subr.bf16.mxu0 (!%p954_p9), %v9568_v3  ;;  %8451 = vmatprep.mubr.msk.bf16.mxu0 (!%p954_p9), %vm9569_vm1, %v9568_v3  ;;  %s10841_s8 = sld [smem:[#allocation12_spill]] (!%p954_p9)  ;;  %v9157_v11 = vld [vmem:[%s10833_s14] sm:$0xff] (!%p954_p9)   ;;  %v9158_v12 = vld [vmem:[%s10833_s14 + $0x10] sm:$0xff] (!%p954_p9)   ;;  %v9159_v13 = vld [vmem:[%s10833_s14 + $0x8] sm:$0xff] (!%p954_p9)   ;;  %vm1157_vm4 = vcmask (!%p954_p9), 261120   ;;  %vm1159_vm5 = vcmask (!%p954_p9), 254976  }
  0x53   : > { %8450 = vmatpush3.bf16.msra.mxu0 (!%p954_p9), %v9156_v6  ;;  %v9160_v14 = vld [vmem:[%s10833_s14 + $0x18] sm:$0xff] (!%p954_p9)   ;;  %v9161_v22 = vld [vmem:[%s10833_s14 + $0x20] sm:$0xff] (!%p954_p9)   ;;  %v9162_v28 = vld [vmem:[%s10833_s14 + $0x28] sm:$0xff] (!%p954_p9)   ;;  %v1071_v39 = vand.u32 (!%p954_p9), 127, %v1070_v38  ;;  %s10844_s9 = sld [smem:[#allocation7_spill]] (!%p954_p9)  ;;  %s10847_s23 = sld [smem:[#allocation16_spill]] (!%p954_p9) }
  0x54   : > { %8461 = vmatprep.subr.bf16.mxu0 (!%p954_p9), %v9568_v3  ;;  %v7671_v23 = vld [vmem:[%s9612_s29] ss:$0 sm:$0xff] (!%p954_p9)  ;;  %v7685_v42 = vld [vmem:[%s9632_s19 + $0x1] ss:$0 sm:$0xff] (!%p954_p9)  ;;  %vm9863_vm13 = vmpackc.low (!%p954_p9), %vm1157_vm4, %vm1157_vm4  ;;  %s9573_s13 = smov (!%p954_p9), [#allocation3]  }
  0x55   : > { %vm1077_vm6 = vcmp.ge.s32.totalorder (!%p954_p9), %v1071_v39, 8  ;;  %vm1078_vm7 = vcmp.lt.s32.totalorder (!%p954_p9), %v1071_v39, 16  ;;  %v7676_v40 = vld [vmem:[%s9632_s19] ss:$0 sm:$0xff] (!%p954_p9)  ;;  %vm1073_vm8 = vcmp.lt.s32.totalorder (!%p954_p9), %v1071_v39, 8  ;;  %vm1082_vm10 = vcmp.ge.s32.totalorder (!%p954_p9), %v1071_v39, 16 }
  0x56   : > { %v1170_v1 = vld [vmem:[%s10839_s3] sm:$0xf] (!%p954_p9)  ;;  %vm1079_vm9 = vmand (!%p954_p9), %vm1077_vm6, %vm1078_vm7  ;;  %v9854_v47 = vsel (!%p954_p9), %vm1073_vm8, 1.0, %v9568_v3  ;;  %vm1083_vm11 = vcmp.lt.s32.totalorder (!%p954_p9), %v1071_v39, 24  ;;  %vm1087_vm12 = vcmp.ge.s32.totalorder (!%p954_p9), %v1071_v39, 24  ;;  %vm1088_vm14 = vcmp.lt.s32.totalorder (!%p954_p9), %v1071_v39, 32 }
  0x57   : > { %v1185_v4 = vsel (!%p954_p9), %vm1183_vm0, %v1170_v1, 0  ;;  %v9857_v48 = vsel (!%p954_p9), %vm1079_vm9, 1.0, %v9568_v3  ;;  %v7694_v61 = vld [vmem:[%s9632_s19 + $0x2] ss:$0 sm:$0xff] (!%p954_p9)  ;;  %vm1084_vm15 = vmand (!%p954_p9), %vm1082_vm10, %vm1083_vm11  ;;  %vm2753_vm6 = vcmask (!%p954_p9), 1041408   ;;  %vm9570_vm7 = vmmov (!%p954_p9), 1  }
  0x58   : > { %8456 = vmatpush3.bf16.msra.mxu1 %v1185_v4  ;;  %s9808_s28 = scalar_select %p1050_p10, %s9768_s0, 1  ;;  %v7674_v15 = vld [vmem:[%s10841_s8] ss:$0 sm:$0xff]  ;;  %v9891_v4 = vsel %vm1084_vm15, 1.0, %v9568_v3  ;;  %vm10069_vm8 = vmpackc.low %vm2753_vm6, %vm9570_vm7  ;;  %vm2615_vm10 = vcmask 80896   ;;  %vm6946_vm11 = vcmask 588800  }
  0x59   : > { %8469 = vmatprep.subr.bf16.mxu1 %v9568_v3  ;;  %s10857_s8 = sld [smem:[#allocation26_spill]]  ;;  %vm7096_vm15 = vcmask 401408  }
  0x5a   : > { %s10798_s2 = sshll.u32 %s9808_s28, 4  ;;  %s1057_s18 = scalar_lea.vmem %s10844_s9, %s9808_s28 }
  0x5b   : > { %8458 = vmatmul.mubr.msk.bf16.vlgmr.msra.gmra.mrb[0].mxu1 %vm1179_vm2, %v1171_v7  ;;  %s1054_s17 = scalar_lea.vmem %s10840_s5, %s10798_s2  ;;  %s10850_s2 = sld [smem:[#allocation9_spill]] }
  0x5c   : > { %8473 = vmatprep.mubr.msk.bf16.mxu1 %vm9569_vm1, %v9568_v3  ;;  %v1092_v8 = vld [vmem:[%s1054_s17] sm:$0xff]  ;;  %v1093_v9 = vld [vmem:[%s1054_s17 + $0x8] sm:$0x3]  ;;  %8470 = vmatpush3.bf16.msra.mxu1 %v9158_v12  ;;  %s10848_s17 = sld [smem:[#allocation17_spill]]  ;;  %s10854_s5 = sld [smem:[#allocation20_spill]] }
  0x5d   : > { %v1096_v10 = vpack.c.bf16 %v1093_v9, %v1092_v8  ;;  %8471 = vmatprep.subr.bf16.mxu1 %v9568_v3  ;;  %s10863_s9 = sand.u32 1, %s9525_s10  }
  0x5f   : > { %8452 = vmatmul.mubr.msk.bf16.vlgmr.msra.gmra.mrb[0].mxu0 %vm1110_vm3, %v1096_v10 }
  0x60   : > { %8465 = vmatprep.mubr.msk.bf16.mxu0 %vm9569_vm1, %v9568_v3  ;;  %8462 = vmatpush3.bf16.msra.mxu0 %v9157_v11 }
  0x61   : > { %8463 = vmatprep.subr.bf16.mxu0 %v9568_v3  ;;  %8472 = vmatpush3.bf16.msra.mxu1 %v9160_v14  ;;  %s1060_s3 = scalar_lea.vmem %s10850_s2, %s9808_s28  ;;  %s10852_s2 = sld [smem:[#allocation21_spill]] }
  0x64   : > { %8464 = vmatpush3.bf16.msra.mxu0 %v9159_v13 }
  0x65   : > { %8477 = vmatprep.subr.bf16.mxu0 %v9568_v3 }
 0x12e   : > { %v1221_v16 = vpop.f32.mrb[0].mxu1 }
 0x12f   : > { %v8459_v17 = vpop.f32.mrb[1].mxu1  ;;  %v9830_v19 = vadd.f32 %v7674_v15, %v1221_v16 }
 0x130   : > { %v1224_v18 = vpop.f32.mrb[2].mxu1 }
 0x131   : > { %v9832_v20 = vadd.f32 %v7674_v15, %v1224_v18  ;;  %v8460_v21 = vpop.f32.mrb[3].mxu1 }
 0x132   : > { %v1148_v25 = vpop.f32.mrb[0].mxu0 }
 0x133   : > { %v1235_v24 = vpack.c.bf16 %v9832_v20, %v9830_v19  ;;  %v1149_v26 = vadd.f32 %v7671_v23, %v1148_v25  ;;  %v8453_v27 = vpop.f32.mrb[1].mxu0 }
 0x134   : > { %v1151_v29 = vpop.f32.mrb[2].mxu0 }
 0x135   : > { %8466 = vmatmul.mubr.msk.bf16.vlgmr.msra.gmra.mrb[4].mxu0 %vm1157_vm4, %v1235_v24  ;;  %8474 = vmatmul.mubr.msk.bf16.vlgmr.msra.gmra.mrb[4].mxu1 %vm1157_vm4, %v1235_v24  ;;  %v1155_v30 = vmax.f32 %v1149_v26, 0.0  ;;  %v1152_v31 = vadd.f32 %v7671_v23, %v1151_v29  ;;  %v8454_v32 = vpop.f32.mrb[3].mxu0 }
 0x136   : > { %8478 = vmatpush3.bf16.msra.mxu0 %v9161_v22  ;;  %8481 = vmatprep.mubr.msk.bf16.mxu0 %vm9569_vm1, %v9568_v3 }
 0x137   : > { %8479 = vmatprep.subr.bf16.mxu0 %v9568_v3  ;;  %v1158_v33 = vsel %vm1157_vm4, %v1155_v30, 0.0  ;;  %v1156_v34 = vmax.f32 %v1152_v31, 0.0 }
 0x139   : > { %v1160_v35 = vsel %vm1159_vm5, %v1156_v34, 0.0  ;;  %v9845_v36 = vpack.c.bf16 %v1156_v34, %v1155_v30  ;;  %vm1089_vm5 = vmand %vm1087_vm12, %vm1088_vm14  ;;  %vm7048_vm12 = vcmask 818176   ;;  %vm7311_vm14 = vcmask 1040384  }
 0x13a   : > { %8480 = vmatpush3.bf16.msra.mxu0 %v9162_v28  ;;  %v9847_v37 = vadd.f32 %v1160_v35, %v1158_v33  ;;  %v9894_v5 = vsel %vm1089_vm5, 1.0, %v9568_v3 }
 0x13d   : > { %8482 = vmatmul.mubr.msk.bf16.vlgmr.msra.gmra.mrb[8].mxu0 %vm1157_vm4, %v1235_v24 }
 0x208   : > { %v1292_v41 = vpop.f32.mrb[4].mxu0  ;;  %v1358_v43 = vpop.f32.mrb[4].mxu1 }
 0x209   : > { %v1293_v44 = vadd.f32 %v7676_v40, %v1292_v41  ;;  %v8467_v45 = vpop.f32.mrb[5].mxu0  ;;  %v8475_v46 = vpop.f32.mrb[5].mxu1  ;;  %v1359_v52 = vadd.f32 %v7685_v42, %v1358_v43 }
 0x20a   : > { %v1295_v49 = vpop.f32.mrb[6].mxu0  ;;  %v1361_v50 = vpop.f32.mrb[6].mxu1 }
 0x20b   : > { %v9859_v51 = vmul.f32 0.35355338, %v1293_v44  ;;  %v1362_v53 = vadd.f32 %v7685_v42, %v1361_v50  ;;  %v8468_v54 = vpop.f32.mrb[7].mxu0  ;;  %v8476_v55 = vpop.f32.mrb[7].mxu1  ;;  %v1296_v60 = vadd.f32 %v7676_v40, %v1295_v49 }
 0x20d   : > { %v9867_v57 = vpack.c.bf16 %v1362_v53, %v1359_v52  ;;  %v1433_v58 = vmul.f32 %v9854_v47, %v9859_v51  ;;  %v1546_v59 = vmul.f32 %v9857_v48, %v9859_v51  ;;  %v9885_v1 = vmul.f32 0.35355338, %v1296_v60 }
 0x20e   : > { %v1815_v24 = vmul.f32 %v9891_v4, %v9859_v51 }
 0x20f   : > { %8881 = vmatprep.subr.msk.bf16.mxu1 %vm9863_vm13, %v9867_v57  ;;  %8489 = vmatprep.mubr.msk.f32.mxu1 %vm1157_vm4, %v1433_v58  ;;  %v1434_v16 = vmul.f32 %v9854_v47, %v9885_v1  ;;  %v1547_v17 = vmul.f32 %v9857_v48, %v9885_v1  ;;  %v1816_v25 = vmul.f32 %v9891_v4, %v9885_v1 }
 0x210   : > { %8887 = vmatprep.subr.msk.bf16.mxu0 %vm9863_vm13, %v9867_v57  ;;  %v1424_v62 = vpop.f32.mrb[8].mxu0  ;;  %8496 = vmatprep.mubr.msk.f32.mxu0 %vm1157_vm4, %v1546_v59 }
 0x211   : > { %v1425_v63 = vadd.f32 %v7694_v61, %v1424_v62  ;;  %8884 = vmatpush3.bf16.xpose.msk.msra.mxu1 %vm9863_vm13, %v9867_v57  ;;  %v8483_v0 = vpop.f32.mrb[9].mxu0  ;;  %8890 = vmatpush3.bf16.xpose.msk.msra.mxu0 %vm9863_vm13, %v9867_v57 }
 0x212   : > { %v1427_v2 = vpop.f32.mrb[10].mxu0  ;;  %8901 = vmatprep.subr.msk.bf16.mxu0 %vm9863_vm13, %v9867_v57 }
 0x213   : > { %v1428_v6 = vadd.f32 %v7694_v61, %v1427_v2  ;;  %v8484_v7 = vpop.f32.mrb[11].mxu0  ;;  %v1651_v8 = vmul.f32 %v9857_v48, %v1425_v63  ;;  %v1544_v9 = vmul.f32 %v9854_v47, %v1425_v63  ;;  %v1920_v10 = vmul.f32 %v9891_v4, %v1425_v63 }
 0x214   : > { %v2110_v11 = vmul.f32 %v9894_v5, %v1425_v63 }
 0x215   : > { %v1652_v12 = vmul.f32 %v9857_v48, %v1428_v6  ;;  %v1545_v13 = vmul.f32 %v9854_v47, %v1428_v6  ;;  %v1921_v14 = vmul.f32 %v9891_v4, %v1428_v6  ;;  %v2111_v15 = vmul.f32 %v9894_v5, %v1428_v6 }
 0x217   : > { %v8891_v18 = vpack.c.bf16 %v1652_v12, %v1651_v8  ;;  %v9911_v21 = vpack.c.bf16 %v1545_v13, %v1544_v9  ;;  %v9913_v22 = vpack.c.bf16 %v1921_v14, %v1920_v10  ;;  %v9915_v23 = vpack.c.bf16 %v2111_v15, %v2110_v11 }
 0x218   : > { %8490 = vmatmul.mubr.msk.f32.vlgmr.msra.gmra.mrb[8].mxu1 %vm1157_vm4, %v1434_v16  ;;  %8497 = vmatmul.mubr.msk.f32.vlgmr.msra.gmra.mrb[12].mxu0 %vm1157_vm4, %v1547_v17 }
 0x219   : > { %8892 = vmatprep.subr.bf16.mxu1 %v8891_v18  ;;  %8904 = vmatpush3.bf16.xpose.msk.msra.mxu0 %vm9863_vm13, %v9867_v57 }
 0x21a   : > { %8517 = vmatprep.mubr.msk.f32.mxu0 %vm1157_vm4, %v1815_v24  ;;  %8894 = vmatpush3.bf16.msra.mxu1 %v8891_v18 }
 0x21b   : > { %8541 = vmatprep.subr.bf16.mxu0 %v9568_v3  ;;  %8896 = vmatprep.subr.bf16.mxu1 %v9911_v21 }
 0x220   : > { %8518 = vmatmul.mubr.msk.f32.vlgmr.msra.gmra.mrb[14].mxu0 %vm1157_vm4, %v1816_v25 }
 0x221   : > { %8545 = vmatprep.mubr.msk.bf16.mxu0 %vm9569_vm1, %v9568_v3 }
 0x2eb   : > { %v8491_v26 = vpop.f32.mrb[8].mxu1  ;;  %v8498_v27 = vpop.f32.mrb[12].mxu0 }
 0x2ec   : > { %v1513_v28 = vpop.f32.mrb[9].mxu1  ;;  %v1620_v29 = vpop.f32.mrb[13].mxu0  ;;  %v1525_v32 = vsel %vm1110_vm3, %v8491_v26, -inf  ;;  %v1632_v33 = vsel %vm1110_vm3, %v8498_v27, -inf }
 0x2ed   : > { %v1522_v30 = vsel %vm1110_vm3, %v1513_v28, -inf  ;;  %v1629_v31 = vsel %vm1110_vm3, %v1620_v29, -inf }
 0x2ee   : > { %1523 = vmax.xlane.f32.xlu1 %v1522_v30  ;;  %1630 = vmax.xlane.f32.xlu0 %v1629_v31 }
 0x2f2   : > { %1526 = vmax.xlane.f32.xlu1 %v1525_v32  ;;  %1633 = vmax.xlane.f32.xlu0 %v1632_v33 }
 0x2f3   : > { %v8519_v34 = vpop.f32.mrb[14].mxu0 }
 0x2f4   : > { %v1889_v35 = vpop.f32.mrb[15].mxu0  ;;  %v1901_v39 = vsel %vm1110_vm3, %v8519_v34, -inf }
 0x2f5   : > { %v1898_v40 = vsel %vm1110_vm3, %v1889_v35, -inf }
 0x2f6   : > { %1902 = vmax.xlane.f32.xlu1 %v1901_v39  ;;  %1899 = vmax.xlane.f32.xlu0 %v1898_v40 }
 0x37b   : > { %v1524_v41 = vpop.xlane.xlu1 %1523  ;;  %v1631_v43 = vpop.xlane.xlu0 %1630 }
 0x37c   : > { %v1528_v42 = vsub.f32 %v1513_v28, %v1524_v41  ;;  %v1635_v44 = vsub.f32 %v1620_v29, %v1631_v43  ;;  %v2005_v41 = vmul.f32 %v9894_v5, %v9859_v51 }
 0x37e   : > { %v1530_v45 = vmul.f32 1.442695, %v1528_v42  ;;  %v1637_v46 = vmul.f32 1.442695, %v1635_v44 }
 0x37f   : > { %v1527_v49 = vpop.xlane.xlu1 %1526  ;;  %v1634_v52 = vpop.xlane.xlu0 %1633 }
 0x380   : > { %v1529_v50 = vsub.f32 %v8491_v26, %v1527_v49  ;;  %9319 = vpow2.f32 %v1637_v46  ;;  %v1636_v53 = vsub.f32 %v8498_v27, %v1634_v52 }
 0x381   : > { %9321 = vpow2.f32 %v1530_v45 }
 0x382   : > { %v1532_v54 = vmul.f32 1.442695, %v1529_v50  ;;  %v1639_v55 = vmul.f32 1.442695, %v1636_v53 }
 0x383   : > { %v1903_v58 = vpop.xlane.xlu1 %1902  ;;  %v1900_v60 = vpop.xlane.xlu0 %1899 }
 0x384   : > { %v1905_v59 = vsub.f32 %v8519_v34, %v1903_v58  ;;  %9323 = vpow2.f32 %v1639_v55  ;;  %v1904_v61 = vsub.f32 %v1889_v35, %v1900_v60  ;;  %v9165_v55 = vld [vmem:[%s10833_s14 + $0x30] sm:$0xff]  }
 0x385   : > { %9325 = vpow2.f32 %v1532_v54  ;;  %8542 = vmatpush3.bf16.msra.mxu0 %v9165_v55 }
 0x386   : > { %v1908_v62 = vmul.f32 1.442695, %v1905_v59  ;;  %v1906_v63 = vmul.f32 1.442695, %v1904_v61  ;;  %8543 = vmatprep.subr.bf16.mxu0 %v9568_v3 }
 0x388   : > { %9327 = vpow2.f32 %v1906_v63  ;;  %v9163_v63 = vld [vmem:[%s10833_s14 + $0x50] sm:$0xff]  }
 0x389   : > { %9329 = vpow2.f32 %v1908_v62 }
 0x38a   : > { %v9320_v0 = vpop.eup %9319 }
 0x38b   : > { %v1641_v2 = vsel %vm1110_vm3, %v9320_v0, 0.0  ;;  %v9322_v6 = vpop.eup %9321 }
 0x38c   : > { %1642 = vadd.xlane.f32.xlu0 %v1641_v2  ;;  %v1534_v8 = vsel %vm1110_vm3, %v9322_v6, 0.0  ;;  %v9164_v2 = vld [vmem:[%s10833_s14 + $0x58] sm:$0xff]  }
 0x38e   : > { %v9324_v7 = vpop.eup %9323 }
 0x38f   : > { %v1644_v9 = vsel %vm1110_vm3, %v9324_v7, 0.0  ;;  %v9326_v10 = vpop.eup %9325 }
 0x390   : > { %1535 = vadd.xlane.f32.xlu0 %v1534_v8  ;;  %1645 = vadd.xlane.f32.xlu1 %v1644_v9  ;;  %v1537_v12 = vsel %vm1110_vm3, %v9326_v10, 0.0 }
 0x392   : > { %v9328_v11 = vpop.eup %9327 }
 0x393   : > { %v1910_v13 = vsel %vm1110_vm3, %v9328_v11, 0.0  ;;  %v9330_v14 = vpop.eup %9329 }
 0x394   : > { %1538 = vadd.xlane.f32.xlu1 %v1537_v12  ;;  %1911 = vadd.xlane.f32.xlu0 %v1910_v13  ;;  %v1913_v15 = vsel %vm1110_vm3, %v9330_v14, 0.0 }
 0x398   : > { %1914 = vadd.xlane.f32.xlu1 %v1913_v15 }
 0x419   : > { %v1643_v16 = vpop.xlane.xlu0 %1642 }
 0x41a   : > { %9331 = vrcp.f32 %v1643_v16 }
 0x41d   : > { %v1646_v17 = vpop.xlane.xlu1 %1645  ;;  %v1536_v18 = vpop.xlane.xlu0 %1535 }
 0x41e   : > { %9333 = vrcp.f32 %v1646_v17 }
 0x41f   : > { %9335 = vrcp.f32 %v1536_v18  ;;  %v7727_v18 = vld [vmem:[%s9632_s19 + $0x3] ss:$0 sm:$0xff] }
 0x421   : > { %v1539_v24 = vpop.xlane.xlu1 %1538  ;;  %v1912_v25 = vpop.xlane.xlu0 %1911 }
 0x422   : > { %9337 = vrcp.f32 %v1539_v24 }
 0x423   : > { %9339 = vrcp.f32 %v1912_v25 }
 0x424   : > { %v9332_v26 = vpop.eup %9331 }
 0x425   : > { %v1649_v27 = vmul.f32 %v9332_v26, %v9320_v0  ;;  %v1915_v31 = vpop.xlane.xlu1 %1914 }
 0x426   : > { %9341 = vrcp.f32 %v1915_v31 }
 0x427   : > { %8503 = vmatprep.mubr.msk.f32.mxu1 %vm1110_vm3, %v1649_v27 }
 0x428   : > { %v9334_v28 = vpop.eup %9333 }
 0x429   : > { %v9336_v29 = vpop.eup %9335  ;;  %v1650_v30 = vmul.f32 %v9334_v28, %v9324_v7 }
 0x42a   : > { %v1542_v32 = vmul.f32 %v9336_v29, %v9322_v6  ;;  %v9166_v6 = vld [vmem:[%s10833_s14 + $0x38] sm:$0xff]  }
 0x42b   : > { %8504 = vmatmul.mubr.msk.f32.vlgmr.msra.gmra.mrb[10].mxu1 %vm1110_vm3, %v1650_v30  ;;  %8544 = vmatpush3.bf16.msra.mxu0 %v9166_v6 }
 0x42c   : > { %8898 = vmatpush3.bf16.msra.mxu1 %v9911_v21  ;;  %8510 = vmatprep.mubr.msk.f32.mxu1 %vm1110_vm3, %v1542_v32  ;;  %v9338_v33 = vpop.eup %9337 }
 0x42d   : > { %8906 = vmatprep.subr.bf16.mxu1 %v9913_v22  ;;  %v9340_v34 = vpop.eup %9339  ;;  %v1543_v35 = vmul.f32 %v9338_v33, %v9326_v10  ;;  %8549 = vmatprep.subr.bf16.mxu0 %v9568_v3  ;;  %v7747_v10 = vld [vmem:[%s9632_s19 + $0x5] ss:$0 sm:$0xff] }
 0x42e   : > { %v1918_v39 = vmul.f32 %v9340_v34, %v9328_v11 }
 0x430   : > { %v9342_v40 = vpop.eup %9341 }
 0x431   : > { %v1919_v21 = vmul.f32 %v9342_v40, %v9330_v14 }
 0x433   : > { %8511 = vmatmul.mubr.msk.f32.vlgmr.msra.gmra.mrb[10].mxu1 %vm1110_vm3, %v1543_v35 }
 0x434   : > { %8908 = vmatpush3.bf16.msra.mxu1 %v9913_v22  ;;  %8524 = vmatprep.mubr.msk.f32.mxu1 %vm1110_vm3, %v1918_v39  ;;  %v2006_v22 = vmul.f32 %v9894_v5, %v9885_v1 }
 0x435   : > { %8911 = vmatprep.subr.msk.bf16.mxu1 %vm9863_vm13, %v9867_v57 }
 0x43b   : > { %8525 = vmatmul.mubr.msk.f32.vlgmr.msra.gmra.mrb[10].mxu1 %vm1110_vm3, %v1919_v21 }
 0x43c   : > { %8531 = vmatprep.mubr.msk.f32.mxu1 %vm1157_vm4, %v2005_v41 }
 0x43d   : > { %8914 = vmatpush3.bf16.xpose.msk.msra.mxu1 %vm9863_vm13, %v9867_v57 }
 0x43e   : > { %8916 = vmatprep.subr.bf16.mxu1 %v9915_v23 }
 0x444   : > { %8532 = vmatmul.mubr.msk.f32.vlgmr.msra.gmra.mrb[12].mxu1 %vm1157_vm4, %v2006_v22 }
 0x445   : > { %8918 = vmatpush3.bf16.msra.mxu1 %v9915_v23 }
 0x446   : > { %8557 = vmatprep.subr.bf16.mxu1 %v9568_v3 }
 0x517   : > { %v8533_v51 = vpop.f32.mrb[12].mxu1 }
 0x518   : > { %v2079_v42 = vpop.f32.mrb[13].mxu1  ;;  %v2091_v43 = vsel %vm1110_vm3, %v8533_v51, -inf }
 0x519   : > { %2092 = vmax.xlane.f32.xlu1 %v2091_v43  ;;  %v2088_v44 = vsel %vm1110_vm3, %v2079_v42, -inf  ;;  %v9168_v43 = vld [vmem:[%s10833_s14 + $0x48] sm:$0xff]  }
 0x51a   : > { %2089 = vmax.xlane.f32.xlu0 %v2088_v44 }
 0x5a6   : > { %v2093_v57 = vpop.xlane.xlu1 %2092 }
 0x5a7   : > { %v2095_v45 = vsub.f32 %v8533_v51, %v2093_v57  ;;  %v2090_v46 = vpop.xlane.xlu0 %2089 }
 0x5a8   : > { %v2094_v49 = vsub.f32 %v2079_v42, %v2090_v46 }
 0x5a9   : > { %v2098_v1 = vmul.f32 1.442695, %v2095_v45 }
 0x5aa   : > { %v2096_v50 = vmul.f32 1.442695, %v2094_v49 }
 0x5ab   : > { %9343 = vpow2.f32 %v2098_v1 }
 0x5ac   : > { %9345 = vpow2.f32 %v2096_v50 }
 0x5b5   : > { %v9344_v23 = vpop.eup %9343 }
 0x5b6   : > { %v9346_v52 = vpop.eup %9345  ;;  %v2103_v53 = vsel %vm1110_vm3, %v9344_v23, 0.0 }
 0x5b7   : > { %2104 = vadd.xlane.f32.xlu1 %v2103_v53  ;;  %v2100_v54 = vsel %vm1110_vm3, %v9346_v52, 0.0 }
 0x5b8   : > { %2101 = vadd.xlane.f32.xlu0 %v2100_v54 }
 0x644   : > { %v2105_v58 = vpop.xlane.xlu1 %2104 }
 0x645   : > { %9347 = vrcp.f32 %v2105_v58  ;;  %v2102_v59 = vpop.xlane.xlu0 %2101  ;;  %v7732_v58 = vld [vmem:[%s9642_s30] ss:$0 sm:$0xff] }
 0x646   : > { %9349 = vrcp.f32 %v2102_v59 }
 0x64f   : > { %v9348_v60 = vpop.eup %9347 }
 0x650   : > { %v9350_v61 = vpop.eup %9349  ;;  %v2109_v0 = vmul.f32 %v9348_v60, %v9344_v23  ;;  %v7731_v23 = vld [vmem:[%s9637_s24] ss:$0 sm:$0xff] }
 0x651   : > { %v2108_v62 = vmul.f32 %v9350_v61, %v9346_v52 }
 0x653   : > { %8538 = vmatprep.mubr.msk.f32.mxu1 %vm1110_vm3, %v2108_v62  ;;  %v9169_v62 = vld [vmem:[%s10833_s14 + $0x60] sm:$0xff]  }
 0x654   : > { %8539 = vmatmul.mubr.msk.f32.vlgmr.msra.gmra.mrb[10].mxu1 %vm1110_vm3, %v2109_v0  ;;  %v9170_v0 = vld [vmem:[%s10833_s14 + $0x68] sm:$0xff]  }
 0x655   : > { %8558 = vmatpush3.bf16.msra.mxu1 %v9163_v63  ;;  %8561 = vmatprep.mubr.msk.bf16.mxu1 %vm9569_vm1, %v9568_v3 }
 0x656   : > { %8559 = vmatprep.subr.bf16.mxu1 %v9568_v3 }
 0x659   : > { %8560 = vmatpush3.bf16.msra.mxu1 %v9164_v2  ;;  %v7738_v2 = vld [vmem:[%s9632_s19 + $0x4] ss:$0 sm:$0xff] }
 0x65c   : > { %8562 = vmatmul.mubr.msk.bf16.vlgmr.msra.gmra.mrb[16].mxu1 %vm1157_vm4, %v9845_v36 }
 0x727   : > { %v8540_v7 = vpop.f32.mrb[10].mxu1 }
 0x728   : > { %v2184_v8 = vpop.f32.mrb[11].mxu1 }
 0x729   : > { %v2200_v9 = vpack.c.bf16 %v8540_v7, %v2184_v8 }
 0x72b   : > { %8546 = vmatmul.mubr.msk.bf16.vlgmr.msra.gmra.mrb[16].mxu0 %vm1157_vm4, %v2200_v9 }
 0x72c   : > { %8553 = vmatprep.mubr.msk.bf16.mxu0 %vm9569_vm1, %v9568_v3 }
 0x72f   : > { %v2445_v11 = vpop.f32.mrb[16].mxu1 }
 0x730   : > { %v8563_v12 = vpop.f32.mrb[17].mxu1  ;;  %v2446_v14 = vadd.f32 %v7747_v10, %v2445_v11 }
 0x731   : > { %v2448_v13 = vpop.f32.mrb[18].mxu1 }
 0x732   : > { %v2449_v15 = vadd.f32 %v7747_v10, %v2448_v13  ;;  %v8564_v16 = vpop.f32.mrb[19].mxu1 }
 0x733   : > { %v7756_v16 = vld [vmem:[%s9632_s19 + $0x6] ss:$0 sm:$0xff] }
 0x734   : > { %v9989_v17 = vpack.c.bf16 %v2449_v15, %v2446_v14 }
 0x736   : > { %8921 = vmatprep.subr.msk.bf16.mxu1 %vm9863_vm13, %v9989_v17 }
 0x737   : > { %8924 = vmatpush3.bf16.xpose.msk.msra.mxu1 %vm9863_vm13, %v9989_v17 }
 0x7fe   : > { %v2258_v24 = vpop.f32.mrb[16].mxu0 }
 0x7ff   : > { %v2259_v25 = vadd.f32 %v7727_v18, %v2258_v24  ;;  %v8547_v26 = vpop.f32.mrb[17].mxu0 }
 0x800   : > { %v2261_v27 = vpop.f32.mrb[18].mxu0 }
 0x801   : > { %v2262_v28 = vadd.f32 %v7727_v18, %v2261_v27  ;;  %v8548_v29 = vpop.f32.mrb[19].mxu0  ;;  %v2265_v30 = vadd.f32 %v2259_v25, %v9830_v19 }
 0x803   : > { %v2267_v31 = vsel %vm1157_vm4, %v2265_v30, 0.0  ;;  %v2266_v32 = vadd.f32 %v2262_v28, %v9832_v20  ;;  %v9167_v20 = vld [vmem:[%s10833_s14 + $0x40] sm:$0xff]  }
 0x804   : > { %2268 = vadd.xlane.f32.xlu0 %v2267_v31  ;;  %8550 = vmatpush3.bf16.msra.mxu0 %v9167_v20 }
 0x805   : > { %v2270_v33 = vsel %vm1157_vm4, %v2266_v32, 0.0  ;;  %8551 = vmatprep.subr.bf16.mxu0 %v9568_v3 }
 0x806   : > { %2271 = vadd.xlane.f32.xlu1 %v2270_v33 }
 0x808   : > { %8552 = vmatpush3.bf16.msra.mxu0 %v9168_v43 }
 0x809   : > { %8565 = vmatprep.subr.bf16.mxu0 %v9568_v3 }
 0x891   : > { %v2269_v34 = vpop.xlane.xlu0 %2268 }
 0x892   : > { %v2274_v35 = vmul.f32 0.03125, %v2269_v34 }
 0x893   : > { %v2272_v39 = vpop.xlane.xlu1 %2271 }
 0x894   : > { %v2276_v40 = vsub.f32 %v2265_v30, %v2274_v35  ;;  %v2275_v21 = vmul.f32 0.03125, %v2272_v39 }
 0x896   : > { %v2277_v41 = vsub.f32 %v2266_v32, %v2275_v21  ;;  %v2278_v22 = vmul.f32 %v2276_v40, %v2276_v40 }
 0x898   : > { %v2280_v51 = vsel %vm1157_vm4, %v2278_v22, 0.0  ;;  %v2279_v19 = vmul.f32 %v2277_v41, %v2277_v41 }
 0x899   : > { %2281 = vadd.xlane.f32.xlu0 %v2280_v51 }
 0x89a   : > { %v2283_v42 = vsel %vm1157_vm4, %v2279_v19, 0.0 }
 0x89b   : > { %2284 = vadd.xlane.f32.xlu1 %v2283_v42 }
 0x926   : > { %v2282_v44 = vpop.xlane.xlu0 %2281 }
 0x927   : > { %v2286_v57 = vmul.f32 0.03125, %v2282_v44  ;;  %v1228_v44 = vld [vmem:[%s1057_s18] sm:$0x1]  ;;  %s10849_s18 = sld [smem:[#allocation19_spill]] }
 0x928   : > { %v2285_v45 = vpop.xlane.xlu1 %2284  ;;  %vm1229_vm9 = vcmp.gt.f32.partialorder %v1228_v44, 0.0 }
 0x929   : > { %v2288_v46 = vadd.f32 1e-05, %v2286_v57  ;;  %v2287_v49 = vmul.f32 0.03125, %v2285_v45  ;;  %v10092_v57 = vshrl.u32 %v1070_v38, 7 }
 0x92b   : > { %9351 = vrsqrt.f32 %v2288_v46  ;;  %v2289_v1 = vadd.f32 1e-05, %v2287_v49  ;;  %v10095_v45 = vsub.s32 0, %v10092_v57  ;;  %v9571_v46 = vmov -1e+09  }
 0x92c   : > { %v1230_v49 = vsel %vm1229_vm9, 0.0, %v9571_v46 }
 0x92d   : > { %9353 = vrsqrt.f32 %v2289_v1  ;;  %v10098_v1 = vrot.slane %v1230_v49, %v10095_v45 }
 0x935   : > { %v9352_v50 = vpop.eup %9351 }
 0x936   : > { %v2292_v52 = vmul.f32 %v9352_v50, %v2276_v40 }
 0x937   : > { %v9354_v53 = vpop.eup %9353 }
 0x938   : > { %v2301_v54 = vmul.f32 %v7731_v23, %v2292_v52  ;;  %v2293_v55 = vmul.f32 %v9354_v53, %v2277_v41 }
 0x93a   : > { %v2302_v59 = vmul.f32 %v7731_v23, %v2293_v55  ;;  %v10010_v60 = vadd.f32 %v7732_v58, %v2301_v54 }
 0x93c   : > { %v10012_v61 = vadd.f32 %v7732_v58, %v2302_v59 }
 0x93e   : > { %v2317_v63 = vpack.c.bf16 %v10012_v61, %v10010_v60 }
 0x940   : > { %8554 = vmatmul.mubr.msk.bf16.vlgmr.msra.gmra.mrb[20].mxu0 %vm1157_vm4, %v2317_v63 }
 0x941   : > { %8566 = vmatpush3.bf16.msra.mxu0 %v9169_v62  ;;  %8569 = vmatprep.mubr.msk.bf16.mxu0 %vm9569_vm1, %v9568_v3 }
 0x942   : > { %8567 = vmatprep.subr.bf16.mxu0 %v9568_v3 }
 0x945   : > { %8568 = vmatpush3.bf16.msra.mxu0 %v9170_v0 }
 0x946   : > { %8927 = vmatprep.subr.msk.bf16.mxu0 %vm9863_vm13, %v9989_v17 }
 0x948   : > { %8570 = vmatmul.mubr.msk.bf16.vlgmr.msra.gmra.mrb[24].mxu0 %vm1157_vm4, %v9845_v36 }
 0x94e   : > { %8930 = vmatpush3.bf16.xpose.msk.msra.mxu0 %vm9863_vm13, %v9989_v17 }
 0x94f   : > { %8945 = vmatprep.subr.msk.bf16.mxu0 %vm9863_vm13, %v9989_v17 }
 0xa13   : > { %v2375_v6 = vpop.f32.mrb[20].mxu0 }
 0xa14   : > { %v2376_v7 = vadd.f32 %v7738_v2, %v2375_v6  ;;  %v8555_v8 = vpop.f32.mrb[21].mxu0 }
 0xa15   : > { %v2378_v9 = vpop.f32.mrb[22].mxu0 }
 0xa16   : > { %v10034_v10 = vmul.f32 0.35355338, %v2376_v7  ;;  %v2379_v11 = vadd.f32 %v7738_v2, %v2378_v9  ;;  %v8556_v12 = vpop.f32.mrb[23].mxu0 }
 0xa18   : > { %v10036_v13 = vmul.f32 0.35355338, %v2379_v11  ;;  %v2520_v14 = vmul.f32 %v9854_v47, %v10034_v10  ;;  %v2640_v15 = vmul.f32 %v9857_v48, %v10034_v10  ;;  %v2916_v26 = vmul.f32 %v9891_v4, %v10034_v10 }
 0xa1a   : > { %v2521_v18 = vmul.f32 %v9854_v47, %v10036_v13  ;;  %v2641_v24 = vmul.f32 %v9857_v48, %v10036_v13  ;;  %8577 = vmatprep.mubr.msk.f32.mxu1 %vm1157_vm4, %v2520_v14  ;;  %8584 = vmatprep.mubr.msk.f32.mxu0 %vm1157_vm4, %v2640_v15  ;;  %v2917_v22 = vmul.f32 %v9891_v4, %v10036_v13 }
 0xa1b   : > { %v2511_v25 = vpop.f32.mrb[24].mxu0 }
 0xa1c   : > { %v2512_v27 = vadd.f32 %v7756_v16, %v2511_v25  ;;  %v8571_v28 = vpop.f32.mrb[25].mxu0  ;;  %8578 = vmatmul.mubr.msk.f32.vlgmr.msra.gmra.mrb[14].mxu1 %vm1157_vm4, %v2521_v18  ;;  %8585 = vmatmul.mubr.msk.f32.vlgmr.msra.gmra.mrb[28].mxu0 %vm1157_vm4, %v2641_v24 }
 0xa1d   : > { %8948 = vmatpush3.bf16.xpose.msk.msra.mxu0 %vm9863_vm13, %v9989_v17  ;;  %v2514_v29 = vpop.f32.mrb[26].mxu0  ;;  %8605 = vmatprep.mubr.msk.f32.mxu0 %vm1157_vm4, %v2916_v26 }
 0xa1e   : > { %v8572_v30 = vpop.f32.mrb[27].mxu0  ;;  %8629 = vmatprep.subr.bf16.mxu0 %v9568_v3  ;;  %v2515_v31 = vadd.f32 %v7756_v16, %v2514_v29  ;;  %v2638_v32 = vmul.f32 %v9854_v47, %v2512_v27  ;;  %v2745_v33 = vmul.f32 %v9857_v48, %v2512_v27  ;;  %v3021_v34 = vmul.f32 %v9891_v4, %v2512_v27 }
 0xa1f   : > { %v3214_v35 = vmul.f32 %v9894_v5, %v2512_v27 }
 0xa20   : > { %v2639_v39 = vmul.f32 %v9854_v47, %v2515_v31  ;;  %v2746_v40 = vmul.f32 %v9857_v48, %v2515_v31  ;;  %v3022_v21 = vmul.f32 %v9891_v4, %v2515_v31  ;;  %v3215_v41 = vmul.f32 %v9894_v5, %v2515_v31 }
 0xa22   : > { %v8931_v19 = vpack.c.bf16 %v2746_v40, %v2745_v33  ;;  %v10073_v42 = vpack.c.bf16 %v2639_v39, %v2638_v32  ;;  %v10075_v20 = vpack.c.bf16 %v3022_v21, %v3021_v34  ;;  %v10077_v43 = vpack.c.bf16 %v3215_v41, %v3214_v35 }
 0xa24   : > { %8606 = vmatmul.mubr.msk.f32.vlgmr.msra.gmra.mrb[30].mxu0 %vm1157_vm4, %v2917_v22  ;;  %8933 = vmatprep.subr.msk.bf16.mxu1 %vm10069_vm8, %v8931_v19 }
 0xa25   : > { %8633 = vmatprep.mubr.msk.bf16.mxu0 %vm9569_vm1, %v9568_v3  ;;  %8936 = vmatpush3.bf16.msk.msra.mxu1 %vm10069_vm8, %v8931_v19 }
 0xa26   : > { %8939 = vmatprep.subr.msk.bf16.mxu1 %vm10069_vm8, %v10073_v42 }
 0xaef   : > { %v8579_v50 = vpop.f32.mrb[14].mxu1  ;;  %v8586_v23 = vpop.f32.mrb[28].mxu0 }
 0xaf0   : > { %v2720_v52 = vadd.f32 %v8586_v23, %v10098_v1  ;;  %v2606_v53 = vpop.f32.mrb[15].mxu1  ;;  %v2714_v54 = vpop.f32.mrb[29].mxu0  ;;  %v2612_v38 = vadd.f32 %v8579_v50, %v10098_v1 }
 0xaf1   : > { %v2715_v55 = vadd.f32 %v2714_v54, %v10098_v1  ;;  %v2607_v59 = vadd.f32 %v2606_v53, %v10098_v1 }
 0xaf2   : > { %v2726_v58 = vsel %vm2615_vm10, %v2720_v52, -inf  ;;  %v2619_v63 = vsel %vm2615_vm10, %v2612_v38, -inf }
 0xaf3   : > { %2727 = vmax.xlane.f32.xlu1 %v2726_v58  ;;  %v2723_v62 = vsel %vm2615_vm10, %v2715_v55, -inf  ;;  %v2616_v2 = vsel %vm2615_vm10, %v2607_v59, -inf }
 0xaf4   : > { %2724 = vmax.xlane.f32.xlu0 %v2723_v62 }
 0xaf7   : > { %v8607_v0 = vpop.f32.mrb[30].mxu0  ;;  %2620 = vmax.xlane.f32.xlu1 %v2619_v63 }
 0xaf8   : > { %v2996_v6 = vadd.f32 %v8607_v0, %v10098_v1  ;;  %v2990_v7 = vpop.f32.mrb[31].mxu0  ;;  %2617 = vmax.xlane.f32.xlu0 %v2616_v2 }
 0xaf9   : > { %v2991_v8 = vadd.f32 %v2990_v7, %v10098_v1 }
 0xafa   : > { %v3002_v9 = vsel %vm2615_vm10, %v2996_v6, -inf }
 0xafb   : > { %3003 = vmax.xlane.f32.xlu1 %v3002_v9  ;;  %v2999_v11 = vsel %vm2615_vm10, %v2991_v8, -inf }
 0xafc   : > { %3000 = vmax.xlane.f32.xlu0 %v2999_v11 }
 0xb80   : > { %v2728_v12 = vpop.xlane.xlu1 %2727 }
 0xb81   : > { %v2730_v14 = vsub.f32 %v2720_v52, %v2728_v12  ;;  %v2725_v15 = vpop.xlane.xlu0 %2724 }
 0xb82   : > { %v2729_v16 = vsub.f32 %v2715_v55, %v2725_v15 }
 0xb83   : > { %v2733_v18 = vmul.f32 1.442695, %v2730_v14 }
 0xb84   : > { %v2731_v24 = vmul.f32 1.442695, %v2729_v16  ;;  %v2621_v25 = vpop.xlane.xlu1 %2620  ;;  %v3109_v16 = vmul.f32 %v9894_v5, %v10034_v10 }
 0xb85   : > { %9355 = vpow2.f32 %v2733_v18  ;;  %v2623_v26 = vsub.f32 %v2612_v38, %v2621_v25  ;;  %v2618_v27 = vpop.xlane.xlu0 %2617 }
 0xb86   : > { %9357 = vpow2.f32 %v2731_v24  ;;  %v2622_v28 = vsub.f32 %v2607_v59, %v2618_v27 }
 0xb87   : > { %v2626_v29 = vmul.f32 1.442695, %v2623_v26 }
 0xb88   : > { %v2624_v30 = vmul.f32 1.442695, %v2622_v28  ;;  %v3004_v31 = vpop.xlane.xlu1 %3003 }
 0xb89   : > { %9359 = vpow2.f32 %v2626_v29  ;;  %v3006_v32 = vsub.f32 %v2996_v6, %v3004_v31  ;;  %v3001_v33 = vpop.xlane.xlu0 %3000 }
 0xb8a   : > { %9361 = vpow2.f32 %v2624_v30  ;;  %v3005_v34 = vsub.f32 %v2991_v8, %v3001_v33 }
 0xb8b   : > { %v3009_v35 = vmul.f32 1.442695, %v3006_v32 }
 0xb8c   : > { %v3007_v39 = vmul.f32 1.442695, %v3005_v34 }
 0xb8d   : > { %9363 = vpow2.f32 %v3009_v35  ;;  %v9171_v35 = vld [vmem:[%s10833_s14 + $0x70] sm:$0xff]  }
 0xb8e   : > { %9365 = vpow2.f32 %v3007_v39  ;;  %8630 = vmatpush3.bf16.msra.mxu0 %v9171_v35 }
 0xb8f   : > { %v9356_v40 = vpop.eup %9355  ;;  %8631 = vmatprep.subr.bf16.mxu0 %v9568_v3 }
 0xb90   : > { %v9358_v21 = vpop.eup %9357  ;;  %v2738_v41 = vsel %vm2615_vm10, %v9356_v40, 0.0 }
 0xb91   : > { %2739 = vadd.xlane.f32.xlu1 %v2738_v41  ;;  %v2735_v22 = vsel %vm2615_vm10, %v9358_v21, 0.0 }
 0xb92   : > { %2736 = vadd.xlane.f32.xlu0 %v2735_v22 }
 0xb93   : > { %v9360_v19 = vpop.eup %9359 }
 0xb94   : > { %v9362_v44 = vpop.eup %9361  ;;  %v2631_v46 = vsel %vm2615_vm10, %v9360_v19, 0.0 }
 0xb95   : > { %2632 = vadd.xlane.f32.xlu1 %v2631_v46  ;;  %v2628_v49 = vsel %vm2615_vm10, %v9362_v44, 0.0 }
 0xb96   : > { %2629 = vadd.xlane.f32.xlu0 %v2628_v49 }
 0xb97   : > { %v9364_v50 = vpop.eup %9363 }
 0xb98   : > { %v9366_v23 = vpop.eup %9365  ;;  %v3014_v52 = vsel %vm2615_vm10, %v9364_v50, 0.0 }
 0xb99   : > { %3015 = vadd.xlane.f32.xlu1 %v3014_v52  ;;  %v3011_v53 = vsel %vm2615_vm10, %v9366_v23, 0.0 }
 0xb9a   : > { %3012 = vadd.xlane.f32.xlu0 %v3011_v53 }
 0xc1e   : > { %v2740_v54 = vpop.xlane.xlu1 %2739 }
 0xc1f   : > { %9367 = vrcp.f32 %v2740_v54  ;;  %v2737_v55 = vpop.xlane.xlu0 %2736 }
 0xc20   : > { %9369 = vrcp.f32 %v2737_v55 }
 0xc22   : > { %v2633_v58 = vpop.xlane.xlu1 %2632 }
 0xc23   : > { %v2630_v38 = vpop.xlane.xlu0 %2629 }
 0xc24   : > { %9371 = vrcp.f32 %v2630_v38 }
 0xc25   : > { %9373 = vrcp.f32 %v2633_v58 }
 0xc26   : > { %v3016_v6 = vpop.xlane.xlu1 %3015 }
 0xc27   : > { %v3013_v59 = vpop.xlane.xlu0 %3012 }
 0xc28   : > { %9375 = vrcp.f32 %v3013_v59 }
 0xc29   : > { %v9368_v62 = vpop.eup %9367  ;;  %9377 = vrcp.f32 %v3016_v6 }
 0xc2a   : > { %v9370_v63 = vpop.eup %9369  ;;  %v2744_v2 = vmul.f32 %v9368_v62, %v9356_v40 }
 0xc2b   : > { %v2743_v0 = vmul.f32 %v9370_v63, %v9358_v21 }
 0xc2d   : > { %8591 = vmatprep.mubr.msk.f32.mxu1 %vm2615_vm10, %v2743_v0 }
 0xc2e   : > { %v9372_v7 = vpop.eup %9371  ;;  %8592 = vmatmul.mubr.msk.f32.vlgmr.msra.gmra.mrb[20].mxu1 %vm2615_vm10, %v2744_v2 }
 0xc2f   : > { %8942 = vmatpush3.bf16.msk.msra.mxu1 %vm10069_vm8, %v10073_v42  ;;  %v2636_v8 = vmul.f32 %v9372_v7, %v9362_v44  ;;  %v9374_v9 = vpop.eup %9373  ;;  %v9172_v44 = vld [vmem:[%s10833_s14 + $0x78] sm:$0xff]  }
 0xc30   : > { %8951 = vmatprep.subr.msk.bf16.mxu1 %vm10069_vm8, %v10075_v20  ;;  %v2637_v12 = vmul.f32 %v9374_v9, %v9360_v19  ;;  %8632 = vmatpush3.bf16.msra.mxu0 %v9172_v44  ;;  %v9187_v44 = vld [vmem:[%s9657_s20] sm:$0xff]  }
 0xc31   : > { %8598 = vmatprep.mubr.msk.f32.mxu1 %vm2615_vm10, %v2636_v8 }
 0xc32   : > { %v9376_v11 = vpop.eup %9375 }
 0xc33   : > { %v3019_v14 = vmul.f32 %v9376_v11, %v9366_v23  ;;  %v9378_v42 = vpop.eup %9377  ;;  %v7793_v23 = vld [vmem:[%s9632_s19 + $0x7] ss:$0 sm:$0xff] }
 0xc34   : > { %v3020_v15 = vmul.f32 %v9378_v42, %v9364_v50  ;;  %v9175_v42 = vld [vmem:[%s10836_s6 + $0x4] ss:$16 sps:$4 sm:$0xff]  }
 0xc35   : > { %3494 = vmatprep.subr.bf16.mxu0 %v9175_v42  ;;  %v9211_v42 = vld [vmem:[%s9657_s20 + $0x30] sm:$0xff]  }
 0xc36   : > { %8599 = vmatmul.mubr.msk.f32.vlgmr.msra.gmra.mrb[20].mxu1 %vm2615_vm10, %v2637_v12 }
 0xc37   : > { %8954 = vmatpush3.bf16.msk.msra.mxu1 %vm10069_vm8, %v10075_v20  ;;  %8612 = vmatprep.mubr.msk.f32.mxu1 %vm2615_vm10, %v3019_v14  ;;  %v3110_v20 = vmul.f32 %v9894_v5, %v10036_v13 }
 0xc38   : > { %8957 = vmatprep.subr.msk.bf16.mxu1 %vm9863_vm13, %v9989_v17 }
 0xc3e   : > { %8613 = vmatmul.mubr.msk.f32.vlgmr.msra.gmra.mrb[20].mxu1 %vm2615_vm10, %v3020_v15  ;;  %v9178_v15 = vld [vmem:[%s10836_s6 + $0xc] ss:$16 sps:$4 sm:$0xff]  }
 0xc3f   : > { %8619 = vmatprep.mubr.msk.f32.mxu1 %vm1157_vm4, %v3109_v16  ;;  %v9173_v16 = vld [vmem:[%s10836_s6] ss:$16 sps:$4 sm:$0xff]  }
 0xc40   : > { %8960 = vmatpush3.bf16.xpose.msk.msra.mxu1 %vm9863_vm13, %v9989_v17 }
 0xc41   : > { %8963 = vmatprep.subr.msk.bf16.mxu1 %vm10069_vm8, %v10077_v43 }
 0xc47   : > { %8620 = vmatmul.mubr.msk.f32.vlgmr.msra.gmra.mrb[22].mxu1 %vm1157_vm4, %v3110_v20  ;;  %v9176_v20 = vld [vmem:[%s10836_s6 + $0x8] ss:$16 sps:$4 sm:$0xff]  }
 0xc48   : > { %8966 = vmatpush3.bf16.msk.msra.mxu1 %vm10069_vm8, %v10077_v43 }
 0xc49   : > { %3537 = vmatprep.subr.bf16.mxu1 %v9178_v15  ;;  %v9212_v15 = vld [vmem:[%s9657_s20 + $0xb0] sm:$0xff]  }
 0xd1a   : > { %v8621_v10 = vpop.f32.mrb[22].mxu1 }
 0xd1b   : > { %v3189_v18 = vadd.f32 %v8621_v10, %v10098_v1  ;;  %v3183_v24 = vpop.f32.mrb[23].mxu1  ;;  %v9179_v10 = vld [vmem:[%s10836_s6 + $0x20] ss:$16 sps:$4 sm:$0xff]  }
 0xd1c   : > { %v3184_v25 = vadd.f32 %v3183_v24, %v10098_v1  ;;  %v9182_v24 = vld [vmem:[%s10836_s6 + $0x28] ss:$16 sps:$4 sm:$0xff]  }
 0xd1d   : > { %v3195_v17 = vsel %vm2615_vm10, %v3189_v18, -inf }
 0xd1e   : > { %3196 = vmax.xlane.f32.xlu1 %v3195_v17  ;;  %v3192_v26 = vsel %vm2615_vm10, %v3184_v25, -inf  ;;  %v9572_v17 = vmov 0  }
 0xd1f   : > { %3193 = vmax.xlane.f32.xlu0 %v3192_v26  ;;  %v9185_v26 = vld [vmem:[%s9657_s20 + $0x40] sm:$0xff]  }
 0xdab   : > { %v3197_v13 = vpop.xlane.xlu1 %3196 }
 0xdac   : > { %v3199_v27 = vsub.f32 %v3189_v18, %v3197_v13  ;;  %v3194_v28 = vpop.xlane.xlu0 %3193  ;;  %v9181_v18 = vld [vmem:[%s10836_s6 + $0x24] ss:$16 sps:$4 sm:$0xff]  }
 0xdad   : > { %v3198_v29 = vsub.f32 %v3184_v25, %v3194_v28  ;;  %v9184_v25 = vld [vmem:[%s10836_s6 + $0x2c] ss:$16 sps:$4 sm:$0xff]   ;;  %v9186_v13 = vld [vmem:[%s9657_s20 + $0xc0] sm:$0xff]  }
 0xdae   : > { %v3202_v30 = vmul.f32 1.442695, %v3199_v27 }
 0xdaf   : > { %v3200_v31 = vmul.f32 1.442695, %v3198_v29 }
 0xdb0   : > { %9379 = vpow2.f32 %v3202_v30 }
 0xdb1   : > { %9381 = vpow2.f32 %v3200_v31 }
 0xdba   : > { %v9380_v43 = vpop.eup %9379 }
 0xdbb   : > { %v9382_v32 = vpop.eup %9381  ;;  %v3207_v33 = vsel %vm2615_vm10, %v9380_v43, 0.0 }
 0xdbc   : > { %3208 = vadd.xlane.f32.xlu1 %v3207_v33  ;;  %v3204_v34 = vsel %vm2615_vm10, %v9382_v32, 0.0  ;;  %v7798_v33 = vld [vmem:[%s9637_s24 + $0x1] ss:$0 sm:$0xff] }
 0xdbd   : > { %3205 = vadd.xlane.f32.xlu0 %v3204_v34 }
 0xe49   : > { %v3209_v39 = vpop.xlane.xlu1 %3208 }
 0xe4a   : > { %9383 = vrcp.f32 %v3209_v39  ;;  %v3206_v40 = vpop.xlane.xlu0 %3205 }
 0xe4b   : > { %9385 = vrcp.f32 %v3206_v40 }
 0xe54   : > { %v9384_v21 = vpop.eup %9383 }
 0xe55   : > { %v9386_v41 = vpop.eup %9385  ;;  %v3213_v19 = vmul.f32 %v9384_v21, %v9380_v43  ;;  %v7800_v21 = vld [vmem:[%s9642_s30 + $0x1] ss:$0 sm:$0xff] }
 0xe56   : > { %v3212_v22 = vmul.f32 %v9386_v41, %v9382_v32 }
 0xe58   : > { %8626 = vmatprep.mubr.msk.f32.mxu1 %vm2615_vm10, %v3212_v22 }
 0xe59   : > { %8627 = vmatmul.mubr.msk.f32.vlgmr.msra.gmra.mrb[20].mxu1 %vm2615_vm10, %v3213_v19 }
 0xe5a   : > { %3538 = vmatpush1.bf16.msra.mxu1 %v9176_v20  ;;  %3569 = vmatprep.mubr.bf16.mxu1 %v9572_v17  ;;  %v9214_v20 = vld [vmem:[%s9657_s20 + $0xf8] sm:$0xff]  }
 0xe5b   : > { %3539 = vmatprep.subr.bf16.mxu1 %v9184_v25  ;;  %v3429_v25 = vld [vmem:[%s10835_s12] sm:$0xf] }
 0xe5e   : > { %3540 = vmatpush1.bf16.msra.mxu1 %v9182_v24  ;;  %v3441_v24 = vsub.s32 2, %v10092_v57 }
 0xe5f   : > { %8269 = vmatprep.subr.bf16.mxu1 %v9186_v13  ;;  %v3445_v13 = vsub.s32 3, %v10092_v57 }
 0xf2c   : > { %v8628_v46 = vpop.f32.mrb[20].mxu1 }
 0xf2d   : > { %v3291_v49 = vpop.f32.mrb[21].mxu1 }
 0xf2e   : > { %v3307_v50 = vpack.c.bf16 %v8628_v46, %v3291_v49  ;;  %v9188_v46 = vld [vmem:[%s9657_s20 + $0x80] sm:$0xff]  }
 0xf30   : > { %8634 = vmatmul.mubr.msk.bf16.vlgmr.msra.gmra.mrb[32].mxu0 %vm1157_vm4, %v3307_v50  ;;  %v9189_v50 = vld [vmem:[%s9657_s20 + $0x48] sm:$0xff]  }
 0xf31   : > { %3495 = vmatpush1.bf16.msra.mxu0 %v9173_v16  ;;  %3526 = vmatprep.mubr.bf16.mxu0 %v9572_v17  ;;  %v9213_v16 = vld [vmem:[%s9657_s20 + $0x78] sm:$0xff]  }
 0xf32   : > { %3496 = vmatprep.subr.bf16.mxu0 %v9181_v18  ;;  %v9216_v18 = vld [vmem:[%s9657_s20 + $0xb8] sm:$0xff]  }
 0xf35   : > { %3497 = vmatpush1.bf16.msra.mxu0 %v9179_v10  ;;  %v9215_v10 = vld [vmem:[%s9657_s20 + $0x38] sm:$0xff]  }
 0xf36   : > { %8247 = vmatprep.subr.bf16.mxu0 %v9185_v26  ;;  %v10227_v26 = vsub.s32 1, %v10092_v57 }
0x1003   : > { %v3365_v52 = vpop.f32.mrb[32].mxu0 }
0x1004   : > { %v3366_v53 = vadd.f32 %v7793_v23, %v3365_v52  ;;  %v8635_v54 = vpop.f32.mrb[33].mxu0  ;;  %v9191_v52 = vld [vmem:[%s9657_s20 + $0x8] sm:$0xff]  }
0x1005   : > { %v3368_v55 = vpop.f32.mrb[34].mxu0  ;;  %v9193_v54 = vld [vmem:[%s9657_s20 + $0x50] sm:$0xff]  }
0x1006   : > { %v3369_v38 = vadd.f32 %v7793_v23, %v3368_v55  ;;  %v8636_v58 = vpop.f32.mrb[35].mxu0  ;;  %v3372_v59 = vadd.f32 %v3366_v53, %v10010_v60  ;;  %v9190_v23 = vld [vmem:[%s9657_s20 + $0xc8] sm:$0xff]   ;;  %v9194_v55 = vld [vmem:[%s9657_s20 + $0xd0] sm:$0xff]  }
0x1007   : > { %v9192_v53 = vld [vmem:[%s9657_s20 + $0x88] sm:$0xff]   ;;  %v9196_v58 = vld [vmem:[%s9657_s20 + $0x90] sm:$0xff]  }
0x1008   : > { %v3374_v62 = vsel %vm1157_vm4, %v3372_v59, 0.0  ;;  %v3373_v63 = vadd.f32 %v3369_v38, %v10012_v61  ;;  %v9195_v38 = vld [vmem:[%s9657_s20 + $0x10] sm:$0xff]  }
0x1009   : > { %3375 = vadd.xlane.f32.xlu0 %v3374_v62  ;;  %v9198_v62 = vld [vmem:[%s9657_s20 + $0xd8] sm:$0xff]  }
0x100a   : > { %v3377_v0 = vsel %vm1157_vm4, %v3373_v63, 0.0 }
0x100b   : > { %3378 = vadd.xlane.f32.xlu1 %v3377_v0  ;;  %v9200_v0 = vld [vmem:[%s9657_s20 + $0x98] sm:$0xff]  }
0x1096   : > { %v3376_v2 = vpop.xlane.xlu0 %3375 }
0x1097   : > { %v3380_v6 = vmul.f32 0.03125, %v3376_v2  ;;  %v9201_v2 = vld [vmem:[%s9657_s20 + $0x60] sm:$0xff]  }
0x1098   : > { %v3379_v7 = vpop.xlane.xlu1 %3378 }
0x1099   : > { %v3382_v8 = vsub.f32 %v3372_v59, %v3380_v6  ;;  %v3381_v9 = vmul.f32 0.03125, %v3379_v7  ;;  %v9197_v59 = vld [vmem:[%s9657_s20 + $0x58] sm:$0xff]   ;;  %v9202_v6 = vld [vmem:[%s9657_s20 + $0xe0] sm:$0xff]  }
0x109a   : > { %v9203_v7 = vld [vmem:[%s9657_s20 + $0x20] sm:$0xff]  }
0x109b   : > { %v3383_v11 = vsub.f32 %v3373_v63, %v3381_v9  ;;  %v3384_v60 = vmul.f32 %v3382_v8, %v3382_v8  ;;  %v9199_v63 = vld [vmem:[%s9657_s20 + $0x18] sm:$0xff]   ;;  %v9205_v9 = vld [vmem:[%s9657_s20 + $0x68] sm:$0xff]  }
0x109d   : > { %v3386_v61 = vsel %vm1157_vm4, %v3384_v60, 0.0  ;;  %v3385_v12 = vmul.f32 %v3383_v11, %v3383_v11  ;;  %v9207_v60 = vld [vmem:[%s9657_s20 + $0x28] sm:$0xff]  }
0x109e   : > { %3387 = vadd.xlane.f32.xlu0 %v3386_v61  ;;  %v9208_v61 = vld [vmem:[%s9657_s20 + $0xa8] sm:$0xff]  }
0x109f   : > { %v3389_v14 = vsel %vm1157_vm4, %v3385_v12, 0.0  ;;  %v9209_v12 = vld [vmem:[%s9657_s20 + $0x70] sm:$0xff]  }
0x10a0   : > { %3390 = vadd.xlane.f32.xlu1 %v3389_v14  ;;  %v9210_v14 = vld [vmem:[%s9657_s20 + $0xf0] sm:$0xff]  }
0x112b   : > { %v3388_v27 = vpop.xlane.xlu0 %3387 }
0x112c   : > { %v3392_v28 = vmul.f32 0.03125, %v3388_v27  ;;  %v3434_v27 = vrot.slane %v3429_v25, %v10095_v45 }
0x112d   : > { %v3391_v29 = vpop.xlane.xlu1 %3390 }
0x112e   : > { %v3394_v30 = vadd.f32 1e-05, %v3392_v28  ;;  %v3393_v31 = vmul.f32 0.03125, %v3391_v29  ;;  %v3442_v28 = vrot.slane %v3429_v25, %v3441_v24  ;;  %v3438_v29 = vrot.slane %v3429_v25, %v10227_v26 }
0x1130   : > { %9387 = vrsqrt.f32 %v3394_v30  ;;  %v3395_v43 = vadd.f32 1e-05, %v3393_v31  ;;  %v3446_v30 = vrot.slane %v3429_v25, %v3445_v13 }
0x1132   : > { %9389 = vrsqrt.f32 %v3395_v43 }
0x113a   : > { %v9388_v32 = vpop.eup %9387 }
0x113b   : > { %v3398_v34 = vmul.f32 %v9388_v32, %v3382_v8  ;;  %v9204_v8 = vld [vmem:[%s9657_s20 + $0xa0] sm:$0xff]  }
0x113c   : > { %v9390_v35 = vpop.eup %9389 }
0x113d   : > { %v3408_v39 = vmul.f32 %v7798_v33, %v3398_v34  ;;  %v3399_v40 = vmul.f32 %v9390_v35, %v3383_v11  ;;  %v9206_v11 = vld [vmem:[%s9657_s20 + $0xe8] sm:$0xff]  }
0x113f   : > { %v3409_v41 = vmul.f32 %v7798_v33, %v3399_v40  ;;  %v10184_v22 = vadd.f32 %v7800_v21, %v3408_v39 }
0x1141   : > { %v10186_v19 = vadd.f32 %v7800_v21, %v3409_v41 }
0x1143   : > { %v3428_v49 = vpack.c.bf16 %v10186_v19, %v10184_v22 }
0x1145   : > { %7809 = vmatmul.mubr.msk.bf16.vlgmr.msra.gmra.mrb[36].mxu0 %vm1157_vm4, %v3428_v49  ;;  %7810 = vmatmul.mubr.msk.bf16.vlgmr.msra.gmra.mrb[24].mxu1 %vm1157_vm4, %v3428_v49 }
0x1146   : > { %8248 = vmatpush3.bf16.msra.mxu0 %v9187_v44  ;;  %8270 = vmatpush3.bf16.msra.mxu1 %v9188_v46 }
0x1147   : > { %8249 = vmatprep.subr.bf16.mxu0 %v9189_v50  ;;  %8271 = vmatprep.subr.bf16.mxu1 %v9190_v23 }
0x114a   : > { %8250 = vmatpush3.bf16.msra.mxu0 %v9191_v52  ;;  %8272 = vmatpush3.bf16.msra.mxu1 %v9192_v53 }
0x114b   : > { %8251 = vmatprep.subr.bf16.mxu0 %v9193_v54  ;;  %8273 = vmatprep.subr.bf16.mxu1 %v9194_v55 }
0x114e   : > { %8252 = vmatpush3.bf16.msra.mxu0 %v9195_v38  ;;  %8274 = vmatpush3.bf16.msra.mxu1 %v9196_v58 }
0x114f   : > { %8253 = vmatprep.subr.bf16.mxu0 %v9197_v59  ;;  %8275 = vmatprep.subr.bf16.mxu1 %v9198_v62 }
0x1152   : > { %8254 = vmatpush3.bf16.msra.mxu0 %v9199_v63  ;;  %8276 = vmatpush3.bf16.msra.mxu1 %v9200_v0 }
0x1153   : > { %8255 = vmatprep.subr.bf16.mxu0 %v9201_v2  ;;  %8277 = vmatprep.subr.bf16.mxu1 %v9202_v6 }
0x1156   : > { %8256 = vmatpush3.bf16.msra.mxu0 %v9203_v7  ;;  %8278 = vmatpush3.bf16.msra.mxu1 %v9204_v8 }
0x1157   : > { %8257 = vmatprep.subr.bf16.mxu0 %v9205_v9  ;;  %8279 = vmatprep.subr.bf16.mxu1 %v9206_v11  ;;  %v7811_v11 = vld [vmem:[%s10847_s23] ss:$0 sm:$0xff] }
0x115a   : > { %8258 = vmatpush3.bf16.msra.mxu0 %v9207_v60  ;;  %8280 = vmatpush3.bf16.msra.mxu1 %v9208_v61 }
0x115b   : > { %8259 = vmatprep.subr.bf16.mxu0 %v9209_v12  ;;  %8281 = vmatprep.subr.bf16.mxu1 %v9210_v14 }
0x115e   : > { %8260 = vmatpush3.bf16.msra.mxu0 %v9211_v42  ;;  %8282 = vmatpush3.bf16.msra.mxu1 %v9212_v15 }
0x115f   : > { %8261 = vmatprep.subr.bf16.mxu0 %v9213_v16  ;;  %8283 = vmatprep.subr.bf16.mxu1 %v9214_v20 }
0x1162   : > { %8262 = vmatpush3.bf16.msra.mxu0 %v9215_v10  ;;  %8284 = vmatpush3.bf16.msra.mxu1 %v9216_v18 }
0x1163   : > { %8637 = vmatprep.subr.bf16.mxu0 %v9568_v3  ;;  %8645 = vmatprep.subr.bf16.mxu1 %v9568_v3 }
0x1218   : > { %v3528_v31 = vpop.f32.mrb[36].mxu0  ;;  %v3571_v43 = vpop.f32.mrb[24].mxu1 }
0x1219   : > { %v3529_v32 = vadd.f32 %v3528_v31, %v3434_v27  ;;  %v3572_v33 = vadd.f32 %v3571_v43, %v3442_v28  ;;  %v3530_v34 = vpop.f32.mrb[37].mxu0  ;;  %v3573_v35 = vpop.f32.mrb[25].mxu1 }
0x121a   : > { %v3531_v39 = vadd.f32 %v3530_v34, %v3438_v29  ;;  %v3574_v40 = vadd.f32 %v3573_v35, %v3446_v30  ;;  %v3532_v21 = vpop.f32.mrb[38].mxu0  ;;  %v3575_v41 = vpop.f32.mrb[26].mxu1 }
0x121b   : > { %v3533_v44 = vadd.f32 %v3532_v21, %v3434_v27  ;;  %v3576_v46 = vadd.f32 %v3575_v41, %v3442_v28  ;;  %v3534_v49 = vpop.f32.mrb[39].mxu0  ;;  %v3577_v50 = vpop.f32.mrb[27].mxu1  ;;  %v3580_v53 = vmax.f32 %v3529_v32, 0.0  ;;  %v3582_v54 = vmax.f32 %v3572_v33, 0.0 }
0x121c   : > { %v3535_v23 = vadd.f32 %v3534_v49, %v3438_v29  ;;  %v3578_v52 = vadd.f32 %v3577_v50, %v3446_v30  ;;  %v3581_v58 = vmax.f32 %v3531_v39, 0.0  ;;  %v3583_v59 = vmax.f32 %v3574_v40, 0.0  ;;  %v9218_v49 = vld [vmem:[%s10833_s14 + $0x90] sm:$0xff]   ;;  %v9219_v50 = vld [vmem:[%s10833_s14 + $0x88] sm:$0xff]  }
0x121d   : > { %v3584_v55 = vmax.f32 %v3533_v44, 0.0  ;;  %v3586_v38 = vmax.f32 %v3576_v46, 0.0  ;;  %v9217_v46 = vld [vmem:[%s10833_s14 + $0x80] sm:$0xff]  }
0x121e   : > { %v3585_v62 = vmax.f32 %v3535_v23, 0.0  ;;  %v3587_v63 = vmax.f32 %v3578_v52, 0.0  ;;  %v9220_v23 = vld [vmem:[%s10833_s14 + $0x98] sm:$0xff]  }
0x121f   : > { %v3652_v0 = vpack.c.bf16 %v3584_v55, %v3580_v53  ;;  %v3654_v2 = vpack.c.bf16 %v3586_v38, %v3582_v54 }
0x1220   : > { %v3653_v6 = vpack.c.bf16 %v3585_v62, %v3581_v58  ;;  %v3655_v7 = vpack.c.bf16 %v3587_v63, %v3583_v59  ;;  %v7845_v62 = vld [vmem:[%s9637_s24 + $0x2] ss:$0 sm:$0xff] }
0x1222   : > { %3887 = vmatprep.mubr.bf16.mxu0 %v3653_v6  ;;  %3928 = vmatprep.mubr.bf16.mxu1 %v3655_v7  ;;  %v7847_v7 = vld [vmem:[%s9642_s30 + $0x2] ss:$0 sm:$0xff] }
0x1223   : > { %3888 = vmatmul.mubr.bf16.vlgmr.msra.gmra.mrb[40].mxu0 %v3652_v0  ;;  %3929 = vmatmul.mubr.bf16.vlgmr.msra.gmra.mrb[28].mxu1 %v3654_v2 }
0x1224   : > { %8641 = vmatprep.mubr.msk.bf16.mxu0 %vm9569_vm1, %v9568_v3  ;;  %8649 = vmatprep.mubr.msk.bf16.mxu1 %vm9569_vm1, %v9568_v3 }
0x1225   : > { %8638 = vmatpush3.bf16.msra.mxu0 %v9217_v46  ;;  %8646 = vmatpush3.bf16.msra.mxu1 %v9218_v49 }
0x1226   : > { %8639 = vmatprep.subr.bf16.mxu0 %v9568_v3  ;;  %8647 = vmatprep.subr.bf16.mxu1 %v9568_v3 }
0x1229   : > { %8640 = vmatpush3.bf16.msra.mxu0 %v9219_v50  ;;  %8648 = vmatpush3.bf16.msra.mxu1 %v9220_v23 }
0x122a   : > { %8653 = vmatprep.subr.bf16.mxu0 %v9568_v3 }
0x12f6   : > { %v8263_v8 = vpop.f32.mrb[40].mxu0  ;;  %v8285_v9 = vpop.f32.mrb[28].mxu1 }
0x12f7   : > { %v8264_v60 = vpop.f32.mrb[41].mxu0  ;;  %v8286_v61 = vpop.f32.mrb[29].mxu1 }
0x12f8   : > { %v8265_v12 = vadd.f32 %v8264_v60, %v8263_v8  ;;  %v8287_v14 = vadd.f32 %v8286_v61, %v8285_v9  ;;  %v8266_v42 = vpop.f32.mrb[42].mxu0  ;;  %v8288_v15 = vpop.f32.mrb[30].mxu1  ;;  %v9221_v60 = vld [vmem:[%s10833_s14 + $0xa0] sm:$0xff]  }
0x12f9   : > { %v8267_v16 = vpop.f32.mrb[43].mxu0  ;;  %v8289_v20 = vpop.f32.mrb[31].mxu1 }
0x12fa   : > { %v3890_v10 = vadd.f32 %v8265_v12, %v7811_v11  ;;  %v8268_v18 = vadd.f32 %v8267_v16, %v8266_v42  ;;  %v8290_v25 = vadd.f32 %v8289_v20, %v8288_v15  ;;  %v9222_v12 = vld [vmem:[%s10833_s14 + $0xa8] sm:$0xff]  }
0x12fb   : > { %v7862_v15 = vld [vmem:[%s9632_s19 + $0x9] ss:$0 sm:$0xff] }
0x12fc   : > { %v3931_v27 = vadd.f32 %v8287_v14, %v3890_v10  ;;  %v3893_v28 = vadd.f32 %v8268_v18, %v7811_v11  ;;  %v7853_v14 = vld [vmem:[%s9632_s19 + $0x8] ss:$0 sm:$0xff] }
0x12fe   : > { %v3934_v29 = vadd.f32 %v8290_v25, %v3893_v28  ;;  %v3937_v30 = vadd.f32 %v3931_v27, %v10184_v22 }
0x1300   : > { %v3939_v31 = vsel %vm1157_vm4, %v3937_v30, 0.0  ;;  %v3938_v43 = vadd.f32 %v3934_v29, %v10186_v19 }
0x1301   : > { %3940 = vadd.xlane.f32.xlu0 %v3939_v31 }
0x1302   : > { %v3942_v32 = vsel %vm1157_vm4, %v3938_v43, 0.0 }
0x1303   : > { %3943 = vadd.xlane.f32.xlu1 %v3942_v32 }
0x138e   : > { %v3941_v33 = vpop.xlane.xlu0 %3940 }
0x138f   : > { %v3945_v34 = vmul.f32 0.03125, %v3941_v33 }
0x1390   : > { %v3944_v35 = vpop.xlane.xlu1 %3943 }
0x1391   : > { %v3947_v39 = vsub.f32 %v3937_v30, %v3945_v34  ;;  %v3946_v40 = vmul.f32 0.03125, %v3944_v35 }
0x1393   : > { %v3948_v21 = vsub.f32 %v3938_v43, %v3946_v40  ;;  %v3949_v41 = vmul.f32 %v3947_v39, %v3947_v39 }
0x1395   : > { %v3951_v22 = vsel %vm1157_vm4, %v3949_v41, 0.0  ;;  %v3950_v44 = vmul.f32 %v3948_v21, %v3948_v21 }
0x1396   : > { %3952 = vadd.xlane.f32.xlu0 %v3951_v22 }
0x1397   : > { %v3954_v19 = vsel %vm1157_vm4, %v3950_v44, 0.0 }
0x1398   : > { %3955 = vadd.xlane.f32.xlu1 %v3954_v19 }
0x1423   : > { %v3953_v52 = vpop.xlane.xlu0 %3952 }
0x1424   : > { %v3957_v53 = vmul.f32 0.03125, %v3953_v52 }
0x1425   : > { %v3956_v54 = vpop.xlane.xlu1 %3955 }
0x1426   : > { %v3959_v55 = vadd.f32 1e-05, %v3957_v53  ;;  %v3958_v38 = vmul.f32 0.03125, %v3956_v54 }
0x1428   : > { %9391 = vrsqrt.f32 %v3959_v55  ;;  %v3960_v58 = vadd.f32 1e-05, %v3958_v38 }
0x142a   : > { %9393 = vrsqrt.f32 %v3960_v58 }
0x1432   : > { %v9392_v59 = vpop.eup %9391 }
0x1433   : > { %v3963_v63 = vmul.f32 %v9392_v59, %v3947_v39  ;;  %v7871_v39 = vld [vmem:[%s9632_s19 + $0xa] ss:$0 sm:$0xff] }
0x1434   : > { %v9394_v0 = vpop.eup %9393 }
0x1435   : > { %v3973_v2 = vmul.f32 %v7845_v62, %v3963_v63  ;;  %v3964_v6 = vmul.f32 %v9394_v0, %v3948_v21 }
0x1437   : > { %v3974_v8 = vmul.f32 %v7845_v62, %v3964_v6  ;;  %v10256_v9 = vadd.f32 %v7847_v7, %v3973_v2 }
0x1439   : > { %v10258_v11 = vadd.f32 %v7847_v7, %v3974_v8 }
0x143b   : > { %v3990_v61 = vpack.c.bf16 %v10258_v11, %v10256_v9 }
0x143d   : > { %8642 = vmatmul.mubr.msk.bf16.vlgmr.msra.gmra.mrb[44].mxu0 %vm1157_vm4, %v3990_v61  ;;  %8650 = vmatmul.mubr.msk.bf16.vlgmr.msra.gmra.mrb[32].mxu1 %vm1157_vm4, %v3990_v61 }
0x143e   : > { %8654 = vmatpush3.bf16.msra.mxu0 %v9221_v60  ;;  %8657 = vmatprep.mubr.msk.bf16.mxu0 %vm9569_vm1, %v9568_v3 }
0x143f   : > { %8655 = vmatprep.subr.bf16.mxu0 %v9568_v3 }
0x1442   : > { %8656 = vmatpush3.bf16.msra.mxu0 %v9222_v12 }
0x1445   : > { %8658 = vmatmul.mubr.msk.bf16.vlgmr.msra.gmra.mrb[48].mxu0 %vm1157_vm4, %v3990_v61 }
0x1510   : > { %v4048_v42 = vpop.f32.mrb[44].mxu0  ;;  %v4114_v16 = vpop.f32.mrb[32].mxu1 }
0x1511   : > { %v4049_v20 = vadd.f32 %v7853_v14, %v4048_v42  ;;  %v8643_v10 = vpop.f32.mrb[45].mxu0  ;;  %v8651_v18 = vpop.f32.mrb[33].mxu1  ;;  %v4115_v29 = vadd.f32 %v7862_v15, %v4114_v16 }
0x1512   : > { %v4051_v25 = vpop.f32.mrb[46].mxu0  ;;  %v4117_v27 = vpop.f32.mrb[34].mxu1 }
0x1513   : > { %v10272_v28 = vmul.f32 0.35355338, %v4049_v20  ;;  %v4118_v30 = vadd.f32 %v7862_v15, %v4117_v27  ;;  %v8644_v31 = vpop.f32.mrb[47].mxu0  ;;  %v8652_v43 = vpop.f32.mrb[35].mxu1  ;;  %v4052_v35 = vadd.f32 %v7853_v14, %v4051_v25 }
0x1515   : > { %v10274_v32 = vpack.c.bf16 %v4118_v30, %v4115_v29  ;;  %v4189_v33 = vmul.f32 %v9854_v47, %v10272_v28  ;;  %v4302_v34 = vmul.f32 %v9857_v48, %v10272_v28  ;;  %v10292_v22 = vmul.f32 0.35355338, %v4052_v35 }
0x1516   : > { %v4571_v6 = vmul.f32 %v9891_v4, %v10272_v28 }
0x1517   : > { %8969 = vmatprep.subr.msk.bf16.mxu1 %vm9863_vm13, %v10274_v32  ;;  %8665 = vmatprep.mubr.msk.f32.mxu1 %vm1157_vm4, %v4189_v33  ;;  %v4190_v58 = vmul.f32 %v9854_v47, %v10292_v22  ;;  %v4303_v59 = vmul.f32 %v9857_v48, %v10292_v22  ;;  %v4572_v7 = vmul.f32 %v9891_v4, %v10292_v22 }
0x1518   : > { %8975 = vmatprep.subr.msk.bf16.mxu0 %vm9863_vm13, %v10274_v32  ;;  %v4180_v40 = vpop.f32.mrb[48].mxu0  ;;  %8672 = vmatprep.mubr.msk.f32.mxu0 %vm1157_vm4, %v4302_v34 }
0x1519   : > { %v4181_v21 = vadd.f32 %v7871_v39, %v4180_v40  ;;  %8972 = vmatpush3.bf16.xpose.msk.msra.mxu1 %vm9863_vm13, %v10274_v32  ;;  %v8659_v41 = vpop.f32.mrb[49].mxu0  ;;  %8978 = vmatpush3.bf16.xpose.msk.msra.mxu0 %vm9863_vm13, %v10274_v32 }
0x151a   : > { %v4183_v44 = vpop.f32.mrb[50].mxu0  ;;  %8989 = vmatprep.subr.msk.bf16.mxu0 %vm9863_vm13, %v10274_v32 }
0x151b   : > { %v4184_v19 = vadd.f32 %v7871_v39, %v4183_v44  ;;  %v8660_v46 = vpop.f32.mrb[51].mxu0  ;;  %v4407_v49 = vmul.f32 %v9857_v48, %v4181_v21  ;;  %v4300_v50 = vmul.f32 %v9854_v47, %v4181_v21  ;;  %v4676_v23 = vmul.f32 %v9891_v4, %v4181_v21 }
0x151c   : > { %v4866_v52 = vmul.f32 %v9894_v5, %v4181_v21 }
0x151d   : > { %v4408_v53 = vmul.f32 %v9857_v48, %v4184_v19  ;;  %v4301_v54 = vmul.f32 %v9854_v47, %v4184_v19  ;;  %v4677_v55 = vmul.f32 %v9891_v4, %v4184_v19  ;;  %v4867_v38 = vmul.f32 %v9894_v5, %v4184_v19 }
0x151f   : > { %v8979_v62 = vpack.c.bf16 %v4408_v53, %v4407_v49  ;;  %v10312_v63 = vpack.c.bf16 %v4301_v54, %v4300_v50  ;;  %v10314_v0 = vpack.c.bf16 %v4677_v55, %v4676_v23  ;;  %v10316_v2 = vpack.c.bf16 %v4867_v38, %v4866_v52 }
0x1520   : > { %8666 = vmatmul.mubr.msk.f32.vlgmr.msra.gmra.mrb[36].mxu1 %vm1157_vm4, %v4190_v58  ;;  %8673 = vmatmul.mubr.msk.f32.vlgmr.msra.gmra.mrb[52].mxu0 %vm1157_vm4, %v4303_v59 }
0x1521   : > { %8980 = vmatprep.subr.bf16.mxu1 %v8979_v62  ;;  %8992 = vmatpush3.bf16.xpose.msk.msra.mxu0 %vm9863_vm13, %v10274_v32 }
0x1522   : > { %8693 = vmatprep.mubr.msk.f32.mxu0 %vm1157_vm4, %v4571_v6  ;;  %8982 = vmatpush3.bf16.msra.mxu1 %v8979_v62 }
0x1523   : > { %8717 = vmatprep.subr.bf16.mxu0 %v9568_v3  ;;  %8984 = vmatprep.subr.bf16.mxu1 %v10312_v63 }
0x1528   : > { %8694 = vmatmul.mubr.msk.f32.vlgmr.msra.gmra.mrb[54].mxu0 %vm1157_vm4, %v4572_v7 }
0x1529   : > { %8721 = vmatprep.mubr.msk.bf16.mxu0 %vm9569_vm1, %v9568_v3 }
0x15f3   : > { %v8667_v8 = vpop.f32.mrb[36].mxu1  ;;  %v8674_v60 = vpop.f32.mrb[52].mxu0 }
0x15f4   : > { %v4269_v61 = vpop.f32.mrb[37].mxu1  ;;  %v4376_v12 = vpop.f32.mrb[53].mxu0  ;;  %v4388_v14 = vsel %vm1110_vm3, %v8674_v60, -inf  ;;  %v4281_v15 = vsel %vm1110_vm3, %v8667_v8, -inf }
0x15f5   : > { %4389 = vmax.xlane.f32.xlu1 %v4388_v14  ;;  %v4385_v42 = vsel %vm1110_vm3, %v4376_v12, -inf  ;;  %v4278_v16 = vsel %vm1110_vm3, %v4269_v61, -inf }
0x15f6   : > { %4386 = vmax.xlane.f32.xlu0 %v4385_v42 }
0x15f9   : > { %4282 = vmax.xlane.f32.xlu1 %v4281_v15 }
0x15fa   : > { %4279 = vmax.xlane.f32.xlu0 %v4278_v16 }
0x15fb   : > { %v8695_v20 = vpop.f32.mrb[54].mxu0 }
0x15fc   : > { %v4645_v10 = vpop.f32.mrb[55].mxu0  ;;  %v4657_v18 = vsel %vm1110_vm3, %v8695_v20, -inf }
0x15fd   : > { %4658 = vmax.xlane.f32.xlu1 %v4657_v18  ;;  %v4654_v25 = vsel %vm1110_vm3, %v4645_v10, -inf }
0x15fe   : > { %4655 = vmax.xlane.f32.xlu0 %v4654_v25 }
0x1682   : > { %v4390_v27 = vpop.xlane.xlu1 %4389 }
0x1683   : > { %v4392_v29 = vsub.f32 %v8674_v60, %v4390_v27  ;;  %v4387_v30 = vpop.xlane.xlu0 %4386 }
0x1684   : > { %v4391_v31 = vsub.f32 %v4376_v12, %v4387_v30 }
0x1685   : > { %v4395_v43 = vmul.f32 1.442695, %v4392_v29 }
0x1686   : > { %v4393_v33 = vmul.f32 1.442695, %v4391_v31  ;;  %v4283_v34 = vpop.xlane.xlu1 %4282 }
0x1687   : > { %9395 = vpow2.f32 %v4395_v43  ;;  %v4285_v35 = vsub.f32 %v8667_v8, %v4283_v34  ;;  %v4280_v39 = vpop.xlane.xlu0 %4279 }
0x1688   : > { %9397 = vpow2.f32 %v4393_v33  ;;  %v4284_v40 = vsub.f32 %v4269_v61, %v4280_v39 }
0x1689   : > { %v4288_v21 = vmul.f32 1.442695, %v4285_v35  ;;  %v4761_v35 = vmul.f32 %v9894_v5, %v10272_v28 }
0x168a   : > { %v4286_v41 = vmul.f32 1.442695, %v4284_v40  ;;  %v4659_v44 = vpop.xlane.xlu1 %4658 }
0x168b   : > { %9399 = vpow2.f32 %v4288_v21  ;;  %v4661_v19 = vsub.f32 %v8695_v20, %v4659_v44  ;;  %v4656_v46 = vpop.xlane.xlu0 %4655 }
0x168c   : > { %9401 = vpow2.f32 %v4286_v41  ;;  %v4660_v49 = vsub.f32 %v4645_v10, %v4656_v46 }
0x168d   : > { %v4664_v50 = vmul.f32 1.442695, %v4661_v19 }
0x168e   : > { %v4662_v23 = vmul.f32 1.442695, %v4660_v49 }
0x168f   : > { %9403 = vpow2.f32 %v4664_v50 }
0x1690   : > { %9405 = vpow2.f32 %v4662_v23 }
0x1691   : > { %v9396_v52 = vpop.eup %9395 }
0x1692   : > { %v9398_v53 = vpop.eup %9397  ;;  %v4400_v54 = vsel %vm1110_vm3, %v9396_v52, 0.0 }
0x1693   : > { %4401 = vadd.xlane.f32.xlu1 %v4400_v54  ;;  %v4397_v55 = vsel %vm1110_vm3, %v9398_v53, 0.0 }
0x1694   : > { %4398 = vadd.xlane.f32.xlu0 %v4397_v55 }
0x1695   : > { %v9400_v38 = vpop.eup %9399 }
0x1696   : > { %v9402_v58 = vpop.eup %9401  ;;  %v4293_v59 = vsel %vm1110_vm3, %v9400_v38, 0.0 }
0x1697   : > { %4294 = vadd.xlane.f32.xlu1 %v4293_v59  ;;  %v4290_v62 = vsel %vm1110_vm3, %v9402_v58, 0.0  ;;  %v9223_v59 = vld [vmem:[%s10833_s14 + $0xd0] sm:$0xff]  }
0x1698   : > { %4291 = vadd.xlane.f32.xlu0 %v4290_v62 }
0x1699   : > { %v9404_v6 = vpop.eup %9403 }
0x169a   : > { %v9406_v7 = vpop.eup %9405  ;;  %v4669_v8 = vsel %vm1110_vm3, %v9404_v6, 0.0 }
0x169b   : > { %4670 = vadd.xlane.f32.xlu1 %v4669_v8  ;;  %v4666_v60 = vsel %vm1110_vm3, %v9406_v7, 0.0 }
0x169c   : > { %4667 = vadd.xlane.f32.xlu0 %v4666_v60 }
0x1720   : > { %v4402_v61 = vpop.xlane.xlu1 %4401 }
0x1721   : > { %9407 = vrcp.f32 %v4402_v61  ;;  %v4399_v12 = vpop.xlane.xlu0 %4398 }
0x1722   : > { %9409 = vrcp.f32 %v4399_v12  ;;  %v7926_v12 = vld [vmem:[%s9632_s19 + $0xd] ss:$0 sm:$0xff] }
0x1724   : > { %v4295_v42 = vpop.xlane.xlu1 %4294 }
0x1725   : > { %v4292_v14 = vpop.xlane.xlu0 %4291 }
0x1726   : > { %9411 = vrcp.f32 %v4292_v14 }
0x1727   : > { %9413 = vrcp.f32 %v4295_v42 }
0x1728   : > { %v4671_v25 = vpop.xlane.xlu1 %4670 }
0x1729   : > { %v4668_v15 = vpop.xlane.xlu0 %4667 }
0x172a   : > { %9415 = vrcp.f32 %v4668_v15 }
0x172b   : > { %v9408_v16 = vpop.eup %9407  ;;  %9417 = vrcp.f32 %v4671_v25  ;;  %v7904_v25 = vld [vmem:[%s9632_s19 + $0xb] ss:$0 sm:$0xff] }
0x172c   : > { %v9410_v20 = vpop.eup %9409  ;;  %v4406_v18 = vmul.f32 %v9408_v16, %v9396_v52  ;;  %v9225_v52 = vld [vmem:[%s10833_s14 + $0xb0] sm:$0xff]  }
0x172d   : > { %v4405_v10 = vmul.f32 %v9410_v20, %v9398_v53  ;;  %8718 = vmatpush3.bf16.msra.mxu0 %v9225_v52 }
0x172e   : > { %8719 = vmatprep.subr.bf16.mxu0 %v9568_v3 }
0x172f   : > { %8679 = vmatprep.mubr.msk.f32.mxu1 %vm1110_vm3, %v4405_v10 }
0x1730   : > { %v9412_v27 = vpop.eup %9411  ;;  %8680 = vmatmul.mubr.msk.f32.vlgmr.msra.gmra.mrb[38].mxu1 %vm1110_vm3, %v4406_v18 }
0x1731   : > { %8986 = vmatpush3.bf16.msra.mxu1 %v10312_v63  ;;  %v4298_v29 = vmul.f32 %v9412_v27, %v9402_v58  ;;  %v9414_v30 = vpop.eup %9413 }
0x1732   : > { %8994 = vmatprep.subr.bf16.mxu1 %v10314_v0  ;;  %v4299_v43 = vmul.f32 %v9414_v30, %v9400_v38 }
0x1733   : > { %8686 = vmatprep.mubr.msk.f32.mxu1 %vm1110_vm3, %v4298_v29 }
0x1734   : > { %v9416_v31 = vpop.eup %9415 }
0x1735   : > { %v4674_v33 = vmul.f32 %v9416_v31, %v9406_v7  ;;  %v9418_v63 = vpop.eup %9417  ;;  %v9226_v7 = vld [vmem:[%s10833_s14 + $0xb8] sm:$0xff]  }
0x1736   : > { %v4675_v34 = vmul.f32 %v9418_v63, %v9404_v6  ;;  %v9224_v6 = vld [vmem:[%s10833_s14 + $0xd8] sm:$0xff]   ;;  %8720 = vmatpush3.bf16.msra.mxu0 %v9226_v7 }
0x1737   : > { %8725 = vmatprep.subr.bf16.mxu0 %v9568_v3 }
0x1738   : > { %8687 = vmatmul.mubr.msk.f32.vlgmr.msra.gmra.mrb[38].mxu1 %vm1110_vm3, %v4299_v43 }
0x1739   : > { %8996 = vmatpush3.bf16.msra.mxu1 %v10314_v0  ;;  %8700 = vmatprep.mubr.msk.f32.mxu1 %vm1110_vm3, %v4674_v33  ;;  %v4762_v0 = vmul.f32 %v9894_v5, %v10292_v22 }
0x173a   : > { %8999 = vmatprep.subr.msk.bf16.mxu1 %vm9863_vm13, %v10274_v32 }
0x1740   : > { %8701 = vmatmul.mubr.msk.f32.vlgmr.msra.gmra.mrb[38].mxu1 %vm1110_vm3, %v4675_v34 }
0x1741   : > { %8707 = vmatprep.mubr.msk.f32.mxu1 %vm1157_vm4, %v4761_v35 }
0x1742   : > { %9002 = vmatpush3.bf16.xpose.msk.msra.mxu1 %vm9863_vm13, %v10274_v32 }
0x1743   : > { %9004 = vmatprep.subr.bf16.mxu1 %v10316_v2 }
0x1749   : > { %8708 = vmatmul.mubr.msk.f32.vlgmr.msra.gmra.mrb[40].mxu1 %vm1157_vm4, %v4762_v0 }
0x174a   : > { %9006 = vmatpush3.bf16.msra.mxu1 %v10316_v2 }
0x174b   : > { %8733 = vmatprep.subr.bf16.mxu1 %v9568_v3 }
0x181c   : > { %v8709_v28 = vpop.f32.mrb[40].mxu1 }
0x181d   : > { %v4835_v39 = vpop.f32.mrb[41].mxu1  ;;  %v4847_v40 = vsel %vm1110_vm3, %v8709_v28, -inf }
0x181e   : > { %4848 = vmax.xlane.f32.xlu1 %v4847_v40  ;;  %v4844_v21 = vsel %vm1110_vm3, %v4835_v39, -inf }
0x181f   : > { %4845 = vmax.xlane.f32.xlu0 %v4844_v21 }
0x18ab   : > { %v4849_v32 = vpop.xlane.xlu1 %4848 }
0x18ac   : > { %v4851_v41 = vsub.f32 %v8709_v28, %v4849_v32  ;;  %v4846_v44 = vpop.xlane.xlu0 %4845 }
0x18ad   : > { %v4850_v19 = vsub.f32 %v4835_v39, %v4846_v44 }
0x18ae   : > { %v4854_v22 = vmul.f32 1.442695, %v4851_v41 }
0x18af   : > { %v4852_v46 = vmul.f32 1.442695, %v4850_v19 }
0x18b0   : > { %9419 = vpow2.f32 %v4854_v22 }
0x18b1   : > { %9421 = vpow2.f32 %v4852_v46  ;;  %v9228_v46 = vld [vmem:[%s10833_s14 + $0xc8] sm:$0xff]  }
0x18ba   : > { %v9420_v2 = vpop.eup %9419 }
0x18bb   : > { %v9422_v49 = vpop.eup %9421  ;;  %v4859_v50 = vsel %vm1110_vm3, %v9420_v2, 0.0 }
0x18bc   : > { %4860 = vadd.xlane.f32.xlu1 %v4859_v50  ;;  %v4856_v23 = vsel %vm1110_vm3, %v9422_v49, 0.0 }
0x18bd   : > { %4857 = vadd.xlane.f32.xlu0 %v4856_v23 }
0x1949   : > { %v4861_v53 = vpop.xlane.xlu1 %4860 }
0x194a   : > { %9423 = vrcp.f32 %v4861_v53  ;;  %v4858_v54 = vpop.xlane.xlu0 %4857 }
0x194b   : > { %9425 = vrcp.f32 %v4858_v54 }
0x1954   : > { %v9424_v55 = vpop.eup %9423 }
0x1955   : > { %v9426_v38 = vpop.eup %9425  ;;  %v4865_v62 = vmul.f32 %v9424_v55, %v9420_v2  ;;  %v7909_v55 = vld [vmem:[%s9637_s24 + $0x3] ss:$0 sm:$0xff] }
0x1956   : > { %v4864_v58 = vmul.f32 %v9426_v38, %v9422_v49 }
0x1958   : > { %8714 = vmatprep.mubr.msk.f32.mxu1 %vm1110_vm3, %v4864_v58 }
0x1959   : > { %8715 = vmatmul.mubr.msk.f32.vlgmr.msra.gmra.mrb[38].mxu1 %vm1110_vm3, %v4865_v62  ;;  %vm6796_vm3 = vcmask 523264  }
0x195a   : > { %8734 = vmatpush3.bf16.msra.mxu1 %v9223_v59  ;;  %8737 = vmatprep.mubr.msk.bf16.mxu1 %vm9569_vm1, %v9568_v3 }
0x195b   : > { %8735 = vmatprep.subr.bf16.mxu1 %v9568_v3 }
0x195e   : > { %8736 = vmatpush3.bf16.msra.mxu1 %v9224_v6  ;;  %v7911_v6 = vld [vmem:[%s9642_s30 + $0x3] ss:$0 sm:$0xff] }
0x1961   : > { %8738 = vmatmul.mubr.msk.bf16.vlgmr.msra.gmra.mrb[44].mxu1 %vm1157_vm4, %v9845_v36 }
0x1a2c   : > { %v8716_v8 = vpop.f32.mrb[38].mxu1 }
0x1a2d   : > { %v4940_v60 = vpop.f32.mrb[39].mxu1 }
0x1a2e   : > { %v4956_v61 = vpack.c.bf16 %v8716_v8, %v4940_v60 }
0x1a30   : > { %8722 = vmatmul.mubr.msk.bf16.vlgmr.msra.gmra.mrb[56].mxu0 %vm1157_vm4, %v4956_v61  ;;  %v9229_v61 = vld [vmem:[%s10833_s14 + $0xe0] sm:$0xff]  }
0x1a31   : > { %8729 = vmatprep.mubr.msk.bf16.mxu0 %vm9569_vm1, %v9568_v3 }
0x1a34   : > { %v5198_v14 = vpop.f32.mrb[44].mxu1 }
0x1a35   : > { %v8739_v42 = vpop.f32.mrb[45].mxu1  ;;  %v5199_v16 = vadd.f32 %v7926_v12, %v5198_v14  ;;  %v9230_v14 = vld [vmem:[%s10833_s14 + $0xe8] sm:$0xff]  }
0x1a36   : > { %v5201_v15 = vpop.f32.mrb[46].mxu1  ;;  %v7917_v42 = vld [vmem:[%s9632_s19 + $0xc] ss:$0 sm:$0xff] }
0x1a37   : > { %v5202_v20 = vadd.f32 %v7926_v12, %v5201_v15  ;;  %v8740_v10 = vpop.f32.mrb[47].mxu1 }
0x1a39   : > { %v10390_v18 = vpack.c.bf16 %v5202_v20, %v5199_v16 }
0x1a3b   : > { %9009 = vmatprep.subr.msk.bf16.mxu1 %vm9863_vm13, %v10390_v18 }
0x1a3c   : > { %9012 = vmatpush3.bf16.xpose.msk.msra.mxu1 %vm9863_vm13, %v10390_v18 }
0x1b03   : > { %v5014_v27 = vpop.f32.mrb[56].mxu0 }
0x1b04   : > { %v5015_v29 = vadd.f32 %v7904_v25, %v5014_v27  ;;  %v8723_v30 = vpop.f32.mrb[57].mxu0 }
0x1b05   : > { %v5017_v31 = vpop.f32.mrb[58].mxu0 }
0x1b06   : > { %v5018_v43 = vadd.f32 %v7904_v25, %v5017_v31  ;;  %v8724_v33 = vpop.f32.mrb[59].mxu0  ;;  %v5021_v63 = vadd.f32 %v5015_v29, %v10256_v9 }
0x1b08   : > { %v5023_v34 = vsel %vm1157_vm4, %v5021_v63, 0.0  ;;  %v5022_v35 = vadd.f32 %v5018_v43, %v10258_v11  ;;  %v9227_v11 = vld [vmem:[%s10833_s14 + $0xc0] sm:$0xff]   ;;  %v7935_v43 = vld [vmem:[%s9632_s19 + $0xe] ss:$0 sm:$0xff] }
0x1b09   : > { %5024 = vadd.xlane.f32.xlu0 %v5023_v34  ;;  %8726 = vmatpush3.bf16.msra.mxu0 %v9227_v11 }
0x1b0a   : > { %v5026_v0 = vsel %vm1157_vm4, %v5022_v35, 0.0  ;;  %8727 = vmatprep.subr.bf16.mxu0 %v9568_v3 }
0x1b0b   : > { %5027 = vadd.xlane.f32.xlu1 %v5026_v0 }
0x1b0d   : > { %8728 = vmatpush3.bf16.msra.mxu0 %v9228_v46 }
0x1b0e   : > { %8741 = vmatprep.subr.bf16.mxu0 %v9568_v3 }
0x1b96   : > { %v5025_v28 = vpop.xlane.xlu0 %5024 }
0x1b97   : > { %v5029_v39 = vmul.f32 0.03125, %v5025_v28 }
0x1b98   : > { %v5028_v40 = vpop.xlane.xlu1 %5027 }
0x1b99   : > { %v5031_v21 = vsub.f32 %v5021_v63, %v5029_v39  ;;  %v5030_v32 = vmul.f32 0.03125, %v5028_v40 }
0x1b9b   : > { %v5032_v41 = vsub.f32 %v5022_v35, %v5030_v32  ;;  %v5033_v44 = vmul.f32 %v5031_v21, %v5031_v21 }
0x1b9d   : > { %v5035_v19 = vsel %vm1157_vm4, %v5033_v44, 0.0  ;;  %v5034_v9 = vmul.f32 %v5032_v41, %v5032_v41 }
0x1b9e   : > { %5036 = vadd.xlane.f32.xlu0 %v5035_v19 }
0x1b9f   : > { %v5038_v22 = vsel %vm1157_vm4, %v5034_v9, 0.0 }
0x1ba0   : > { %5039 = vadd.xlane.f32.xlu1 %v5038_v22 }
0x1c2b   : > { %v5037_v2 = vpop.xlane.xlu0 %5036 }
0x1c2c   : > { %v5041_v49 = vmul.f32 0.03125, %v5037_v2 }
0x1c2d   : > { %v5040_v50 = vpop.xlane.xlu1 %5039 }
0x1c2e   : > { %v5043_v23 = vadd.f32 1e-05, %v5041_v49  ;;  %v5042_v52 = vmul.f32 0.03125, %v5040_v50 }
0x1c30   : > { %9427 = vrsqrt.f32 %v5043_v23  ;;  %v5044_v53 = vadd.f32 1e-05, %v5042_v52 }
0x1c32   : > { %9429 = vrsqrt.f32 %v5044_v53 }
0x1c3a   : > { %v9428_v54 = vpop.eup %9427 }
0x1c3b   : > { %v5047_v38 = vmul.f32 %v9428_v54, %v5031_v21 }
0x1c3c   : > { %v9430_v58 = vpop.eup %9429 }
0x1c3d   : > { %v5057_v59 = vmul.f32 %v7909_v55, %v5047_v38  ;;  %v5048_v62 = vmul.f32 %v9430_v58, %v5032_v41 }
0x1c3f   : > { %v5058_v7 = vmul.f32 %v7909_v55, %v5048_v62  ;;  %v10411_v8 = vadd.f32 %v7911_v6, %v5057_v59 }
0x1c41   : > { %v10413_v60 = vadd.f32 %v7911_v6, %v5058_v7 }
0x1c43   : > { %v5074_v12 = vpack.c.bf16 %v10413_v60, %v10411_v8 }
0x1c45   : > { %8730 = vmatmul.mubr.msk.bf16.vlgmr.msra.gmra.mrb[60].mxu0 %vm1157_vm4, %v5074_v12 }
0x1c46   : > { %8742 = vmatpush3.bf16.msra.mxu0 %v9229_v61  ;;  %8745 = vmatprep.mubr.msk.bf16.mxu0 %vm9569_vm1, %v9568_v3 }
0x1c47   : > { %8743 = vmatprep.subr.bf16.mxu0 %v9568_v3 }
0x1c4a   : > { %8744 = vmatpush3.bf16.msra.mxu0 %v9230_v14 }
0x1c4b   : > { %9015 = vmatprep.subr.msk.bf16.mxu0 %vm9863_vm13, %v10390_v18 }
0x1c4d   : > { %8746 = vmatmul.mubr.msk.bf16.vlgmr.msra.gmra.mrb[64].mxu0 %vm1157_vm4, %v9845_v36 }
0x1c53   : > { %9018 = vmatpush3.bf16.xpose.msk.msra.mxu0 %vm9863_vm13, %v10390_v18 }
0x1c54   : > { %9033 = vmatprep.subr.msk.bf16.mxu0 %vm9863_vm13, %v10390_v18 }
0x1d18   : > { %v5132_v15 = vpop.f32.mrb[60].mxu0 }
0x1d19   : > { %v5133_v16 = vadd.f32 %v7917_v42, %v5132_v15  ;;  %v8731_v20 = vpop.f32.mrb[61].mxu0 }
0x1d1a   : > { %v5135_v10 = vpop.f32.mrb[62].mxu0 }
0x1d1b   : > { %v10435_v25 = vmul.f32 0.35355338, %v5133_v16  ;;  %v5136_v27 = vadd.f32 %v7917_v42, %v5135_v10  ;;  %v8732_v29 = vpop.f32.mrb[63].mxu0 }
0x1d1d   : > { %v10437_v30 = vmul.f32 0.35355338, %v5136_v27  ;;  %v5273_v36 = vmul.f32 %v9854_v47, %v10435_v25  ;;  %v5386_v31 = vmul.f32 %v9857_v48, %v10435_v25  ;;  %v5661_v35 = vmul.f32 %v9891_v4, %v10435_v25 }
0x1d1f   : > { %v5274_v33 = vmul.f32 %v9854_v47, %v10437_v30  ;;  %v5387_v63 = vmul.f32 %v9857_v48, %v10437_v30  ;;  %8753 = vmatprep.mubr.msk.f32.mxu1 %vm1157_vm4, %v5273_v36  ;;  %8760 = vmatprep.mubr.msk.f32.mxu0 %vm1157_vm4, %v5386_v31  ;;  %v5662_v2 = vmul.f32 %v9891_v4, %v10437_v30 }
0x1d20   : > { %v5264_v34 = vpop.f32.mrb[64].mxu0 }
0x1d21   : > { %v5265_v0 = vadd.f32 %v7935_v43, %v5264_v34  ;;  %v8747_v28 = vpop.f32.mrb[65].mxu0  ;;  %8754 = vmatmul.mubr.msk.f32.vlgmr.msra.gmra.mrb[42].mxu1 %vm1157_vm4, %v5274_v33  ;;  %8761 = vmatmul.mubr.msk.f32.vlgmr.msra.gmra.mrb[68].mxu0 %vm1157_vm4, %v5387_v63 }
0x1d22   : > { %9036 = vmatpush3.bf16.xpose.msk.msra.mxu0 %vm9863_vm13, %v10390_v18  ;;  %v5267_v39 = vpop.f32.mrb[66].mxu0  ;;  %8781 = vmatprep.mubr.msk.f32.mxu0 %vm1157_vm4, %v5661_v35 }
0x1d23   : > { %v8748_v40 = vpop.f32.mrb[67].mxu0  ;;  %8805 = vmatprep.subr.bf16.mxu0 %v9568_v3  ;;  %v5268_v21 = vadd.f32 %v7935_v43, %v5267_v39  ;;  %v5384_v32 = vmul.f32 %v9854_v47, %v5265_v0  ;;  %v5491_v41 = vmul.f32 %v9857_v48, %v5265_v0  ;;  %v5766_v44 = vmul.f32 %v9891_v4, %v5265_v0 }
0x1d24   : > { %v5959_v19 = vmul.f32 %v9894_v5, %v5265_v0 }
0x1d25   : > { %v5385_v9 = vmul.f32 %v9854_v47, %v5268_v21  ;;  %v5492_v22 = vmul.f32 %v9857_v48, %v5268_v21  ;;  %v5767_v11 = vmul.f32 %v9891_v4, %v5268_v21  ;;  %v5960_v46 = vmul.f32 %v9894_v5, %v5268_v21 }
0x1d27   : > { %v9019_v49 = vpack.c.bf16 %v5492_v22, %v5491_v41  ;;  %v10469_v50 = vpack.c.bf16 %v5385_v9, %v5384_v32  ;;  %v10471_v23 = vpack.c.bf16 %v5767_v11, %v5766_v44  ;;  %v10473_v52 = vpack.c.bf16 %v5960_v46, %v5959_v19 }
0x1d29   : > { %8782 = vmatmul.mubr.msk.f32.vlgmr.msra.gmra.mrb[70].mxu0 %vm1157_vm4, %v5662_v2  ;;  %9021 = vmatprep.subr.msk.bf16.mxu1 %vm10069_vm8, %v9019_v49 }
0x1d2a   : > { %8809 = vmatprep.mubr.msk.bf16.mxu0 %vm9569_vm1, %v9568_v3  ;;  %9024 = vmatpush3.bf16.msk.msra.mxu1 %vm10069_vm8, %v9019_v49 }
0x1d2b   : > { %9027 = vmatprep.subr.msk.bf16.mxu1 %vm10069_vm8, %v10469_v50 }
0x1df4   : > { %v8755_v47 = vpop.f32.mrb[42].mxu1  ;;  %v8762_v48 = vpop.f32.mrb[68].mxu0 }
0x1df5   : > { %v5466_v4 = vadd.f32 %v8762_v48, %v10098_v1  ;;  %v5353_v53 = vpop.f32.mrb[43].mxu1  ;;  %v5460_v54 = vpop.f32.mrb[69].mxu0  ;;  %v5359_v38 = vadd.f32 %v8755_v47, %v10098_v1 }
0x1df6   : > { %v5461_v55 = vadd.f32 %v5460_v54, %v10098_v1  ;;  %v5354_v59 = vadd.f32 %v5353_v53, %v10098_v1 }
0x1df7   : > { %v5472_v58 = vsel %vm2615_vm10, %v5466_v4, -inf  ;;  %v5365_v6 = vsel %vm2615_vm10, %v5359_v38, -inf }
0x1df8   : > { %5473 = vmax.xlane.f32.xlu1 %v5472_v58  ;;  %v5469_v62 = vsel %vm2615_vm10, %v5461_v55, -inf  ;;  %v5362_v61 = vsel %vm2615_vm10, %v5354_v59, -inf }
0x1df9   : > { %5470 = vmax.xlane.f32.xlu0 %v5469_v62 }
0x1dfc   : > { %v8783_v7 = vpop.f32.mrb[70].mxu0  ;;  %5366 = vmax.xlane.f32.xlu1 %v5365_v6 }
0x1dfd   : > { %v5741_v12 = vadd.f32 %v8783_v7, %v10098_v1  ;;  %v5735_v14 = vpop.f32.mrb[71].mxu0  ;;  %5363 = vmax.xlane.f32.xlu0 %v5362_v61 }
0x1dfe   : > { %v5736_v42 = vadd.f32 %v5735_v14, %v10098_v1 }
0x1dff   : > { %v5747_v15 = vsel %vm2615_vm10, %v5741_v12, -inf }
0x1e00   : > { %5748 = vmax.xlane.f32.xlu1 %v5747_v15  ;;  %v5744_v16 = vsel %vm2615_vm10, %v5736_v42, -inf }
0x1e01   : > { %5745 = vmax.xlane.f32.xlu0 %v5744_v16 }
0x1e85   : > { %v5474_v20 = vpop.xlane.xlu1 %5473 }
0x1e86   : > { %v5476_v10 = vsub.f32 %v5466_v4, %v5474_v20  ;;  %v5471_v27 = vpop.xlane.xlu0 %5470 }
0x1e87   : > { %v5475_v29 = vsub.f32 %v5461_v55, %v5471_v27 }
0x1e88   : > { %v5479_v36 = vmul.f32 1.442695, %v5476_v10 }
0x1e89   : > { %v5477_v31 = vmul.f32 1.442695, %v5475_v29  ;;  %v5367_v43 = vpop.xlane.xlu1 %5366  ;;  %v5854_v29 = vmul.f32 %v9894_v5, %v10435_v25 }
0x1e8a   : > { %9431 = vpow2.f32 %v5479_v36  ;;  %v5369_v33 = vsub.f32 %v5359_v38, %v5367_v43  ;;  %v5364_v63 = vpop.xlane.xlu0 %5363 }
0x1e8b   : > { %9433 = vpow2.f32 %v5477_v31  ;;  %v5368_v34 = vsub.f32 %v5354_v59, %v5364_v63 }
0x1e8c   : > { %v5372_v35 = vmul.f32 1.442695, %v5369_v33 }
0x1e8d   : > { %v5370_v0 = vmul.f32 1.442695, %v5368_v34  ;;  %v5749_v28 = vpop.xlane.xlu1 %5748 }
0x1e8e   : > { %9435 = vpow2.f32 %v5372_v35  ;;  %v5751_v39 = vsub.f32 %v5741_v12, %v5749_v28  ;;  %v5746_v40 = vpop.xlane.xlu0 %5745  ;;  %v9231_v28 = vld [vmem:[%s10833_s14 + $0xf0] sm:$0xff]  }
0x1e8f   : > { %9437 = vpow2.f32 %v5370_v0  ;;  %v5750_v21 = vsub.f32 %v5736_v42, %v5746_v40  ;;  %8806 = vmatpush3.bf16.msra.mxu0 %v9231_v28 }
0x1e90   : > { %v5754_v32 = vmul.f32 1.442695, %v5751_v39  ;;  %8807 = vmatprep.subr.bf16.mxu0 %v9568_v3 }
0x1e91   : > { %v5752_v41 = vmul.f32 1.442695, %v5750_v21 }
0x1e92   : > { %9439 = vpow2.f32 %v5754_v32 }
0x1e93   : > { %9441 = vpow2.f32 %v5752_v41 }
0x1e94   : > { %v9432_v44 = vpop.eup %9431 }
0x1e95   : > { %v9434_v19 = vpop.eup %9433  ;;  %v5484_v9 = vsel %vm2615_vm10, %v9432_v44, 0.0 }
0x1e96   : > { %5485 = vadd.xlane.f32.xlu1 %v5484_v9  ;;  %v5481_v22 = vsel %vm2615_vm10, %v9434_v19, 0.0 }
0x1e97   : > { %5482 = vadd.xlane.f32.xlu0 %v5481_v22 }
0x1e98   : > { %v9436_v11 = vpop.eup %9435 }
0x1e99   : > { %v9438_v46 = vpop.eup %9437  ;;  %v5377_v2 = vsel %vm2615_vm10, %v9436_v11, 0.0 }
0x1e9a   : > { %5378 = vadd.xlane.f32.xlu1 %v5377_v2  ;;  %v5374_v49 = vsel %vm2615_vm10, %v9438_v46, 0.0 }
0x1e9b   : > { %5375 = vadd.xlane.f32.xlu0 %v5374_v49 }
0x1e9c   : > { %v9440_v47 = vpop.eup %9439 }
0x1e9d   : > { %v9442_v48 = vpop.eup %9441  ;;  %v5759_v4 = vsel %vm2615_vm10, %v9440_v47, 0.0 }
0x1e9e   : > { %5760 = vadd.xlane.f32.xlu1 %v5759_v4  ;;  %v5756_v53 = vsel %vm2615_vm10, %v9442_v48, 0.0 }
0x1e9f   : > { %5757 = vadd.xlane.f32.xlu0 %v5756_v53 }
0x1f23   : > { %v5486_v54 = vpop.xlane.xlu1 %5485 }
0x1f24   : > { %9443 = vrcp.f32 %v5486_v54  ;;  %v5483_v55 = vpop.xlane.xlu0 %5482 }
0x1f25   : > { %9445 = vrcp.f32 %v5483_v55 }
0x1f27   : > { %v5379_v58 = vpop.xlane.xlu1 %5378 }
0x1f28   : > { %v5376_v38 = vpop.xlane.xlu0 %5375 }
0x1f29   : > { %9447 = vrcp.f32 %v5376_v38 }
0x1f2a   : > { %9449 = vrcp.f32 %v5379_v58 }
0x1f2b   : > { %v5761_v12 = vpop.xlane.xlu1 %5760 }
0x1f2c   : > { %v5758_v59 = vpop.xlane.xlu0 %5757 }
0x1f2d   : > { %9451 = vrcp.f32 %v5758_v59 }
0x1f2e   : > { %v9444_v62 = vpop.eup %9443  ;;  %9453 = vrcp.f32 %v5761_v12 }
0x1f2f   : > { %v9446_v6 = vpop.eup %9445  ;;  %v5490_v61 = vmul.f32 %v9444_v62, %v9432_v44 }
0x1f30   : > { %v5489_v7 = vmul.f32 %v9446_v6, %v9434_v19  ;;  %v9232_v19 = vld [vmem:[%s10833_s14 + $0xf8] sm:$0xff]   ;;  %s9475_s14 = sshll.u32 %s9573_s13, 4  ;;  %s9476_s14 = int_to_ptr.vmem [resolvable:$false] %s9475_s14 }
0x1f31   : > { %8808 = vmatpush3.bf16.msra.mxu0 %v9232_v19  ;;  %v9250_v19 = vld [vmem:[%s9657_s20 + $0x108] sm:$0xff]  }
0x1f32   : > { %8767 = vmatprep.mubr.msk.f32.mxu1 %vm2615_vm10, %v5489_v7 }
0x1f33   : > { %v9448_v14 = vpop.eup %9447  ;;  %8768 = vmatmul.mubr.msk.f32.vlgmr.msra.gmra.mrb[48].mxu1 %vm2615_vm10, %v5490_v61 }
0x1f34   : > { %9030 = vmatpush3.bf16.msk.msra.mxu1 %vm10069_vm8, %v10469_v50  ;;  %v5382_v42 = vmul.f32 %v9448_v14, %v9438_v46  ;;  %v9450_v15 = vpop.eup %9449  ;;  %v7972_v46 = vld [vmem:[%s9632_s19 + $0xf] ss:$0 sm:$0xff] }
0x1f35   : > { %9039 = vmatprep.subr.msk.bf16.mxu1 %vm10069_vm8, %v10471_v23  ;;  %v5383_v20 = vmul.f32 %v9450_v15, %v9436_v11  ;;  %v9235_v15 = vld [vmem:[%s10836_s6 + $0x44] ss:$16 sps:$4 sm:$0xff]  }
0x1f36   : > { %8774 = vmatprep.mubr.msk.f32.mxu1 %vm2615_vm10, %v5382_v42  ;;  %6241 = vmatprep.subr.bf16.mxu0 %v9235_v15  ;;  %v9276_v15 = vld [vmem:[%s9657_s20 + $0x1b8] sm:$0xff]  }
0x1f37   : > { %v9452_v16 = vpop.eup %9451 }
0x1f38   : > { %v5764_v10 = vmul.f32 %v9452_v16, %v9442_v48  ;;  %v9454_v50 = vpop.eup %9453  ;;  %v9238_v16 = vld [vmem:[%s10836_s6 + $0x4c] ss:$16 sps:$4 sm:$0xff]  }
0x1f39   : > { %v5765_v27 = vmul.f32 %v9454_v50, %v9440_v47  ;;  %v9239_v50 = vld [vmem:[%s10836_s6 + $0x60] ss:$16 sps:$4 sm:$0xff]  }
0x1f3b   : > { %8775 = vmatmul.mubr.msk.f32.vlgmr.msra.gmra.mrb[48].mxu1 %vm2615_vm10, %v5383_v20  ;;  %v9233_v20 = vld [vmem:[%s10836_s6 + $0x40] ss:$16 sps:$4 sm:$0xff]  }
0x1f3c   : > { %9042 = vmatpush3.bf16.msk.msra.mxu1 %vm10069_vm8, %v10471_v23  ;;  %8788 = vmatprep.mubr.msk.f32.mxu1 %vm2615_vm10, %v5764_v10  ;;  %v5855_v23 = vmul.f32 %v9894_v5, %v10437_v30  ;;  %v9236_v10 = vld [vmem:[%s10836_s6 + $0x48] ss:$16 sps:$4 sm:$0xff]  }
0x1f3d   : > { %9045 = vmatprep.subr.msk.bf16.mxu1 %vm9863_vm13, %v10390_v18 }
0x1f43   : > { %8789 = vmatmul.mubr.msk.f32.vlgmr.msra.gmra.mrb[48].mxu1 %vm2615_vm10, %v5765_v27  ;;  %v9241_v27 = vld [vmem:[%s10836_s6 + $0x64] ss:$16 sps:$4 sm:$0xff]  }
0x1f44   : > { %8795 = vmatprep.mubr.msk.f32.mxu1 %vm1157_vm4, %v5854_v29  ;;  %v9242_v29 = vld [vmem:[%s10836_s6 + $0x68] ss:$16 sps:$4 sm:$0xff]  }
0x1f45   : > { %9048 = vmatpush3.bf16.xpose.msk.msra.mxu1 %vm9863_vm13, %v10390_v18  ;;  %vm7102_vm13 = vcmask 31744  }
0x1f46   : > { %9051 = vmatprep.subr.msk.bf16.mxu1 %vm10069_vm8, %v10473_v52 }
0x1f4c   : > { %8796 = vmatmul.mubr.msk.f32.vlgmr.msra.gmra.mrb[50].mxu1 %vm1157_vm4, %v5855_v23  ;;  %v9244_v23 = vld [vmem:[%s10836_s6 + $0x6c] ss:$16 sps:$4 sm:$0xff]   ;;  %s10856_s6 = sld [smem:[#allocation10_spill]] }
0x1f4d   : > { %9054 = vmatpush3.bf16.msk.msra.mxu1 %vm10069_vm8, %v10473_v52 }
0x1f4e   : > { %6284 = vmatprep.subr.bf16.mxu1 %v9238_v16  ;;  %v9279_v16 = vld [vmem:[%s10848_s17 + $0x4] ss:$8 sps:$4 sm:$0xff]  }
0x201f   : > { %v8797_v25 = vpop.f32.mrb[50].mxu1 }
0x2020   : > { %v5934_v36 = vadd.f32 %v8797_v25, %v10098_v1  ;;  %v5928_v31 = vpop.f32.mrb[51].mxu1  ;;  %v9245_v25 = vld [vmem:[%s9657_s20 + $0x140] sm:$0xff]  }
0x2021   : > { %v5929_v56 = vadd.f32 %v5928_v31, %v10098_v1 }
0x2022   : > { %v5940_v18 = vsel %vm2615_vm10, %v5934_v36, -inf }
0x2023   : > { %5941 = vmax.xlane.f32.xlu1 %v5940_v18  ;;  %v5937_v43 = vsel %vm2615_vm10, %v5929_v56, -inf }
0x2024   : > { %5938 = vmax.xlane.f32.xlu0 %v5937_v43 }
0x20b0   : > { %v5942_v5 = vpop.xlane.xlu1 %5941 }
0x20b1   : > { %v5944_v30 = vsub.f32 %v5934_v36, %v5942_v5  ;;  %v5939_v33 = vpop.xlane.xlu0 %5938  ;;  %v9247_v36 = vld [vmem:[%s9657_s20 + $0x1c0] sm:$0xff]  }
0x20b2   : > { %v5943_v63 = vsub.f32 %v5929_v56, %v5939_v33 }
0x20b3   : > { %v5947_v34 = vmul.f32 1.442695, %v5944_v30 }
0x20b4   : > { %v5945_v51 = vmul.f32 1.442695, %v5943_v63  ;;  %v7977_v63 = vld [vmem:[%s9637_s24 + $0x4] ss:$0 sm:$0xff] }
0x20b5   : > { %9455 = vpow2.f32 %v5947_v34 }
0x20b6   : > { %9457 = vpow2.f32 %v5945_v51 }
0x20bf   : > { %v9456_v52 = vpop.eup %9455 }
0x20c0   : > { %v9458_v35 = vpop.eup %9457  ;;  %v5952_v0 = vsel %vm2615_vm10, %v9456_v52, 0.0 }
0x20c1   : > { %5953 = vadd.xlane.f32.xlu1 %v5952_v0  ;;  %v5949_v1 = vsel %vm2615_vm10, %v9458_v35, 0.0  ;;  %v7979_v0 = vld [vmem:[%s9642_s30 + $0x4] ss:$0 sm:$0xff] }
0x20c2   : > { %5950 = vadd.xlane.f32.xlu0 %v5949_v1 }
0x214e   : > { %v5954_v39 = vpop.xlane.xlu1 %5953 }
0x214f   : > { %9459 = vrcp.f32 %v5954_v39  ;;  %v5951_v40 = vpop.xlane.xlu0 %5950 }
0x2150   : > { %9461 = vrcp.f32 %v5951_v40  ;;  %v9246_v40 = vld [vmem:[%s9657_s20 + $0x100] sm:$0xff]  }
0x2159   : > { %v9460_v21 = vpop.eup %9459 }
0x215a   : > { %v9462_v32 = vpop.eup %9461  ;;  %v5958_v44 = vmul.f32 %v9460_v21, %v9456_v52  ;;  %v9248_v21 = vld [vmem:[%s9657_s20 + $0x180] sm:$0xff]  }
0x215b   : > { %v5957_v41 = vmul.f32 %v9462_v32, %v9458_v35 }
0x215d   : > { %8802 = vmatprep.mubr.msk.f32.mxu1 %vm2615_vm10, %v5957_v41  ;;  %v9249_v41 = vld [vmem:[%s9657_s20 + $0x148] sm:$0xff]  }
0x215e   : > { %8803 = vmatmul.mubr.msk.f32.vlgmr.msra.gmra.mrb[48].mxu1 %vm2615_vm10, %v5958_v44  ;;  %v9251_v44 = vld [vmem:[%s9657_s20 + $0x1c8] sm:$0xff]  }
0x215f   : > { %6316 = vmatprep.mubr.bf16.mxu1 %v9572_v17  ;;  %6285 = vmatpush1.bf16.msra.mxu1 %v9236_v10 }
0x2160   : > { %6286 = vmatprep.subr.bf16.mxu1 %v9244_v23 }
0x2163   : > { %6287 = vmatpush1.bf16.msra.mxu1 %v9242_v29 }
0x2164   : > { %8401 = vmatprep.subr.bf16.mxu1 %v9247_v36 }
0x2231   : > { %v8804_v9 = vpop.f32.mrb[48].mxu1 }
0x2232   : > { %v6036_v22 = vpop.f32.mrb[49].mxu1 }
0x2233   : > { %v6052_v11 = vpack.c.bf16 %v8804_v9, %v6036_v22  ;;  %v9252_v9 = vld [vmem:[%s9657_s20 + $0x188] sm:$0xff]   ;;  %v9253_v22 = vld [vmem:[%s9657_s20 + $0x150] sm:$0xff]  }
0x2235   : > { %8810 = vmatmul.mubr.msk.bf16.vlgmr.msra.gmra.mrb[72].mxu0 %vm1157_vm4, %v6052_v11  ;;  %v9255_v11 = vld [vmem:[%s9657_s20 + $0x1d0] sm:$0xff]  }
0x2236   : > { %6273 = vmatprep.mubr.bf16.mxu0 %v9572_v17  ;;  %6242 = vmatpush1.bf16.msra.mxu0 %v9233_v20  ;;  %v7988_v20 = vld [vmem:[%s10835_s12 + $0x4] sm:$0xf]  ;;  %s7504_s12 = scalar_lea.sflag [#allocation4], %s10863_s9 }
0x2237   : > { %6243 = vmatprep.subr.bf16.mxu0 %v9241_v27  ;;  %v6181_v10 = vrot.slane %v7988_v20, %v10095_v45  ;;  %v6185_v27 = vrot.slane %v7988_v20, %v10227_v26  ;;  %v6193_v29 = vrot.slane %v7988_v20, %v3445_v13 }
0x223a   : > { %6244 = vmatpush1.bf16.msra.mxu0 %v9239_v50  ;;  %v6189_v50 = vrot.slane %v7988_v20, %v3441_v24 }
0x223b   : > { %8379 = vmatprep.subr.bf16.mxu0 %v9245_v25 }
0x2308   : > { %v6110_v2 = vpop.f32.mrb[72].mxu0 }
0x2309   : > { %v6111_v49 = vadd.f32 %v7972_v46, %v6110_v2  ;;  %v8811_v47 = vpop.f32.mrb[73].mxu0  ;;  %v9256_v2 = vld [vmem:[%s9657_s20 + $0x190] sm:$0xff]  }
0x230a   : > { %v6113_v48 = vpop.f32.mrb[74].mxu0  ;;  %v9259_v47 = vld [vmem:[%s9657_s20 + $0x1d8] sm:$0xff]  }
0x230b   : > { %v6114_v4 = vadd.f32 %v7972_v46, %v6113_v48  ;;  %v8812_v53 = vpop.f32.mrb[75].mxu0  ;;  %v6117_v54 = vadd.f32 %v6111_v49, %v10411_v8  ;;  %v9254_v46 = vld [vmem:[%s9657_s20 + $0x110] sm:$0xff]   ;;  %v9257_v49 = vld [vmem:[%s9657_s20 + $0x158] sm:$0xff]  }
0x230c   : > { %v9258_v48 = vld [vmem:[%s9657_s20 + $0x118] sm:$0xff]   ;;  %v9261_v53 = vld [vmem:[%s9657_s20 + $0x160] sm:$0xff]  }
0x230d   : > { %v6119_v55 = vsel %vm1157_vm4, %v6117_v54, 0.0  ;;  %v6118_v38 = vadd.f32 %v6114_v4, %v10413_v60  ;;  %v9260_v4 = vld [vmem:[%s9657_s20 + $0x198] sm:$0xff]  }
0x230e   : > { %6120 = vadd.xlane.f32.xlu0 %v6119_v55  ;;  %v9262_v55 = vld [vmem:[%s9657_s20 + $0x120] sm:$0xff]  }
0x230f   : > { %v6122_v58 = vsel %vm1157_vm4, %v6118_v38, 0.0 }
0x2310   : > { %6123 = vadd.xlane.f32.xlu1 %v6122_v58  ;;  %v9265_v58 = vld [vmem:[%s9657_s20 + $0x168] sm:$0xff]  }
0x239b   : > { %v6121_v59 = vpop.xlane.xlu0 %6120 }
0x239c   : > { %v6125_v62 = vmul.f32 0.03125, %v6121_v59  ;;  %v9267_v59 = vld [vmem:[%s9657_s20 + $0x1e8] sm:$0xff]  }
0x239d   : > { %v6124_v6 = vpop.xlane.xlu1 %6123 }
0x239e   : > { %v6127_v7 = vsub.f32 %v6117_v54, %v6125_v62  ;;  %v6126_v61 = vmul.f32 0.03125, %v6124_v6  ;;  %v9263_v54 = vld [vmem:[%s9657_s20 + $0x1e0] sm:$0xff]   ;;  %v9266_v62 = vld [vmem:[%s9657_s20 + $0x128] sm:$0xff]  }
0x239f   : > { %v9268_v6 = vld [vmem:[%s9657_s20 + $0x1a8] sm:$0xff]  }
0x23a0   : > { %v6128_v12 = vsub.f32 %v6118_v38, %v6126_v61  ;;  %v6129_v8 = vmul.f32 %v6127_v7, %v6127_v7  ;;  %v9264_v38 = vld [vmem:[%s9657_s20 + $0x1a0] sm:$0xff]   ;;  %v9270_v61 = vld [vmem:[%s9657_s20 + $0x130] sm:$0xff]  }
0x23a2   : > { %v6131_v60 = vsel %vm1157_vm4, %v6129_v8, 0.0  ;;  %v6130_v14 = vmul.f32 %v6128_v12, %v6128_v12  ;;  %v9272_v8 = vld [vmem:[%s9657_s20 + $0x1b0] sm:$0xff]  }
0x23a3   : > { %6132 = vadd.xlane.f32.xlu0 %v6131_v60  ;;  %v9273_v60 = vld [vmem:[%s9657_s20 + $0x178] sm:$0xff]  }
0x23a4   : > { %v6134_v42 = vsel %vm1157_vm4, %v6130_v14, 0.0  ;;  %v9274_v14 = vld [vmem:[%s9657_s20 + $0x138] sm:$0xff]  }
0x23a5   : > { %6135 = vadd.xlane.f32.xlu1 %v6134_v42  ;;  %v9275_v42 = vld [vmem:[%s9657_s20 + $0x1f8] sm:$0xff]  }
0x2430   : > { %v6133_v31 = vpop.xlane.xlu0 %6132 }
0x2431   : > { %v6137_v56 = vmul.f32 0.03125, %v6133_v31 }
0x2432   : > { %v6136_v18 = vpop.xlane.xlu1 %6135 }
0x2433   : > { %v6139_v43 = vadd.f32 1e-05, %v6137_v56  ;;  %v6138_v5 = vmul.f32 0.03125, %v6136_v18 }
0x2435   : > { %9463 = vrsqrt.f32 %v6139_v43  ;;  %v6140_v30 = vadd.f32 1e-05, %v6138_v5 }
0x2437   : > { %9465 = vrsqrt.f32 %v6140_v30 }
0x243f   : > { %v9464_v33 = vpop.eup %9463 }
0x2440   : > { %v6143_v34 = vmul.f32 %v9464_v33, %v6127_v7  ;;  %v9269_v7 = vld [vmem:[%s9657_s20 + $0x170] sm:$0xff]  }
0x2441   : > { %v9466_v51 = vpop.eup %9465 }
0x2442   : > { %v6153_v52 = vmul.f32 %v7977_v63, %v6143_v34  ;;  %v6144_v35 = vmul.f32 %v9466_v51, %v6128_v12  ;;  %v9271_v12 = vld [vmem:[%s9657_s20 + $0x1f0] sm:$0xff]  }
0x2444   : > { %v6154_v1 = vmul.f32 %v7977_v63, %v6144_v35  ;;  %v10569_v28 = vadd.f32 %v7979_v0, %v6153_v52 }
0x2446   : > { %v10571_v39 = vadd.f32 %v7979_v0, %v6154_v1 }
0x2448   : > { %v6174_v32 = vpack.c.bf16 %v10571_v39, %v10569_v28 }
0x244a   : > { %7997 = vmatmul.mubr.msk.bf16.vlgmr.msra.gmra.mrb[76].mxu0 %vm1157_vm4, %v6174_v32  ;;  %7998 = vmatmul.mubr.msk.bf16.vlgmr.msra.gmra.mrb[52].mxu1 %vm1157_vm4, %v6174_v32 }
0x244b   : > { %8380 = vmatpush3.bf16.msra.mxu0 %v9246_v40  ;;  %8402 = vmatpush3.bf16.msra.mxu1 %v9248_v21 }
0x244c   : > { %8381 = vmatprep.subr.bf16.mxu0 %v9249_v41  ;;  %8403 = vmatprep.subr.bf16.mxu1 %v9251_v44 }
0x244f   : > { %8382 = vmatpush3.bf16.msra.mxu0 %v9250_v19  ;;  %8404 = vmatpush3.bf16.msra.mxu1 %v9252_v9 }
0x2450   : > { %8383 = vmatprep.subr.bf16.mxu0 %v9253_v22  ;;  %8405 = vmatprep.subr.bf16.mxu1 %v9255_v11  ;;  %v9277_v11 = vld [vmem:[%s10848_s17] ss:$8 sps:$4 sm:$0xff]  }
0x2453   : > { %8384 = vmatpush3.bf16.msra.mxu0 %v9254_v46  ;;  %8406 = vmatpush3.bf16.msra.mxu1 %v9256_v2  ;;  %v9282_v46 = vld [vmem:[%s10848_s17 + $0x14] ss:$8 sps:$4 sm:$0xff]   ;;  %v9289_v2 = vld [vmem:[%s10849_s18] sm:$0xff]  }
0x2454   : > { %8385 = vmatprep.subr.bf16.mxu0 %v9257_v49  ;;  %8407 = vmatprep.subr.bf16.mxu1 %v9259_v47  ;;  %v9280_v49 = vld [vmem:[%s10848_s17 + $0x10] ss:$8 sps:$4 sm:$0xff]   ;;  %v9285_v47 = vld [vmem:[%s10848_s17 + $0x24] ss:$8 sps:$4 sm:$0xff]  }
0x2457   : > { %8386 = vmatpush3.bf16.msra.mxu0 %v9258_v48  ;;  %8408 = vmatpush3.bf16.msra.mxu1 %v9260_v4  ;;  %v9290_v48 = vld [vmem:[%s10849_s18 + $0x8] sm:$0xff]  }
0x2458   : > { %8387 = vmatprep.subr.bf16.mxu0 %v9261_v53  ;;  %8409 = vmatprep.subr.bf16.mxu1 %v9263_v54  ;;  %v9283_v4 = vld [vmem:[%s10848_s17 + $0x20] ss:$8 sps:$4 sm:$0xff]   ;;  %v9288_v53 = vld [vmem:[%s10848_s17 + $0x34] ss:$8 sps:$4 sm:$0xff]  }
0x2459   : > { %v9291_v54 = vld [vmem:[%s10849_s18 + $0x10] sm:$0xff]  }
0x245b   : > { %8388 = vmatpush3.bf16.msra.mxu0 %v9262_v55  ;;  %8410 = vmatpush3.bf16.msra.mxu1 %v9264_v38  ;;  %v9286_v55 = vld [vmem:[%s10848_s17 + $0x30] ss:$8 sps:$4 sm:$0xff]   ;;  %v6734_v38 = vld [vmem:[%s1060_s3] sm:$0x1]  ;;  %s10851_s3 = sld [smem:[#allocation18_spill]]  ;;  %s9477_s17 = scalar_lea.vmem %s9476_s14, 32 }
0x245c   : > { %8389 = vmatprep.subr.bf16.mxu0 %v9265_v58  ;;  %8411 = vmatprep.subr.bf16.mxu1 %v9267_v59  ;;  %v9292_v58 = vld [vmem:[%s10849_s18 + $0x18] sm:$0xff]   ;;  %v6743_v59 = vpack.c.bf16 %v6734_v38, %v6734_v38 }
0x245f   : > { %8390 = vmatpush3.bf16.msra.mxu0 %v9266_v62  ;;  %8412 = vmatpush3.bf16.msra.mxu1 %v9268_v6  ;;  %v9293_v62 = vld [vmem:[%s10849_s18 + $0x20] sm:$0xff]   ;;  %v9294_v6 = vld [vmem:[%s10849_s18 + $0x28] sm:$0xff]  }
0x2460   : > { %8391 = vmatprep.subr.bf16.mxu0 %v9269_v7  ;;  %8413 = vmatprep.subr.bf16.mxu1 %v9271_v12  ;;  %v9295_v7 = vld [vmem:[%s10849_s18 + $0x30] sm:$0xff]   ;;  %v9297_v12 = vld [vmem:[%s10849_s18 + $0x40] sm:$0xff]  }
0x2463   : > { %8392 = vmatpush3.bf16.msra.mxu0 %v9270_v61  ;;  %8414 = vmatpush3.bf16.msra.mxu1 %v9272_v8  ;;  %v9296_v61 = vld [vmem:[%s10849_s18 + $0x38] sm:$0xff]   ;;  %v9298_v8 = vld [vmem:[%s10849_s18 + $0x48] sm:$0xff]  }
0x2464   : > { %8393 = vmatprep.subr.bf16.mxu0 %v9273_v60  ;;  %8415 = vmatprep.subr.bf16.mxu1 %v9275_v42  ;;  %v9299_v60 = vld [vmem:[%s10849_s18 + $0x50] sm:$0xff]   ;;  %v9301_v42 = vld [vmem:[%s10849_s18 + $0x60] ss:$0 sps:$4 sm:$0xff]  }
0x2467   : > { %8394 = vmatpush3.bf16.msra.mxu0 %v9274_v14  ;;  %8416 = vmatpush3.bf16.msra.mxu1 %v9276_v15  ;;  %v9300_v14 = vld [vmem:[%s10849_s18 + $0x58] sm:$0xff]   ;;  %v6951_v15 = vsel %vm1183_vm0, %v9301_v42, 0 }
0x2468   : > { %6953 = vmatprep.subr.bf16.mxu1 %v9572_v17  ;;  %6800 = vmatprep.subr.bf16.mxu0 %v9279_v16 }
0x251d   : > { %v6275_v23 = vpop.f32.mrb[76].mxu0  ;;  %v6318_v25 = vpop.f32.mrb[52].mxu1 }
0x251e   : > { %v6276_v36 = vadd.f32 %v6275_v23, %v6181_v10  ;;  %v6319_v31 = vadd.f32 %v6318_v25, %v6189_v50  ;;  %v6277_v56 = vpop.f32.mrb[77].mxu0  ;;  %v6320_v18 = vpop.f32.mrb[53].mxu1 }
0x251f   : > { %v6278_v43 = vadd.f32 %v6277_v56, %v6185_v27  ;;  %v6321_v5 = vadd.f32 %v6320_v18, %v6193_v29  ;;  %v6279_v30 = vpop.f32.mrb[78].mxu0  ;;  %v6322_v33 = vpop.f32.mrb[54].mxu1 }
0x2520   : > { %v6280_v63 = vadd.f32 %v6279_v30, %v6181_v10  ;;  %v6323_v34 = vadd.f32 %v6322_v33, %v6189_v50  ;;  %v6281_v51 = vpop.f32.mrb[79].mxu0  ;;  %v6324_v24 = vpop.f32.mrb[55].mxu1  ;;  %v6327_v13 = vmax.f32 %v6276_v36, 0.0  ;;  %v6329_v35 = vmax.f32 %v6319_v31, 0.0  ;;  %v8064_v10 = vld [vmem:[%s10847_s23 + $0x1] ss:$0 sm:$0xff] }
0x2521   : > { %v6282_v52 = vadd.f32 %v6281_v51, %v6185_v27  ;;  %v6325_v57 = vadd.f32 %v6324_v24, %v6193_v29  ;;  %v6328_v40 = vmax.f32 %v6278_v43, 0.0  ;;  %v6330_v21 = vmax.f32 %v6321_v5, 0.0  ;;  %v6744_v24 = vld [vmem:[%s10851_s3] sm:$0x3]  ;;  %s10853_s3 = sld [smem:[#allocation25_spill]] }
0x2522   : > { %v6331_v0 = vmax.f32 %v6280_v63, 0.0  ;;  %v6333_v1 = vmax.f32 %v6323_v34, 0.0 }
0x2523   : > { %v6332_v32 = vmax.f32 %v6282_v52, 0.0  ;;  %v6334_v41 = vmax.f32 %v6325_v57, 0.0  ;;  %v6789_v57 = vrot.slane %v6744_v24, %v10095_v45 }
0x2524   : > { %v6400_v44 = vpack.c.bf16 %v6331_v0, %v6327_v13  ;;  %v6402_v19 = vpack.c.bf16 %v6333_v1, %v6329_v35  ;;  %v6793_v13 = vrot.slane %v6744_v24, %v10227_v26  ;;  %v9302_v26 = vld [vmem:[%s10852_s2] sm:$0xff]  }
0x2525   : > { %v6401_v9 = vpack.c.bf16 %v6332_v32, %v6328_v40  ;;  %v6403_v22 = vpack.c.bf16 %v6334_v41, %v6330_v21 }
0x2527   : > { %6636 = vmatprep.mubr.bf16.mxu0 %v6401_v9  ;;  %6677 = vmatprep.mubr.bf16.mxu1 %v6403_v22  ;;  %v9304_v9 = vld [vmem:[%s10852_s2 + $0x10] sm:$0xff]   ;;  %v9305_v22 = vld [vmem:[%s10852_s2 + $0x18] sm:$0xff]  }
0x2528   : > { %6637 = vmatmul.mubr.bf16.vlgmr.msra.gmra.mrb[80].mxu0 %v6400_v44  ;;  %6678 = vmatmul.mubr.bf16.vlgmr.msra.gmra.mrb[56].mxu1 %v6402_v19  ;;  %v9303_v19 = vld [vmem:[%s10852_s2 + $0x8] sm:$0xff]  }
0x2529   : > { %6801 = vmatpush1.bf16.msra.mxu0 %v9277_v11  ;;  %6832 = vmatprep.mubr.bf16.mxu0 %v9572_v17  ;;  %v9306_v11 = vld [vmem:[%s10852_s2 + $0x20] sm:$0xff]  }
0x252a   : > { %6802 = vmatprep.subr.bf16.mxu0 %v9282_v46  ;;  %6954 = vmatpush1.bf16.msra.mxu1 %v9289_v2  ;;  %v9307_v46 = vld [vmem:[%s10852_s2 + $0x28] sm:$0xff]   ;;  %v9308_v2 = vld [vmem:[%s10852_s2 + $0x30] ss:$0 sps:$4 sm:$0x33]   ;;  %s10855_s2 = sld [smem:[#allocation23_spill]] }
0x252b   : > { %6955 = vmatprep.subr.bf16.mxu1 %v9572_v17 }
0x252d   : > { %6803 = vmatpush1.bf16.msra.mxu0 %v9280_v49  ;;  %v7053_v49 = vsel %vm2753_vm6, %v9308_v2, 0 }
0x252e   : > { %6804 = vmatprep.subr.bf16.mxu0 %v9285_v47  ;;  %6956 = vmatpush1.bf16.msra.mxu1 %v9290_v48 }
0x252f   : > { %6957 = vmatprep.subr.bf16.mxu1 %v9572_v17 }
0x2531   : > { %6805 = vmatpush1.bf16.msra.mxu0 %v9283_v4 }
0x2532   : > { %6806 = vmatprep.subr.bf16.mxu0 %v9288_v53  ;;  %6958 = vmatpush1.bf16.msra.mxu1 %v9291_v54 }
0x2533   : > { %6959 = vmatprep.subr.bf16.mxu1 %v9572_v17 }
0x2535   : > { %6807 = vmatpush1.bf16.msra.mxu0 %v9286_v55 }
0x2536   : > { %6960 = vmatpush1.bf16.msra.mxu1 %v9292_v58  ;;  %8813 = vmatprep.subr.bf16.mxu0 %v9568_v3 }
0x2537   : > { %6961 = vmatprep.subr.bf16.mxu1 %v9572_v17 }
0x2538   : > { %8109 = vmatmul.mubr.msk.bf16.vlgmr.msra.gmra.mrb[84].mxu0 %vm6796_vm3, %v6743_v59 }
0x2539   : > { %8827 = vmatprep.mubr.msk.bf16.mxu0 %vm9569_vm1, %v9568_v3  ;;  %8814 = vmatpush3.bf16.msra.mxu0 %v9302_v26 }
0x253a   : > { %6962 = vmatpush1.bf16.msra.mxu1 %v9293_v62  ;;  %8815 = vmatprep.subr.bf16.mxu0 %v9568_v3 }
0x253b   : > { %6963 = vmatprep.subr.bf16.mxu1 %v9572_v17 }
0x253d   : > { %8816 = vmatpush3.bf16.msra.mxu0 %v9303_v19 }
0x253e   : > { %6964 = vmatpush1.bf16.msra.mxu1 %v9294_v6  ;;  %8817 = vmatprep.subr.bf16.mxu0 %v9568_v3  ;;  %v9311_v6 = vld [vmem:[%s10853_s3] sm:$0xff]  }
0x253f   : > { %6965 = vmatprep.subr.bf16.mxu1 %v9572_v17 }
0x2541   : > { %8818 = vmatpush3.bf16.msra.mxu0 %v9304_v9 }
0x2542   : > { %6966 = vmatpush1.bf16.msra.mxu1 %v9295_v7  ;;  %8819 = vmatprep.subr.bf16.mxu0 %v9568_v3  ;;  %v9312_v7 = vld [vmem:[%s10853_s3 + $0x8] sm:$0xff]   ;;  %s1063_s3 = scalar_lea.vmem %s10856_s6, %s9808_s28  ;;  %s10859_s6 = sld [smem:[#allocation28_spill]] }
0x2543   : > { %6967 = vmatprep.subr.bf16.mxu1 %v9572_v17 }
0x2545   : > { %8820 = vmatpush3.bf16.msra.mxu0 %v9305_v22 }
0x2546   : > { %6968 = vmatpush1.bf16.msra.mxu1 %v9296_v61  ;;  %8821 = vmatprep.subr.bf16.mxu0 %v9568_v3  ;;  %v1162_v61 = vrot.slane %v9847_v37, 4 }
0x2547   : > { %6969 = vmatprep.subr.bf16.mxu1 %v9572_v17 }
0x2549   : > { %8822 = vmatpush3.bf16.msra.mxu0 %v9306_v11  ;;  %v7362_v11 = vld [vmem:[%s10859_s6] sm:$0xf]  ;;  %s10862_s6 = sld [smem:[#allocation29_spill]] }
0x254a   : > { %6970 = vmatpush1.bf16.msra.mxu1 %v9297_v12  ;;  %8823 = vmatprep.subr.bf16.mxu0 %v9568_v3  ;;  %v1163_v12 = vadd.f32 %v1162_v61, %v9847_v37  ;;  %v7098_v37 = vld [vmem:[%s1063_s3] sm:$0x1]  ;;  %s10861_s3 = sld [smem:[#allocation24_spill]] }
0x254b   : > { %6971 = vmatprep.subr.bf16.mxu1 %v9572_v17 }
0x254d   : > { %8824 = vmatpush3.bf16.msra.mxu0 %v9307_v46  ;;  %v7368_v46 = vsel %vm1183_vm0, %v7362_v11, 0  ;;  %vm7307_vm0 = vcmask 408576  }
0x254e   : > { %6972 = vmatpush1.bf16.msra.mxu1 %v9298_v8  ;;  %8825 = vmatprep.subr.bf16.mxu0 %v9568_v3  ;;  %v6870_v8 = vld [vmem:[%s10854_s5] sm:$0x1]  ;;  %s10858_s5 = sld [smem:[#allocation27_spill]] }
0x254f   : > { %6973 = vmatprep.subr.bf16.mxu1 %v9572_v17 }
0x2551   : > { %8826 = vmatpush3.bf16.msra.mxu0 %v7053_v49 }
0x2552   : > { %6974 = vmatpush1.bf16.msra.mxu1 %v9299_v60  ;;  %8831 = vmatprep.subr.bf16.mxu0 %v9568_v3 }
0x2553   : > { %6975 = vmatprep.subr.bf16.mxu1 %v9572_v17 }
0x2554   : > { %v9315_v26 = vld [vmem:[%s10858_s5 + $0x10] sm:$0xff]   ;;  %v9316_v9 = vld [vmem:[%s10858_s5 + $0x18] ss:$0 sps:$4 sm:$0x11]  }
0x2555   : > { %v7313_v22 = vsel %vm7311_vm14, %v9316_v9, 0 }
0x2556   : > { %6976 = vmatpush1.bf16.msra.mxu1 %v9300_v14  ;;  %v1164_v14 = vrot.slane %v1163_v12, 2 }
0x2557   : > { %6977 = vmatprep.subr.bf16.mxu1 %v9572_v17 }
0x255a   : > { %6978 = vmatpush1.bf16.msra.mxu1 %v6951_v15 }
0x255b   : > { %8845 = vmatprep.subr.bf16.mxu1 %v9568_v3 }
0x25fb   : > { %v8395_v16 = vpop.f32.mrb[80].mxu0  ;;  %v8417_v20 = vpop.f32.mrb[56].mxu1 }
0x25fc   : > { %v8396_v50 = vpop.f32.mrb[81].mxu0  ;;  %v8418_v27 = vpop.f32.mrb[57].mxu1 }
0x25fd   : > { %v8397_v29 = vadd.f32 %v8396_v50, %v8395_v16  ;;  %v8419_v23 = vadd.f32 %v8418_v27, %v8417_v20  ;;  %v8398_v25 = vpop.f32.mrb[82].mxu0  ;;  %v8420_v36 = vpop.f32.mrb[58].mxu1  ;;  %v7099_v20 = vld [vmem:[%s10855_s2] sm:$0x3]  ;;  %v1165_v27 = vadd.f32 %v1164_v14, %v1163_v12  ;;  %s10860_s2 = sld [smem:[#allocation22_spill]] }
0x25fe   : > { %v8399_v31 = vpop.f32.mrb[83].mxu0  ;;  %v8421_v56 = vpop.f32.mrb[59].mxu1 }
0x25ff   : > { %v6639_v18 = vadd.f32 %v8397_v29, %v8064_v10  ;;  %v8400_v17 = vadd.f32 %v8399_v31, %v8398_v25  ;;  %v8422_v43 = vadd.f32 %v8421_v56, %v8420_v36  ;;  %v1166_v25 = vrot.slane %v1165_v27, 1  ;;  %v9309_v31 = vld [vmem:[%s10857_s8] sm:$0xff]  }
0x2600   : > { %v7100_v36 = vpack.c.bf16 %v7098_v37, %v7098_v37  ;;  %v9317_v37 = vld [vmem:[%s9732_s21] sm:$0xff]  }
0x2601   : > { %v6680_v5 = vadd.f32 %v8419_v23, %v6639_v18  ;;  %v6642_v30 = vadd.f32 %v8400_v17, %v8064_v10  ;;  %v7107_v23 = vsel %vm2753_vm6, %v7099_v20, 0  ;;  %v1167_v56 = vadd.f32 %v1166_v25, %v1165_v27  ;;  %v9310_v18 = vld [vmem:[%s10857_s8 + $0x8] sm:$0xff]   ;;  %s10804_s8 = sand.u32 1, %s9525_s10  }
0x2602   : > { %v9318_v25 = vld [vmem:[%s9732_s21 + $0x8] sm:$0xff]  }
0x2603   : > { %v6683_v33 = vadd.f32 %v8422_v43, %v6642_v30  ;;  %v6686_v63 = vadd.f32 %v6680_v5, %v10569_v28  ;;  %v7156_v17 = vmax.f32 %v1167_v56, 0.0  ;;  %v9313_v43 = vld [vmem:[%s10858_s5] sm:$0xff]   ;;  %v9314_v30 = vld [vmem:[%s10858_s5 + $0x8] sm:$0xff]   ;;  %s10735_s5 = scalar_lea.vmem [#allocation3], %s10804_s8 }
0x2604   : > { %v7008_v2 = vld [vmem:[%s10860_s2] sm:$0x1]  ;;  %s8150_s2 = sshll.u32 %s9768_s0, 4 }
0x2605   : > { %v6688_v34 = vsel %vm1157_vm4, %v6686_v63, 0.0  ;;  %v6687_v51 = vadd.f32 %v6683_v33, %v10571_v39  ;;  %v7161_v5 = vpack.c.bf16 %v7156_v17, %v7156_v17  ;;  %s10753_s8 = scalar_lea.hbm %s9745_s4, %s8150_s2 }
0x2606   : > { %6689 = vadd.xlane.f32.xlu0 %v6688_v34 }
0x2607   : > { %v6691_v52 = vsel %vm1157_vm4, %v6687_v51, 0.0 }
0x2608   : > { %6692 = vadd.xlane.f32.xlu1 %v6691_v52 }
0x260b   : > { %v6834_v35 = vpop.f32.mrb[84].mxu0 }
0x260c   : > { %v6835_v0 = vadd.f32 %v6834_v35, %v6789_v57  ;;  %v6836_v1 = vpop.f32.mrb[85].mxu0 }
0x260d   : > { %v6837_v40 = vadd.f32 %v6836_v1, %v6793_v13  ;;  %v6838_v28 = vpop.f32.mrb[86].mxu0  ;;  %v8098_v13 = vld [vmem:[%s9637_s24 + $0x5] ss:$0 sm:$0xff] }
0x260e   : > { %v6841_v21 = vmax.f32 %v6835_v0, 0.0  ;;  %v6839_v32 = vpop.f32.mrb[87].mxu0  ;;  %v8100_v1 = vld [vmem:[%s9642_s30 + $0x5] ss:$0 sm:$0xff] }
0x260f   : > { %v6842_v39 = vmax.f32 %v6837_v40, 0.0 }
0x2610   : > { %v6868_v44 = vpack.c.bf16 %v6841_v21, %v6841_v21 }
0x2611   : > { %v6869_v41 = vpack.c.bf16 %v6842_v39, %v6842_v39 }
0x2613   : > { %8123 = vmatprep.mubr.msk.bf16.mxu1 %vm6946_vm11, %v6869_v41 }
0x2614   : > { %6986 = vmatmul.mubr.bf16.vlgmr.msra.gmra.mrb[60].mxu1 %v6868_v44 }
0x2615   : > { %8849 = vmatprep.mubr.msk.bf16.mxu1 %vm9569_vm1, %v9568_v3  ;;  %8846 = vmatpush3.bf16.msra.mxu1 %v9311_v6 }
0x2616   : > { %8847 = vmatprep.subr.bf16.mxu1 %v9568_v3 }
0x2619   : > { %8848 = vmatpush3.bf16.msra.mxu1 %v9312_v7 }
0x261a   : > { %8865 = vmatprep.subr.bf16.mxu1 %v9568_v3 }
0x2693   : > { %v6690_v47 = vpop.xlane.xlu0 %6689 }
0x2694   : > { %v6694_v48 = vmul.f32 0.03125, %v6690_v47 }
0x2695   : > { %v6693_v4 = vpop.xlane.xlu1 %6692 }
0x2696   : > { %v10681_v53 = vsub.f32 %v6686_v63, %v6694_v48  ;;  %v6695_v54 = vmul.f32 0.03125, %v6693_v4 }
0x2698   : > { %v10683_v55 = vsub.f32 %v6687_v51, %v6695_v54  ;;  %v6698_v38 = vmul.f32 %v10681_v53, %v10681_v53 }
0x269a   : > { %v6700_v58 = vsel %vm1157_vm4, %v6698_v38, 0.0  ;;  %v6699_v59 = vmul.f32 %v10683_v55, %v10683_v55  ;;  %v7101_v38 = vld [vmem:[%s10861_s3] sm:$0x1]  ;;  %s7519_s3 = sshll.u32 %s10735_s5, 4  ;;  %s7520_s3 = int_to_ptr.vmem [resolvable:$true] %s7519_s3 }
0x269b   : > { %6701 = vadd.xlane.f32.xlu0 %v6700_v58  ;;  %p9478_p0 = scmp.lt.s32.totalorder %s7520_s3, %s9476_s14 }
0x269c   : > { %v6703_v62 = vsel %vm1157_vm4, %v6699_v59, 0.0 }
0x269d   : > { %6704 = vadd.xlane.f32.xlu1 %v6703_v62 }
0x26e7   : > { %v6987_v60 = vpop.f32.mrb[60].mxu1 }
0x26e8   : > { %v6988_v42 = vadd.f32 %v6987_v60, %v6870_v8  ;;  %v6989_v15 = vpop.f32.mrb[61].mxu1 }
0x26e9   : > { %v6990_v16 = vpop.f32.mrb[62].mxu1 }
0x26ea   : > { %v6993_v10 = vmax.f32 %v6988_v42, 0.0  ;;  %v6991_v50 = vpop.f32.mrb[63].mxu1 }
0x26ec   : > { %v7007_v29 = vpack.c.bf16 %v6993_v10, %v6993_v10 }
0x26ee   : > { %8828 = vmatmul.mubr.msk.bf16.vlgmr.msra.gmra.mrb[88].mxu0 %vm7048_vm12, %v7007_v29 }
0x26ef   : > { %8832 = vmatpush3.bf16.msra.mxu0 %v7107_v23  ;;  %8833 = vmatprep.mubr.msk.bf16.mxu0 %vm9569_vm1, %v9568_v3 }
0x26f0   : > { %8837 = vmatprep.subr.bf16.mxu0 %v9568_v3 }
0x26f6   : > { %8834 = vmatmul.mubr.msk.bf16.vlgmr.msra.gmra.mrb[92].mxu0 %vm7102_vm13, %v7100_v36 }
0x26f7   : > { %8838 = vmatpush3.bf16.msra.mxu0 %v9309_v31  ;;  %8841 = vmatprep.mubr.msk.bf16.mxu0 %vm9569_vm1, %v9568_v3 }
0x26f8   : > { %8839 = vmatprep.subr.bf16.mxu0 %v9568_v3 }
0x26fb   : > { %8840 = vmatpush3.bf16.msra.mxu0 %v9310_v18 }
0x26fc   : > { %8853 = vmatprep.subr.bf16.mxu0 %v9568_v3 }
0x26fe   : > { %8842 = vmatmul.mubr.msk.bf16.vlgmr.msra.gmra.mrb[96].mxu0 %vm1157_vm4, %v7161_v5 }
0x26ff   : > { %8854 = vmatpush3.bf16.msra.mxu0 %v9313_v43  ;;  %8861 = vmatprep.mubr.msk.bf16.mxu0 %vm9569_vm1, %v9568_v3 }
0x2700   : > { %8855 = vmatprep.subr.bf16.mxu0 %v9568_v3 }
0x2703   : > { %8856 = vmatpush3.bf16.msra.mxu0 %v9314_v30 }
0x2704   : > { %8857 = vmatprep.subr.bf16.mxu0 %v9568_v3 }
0x2707   : > { %8858 = vmatpush3.bf16.msra.mxu0 %v9315_v26 }
0x2708   : > { %8859 = vmatprep.subr.bf16.mxu0 %v9568_v3 }
0x270b   : > { %8860 = vmatpush3.bf16.msra.mxu0 %v7313_v22 }
0x2728   : > { %v6702_v33 = vpop.xlane.xlu0 %6701 }
0x2729   : > { %v6706_v63 = vmul.f32 0.03125, %v6702_v33 }
0x272a   : > { %v6705_v34 = vpop.xlane.xlu1 %6704 }
0x272b   : > { %v6708_v51 = vadd.f32 1e-05, %v6706_v63  ;;  %v6707_v24 = vmul.f32 0.03125, %v6705_v34  ;;  %v8145_v34 = vld [vmem:[%s10862_s6] ss:$0 sm:$0xff]  ;;  %s9471_s6 = scalar_lea.vmem %s7520_s3, 16 }
0x272c   : > { %p9472_p11 = scmp.ne.s32.totalorder %s7520_s3, %s9471_s6  ;;  %p9479_p1 = scmp.lt.s32.totalorder %s9477_s17, %s9471_s6 }
0x272d   : > { %9467 = vrsqrt.f32 %v6708_v51  ;;  %v6709_v52 = vadd.f32 1e-05, %v6707_v24 }
0x272e   : > { %p9473_p12 = pnand %p9472_p11, %p9785_p5  ;;  %p9480_p2 = por %p9479_p1, %p9478_p0 }
0x272f   : > { %9469 = vrsqrt.f32 %v6709_v52 }
0x2730   : > { %p9474_p13 = pneg %p9473_p12 }
0x2732   : > { %p9481_p3 = pnand %p9480_p2, %p9474_p13 }
0x2737   : > { %v9468_v57 = vpop.eup %9467 }
0x2738   : > { %v6712_v35 = vmul.f32 %v9468_v57, %v10681_v53 }
0x2739   : > { %v9470_v0 = vpop.eup %9469 }
0x273a   : > { %v6722_v40 = vmul.f32 %v8098_v13, %v6712_v35  ;;  %v6713_v28 = vmul.f32 %v9470_v0, %v10683_v55 }
0x273c   : > { %v6723_v21 = vmul.f32 %v8098_v13, %v6713_v28  ;;  %v6732_v32 = vadd.f32 %v8100_v1, %v6722_v40 }
0x273e   : > { %v6733_v39 = vadd.f32 %v8100_v1, %v6723_v21  ;;  %v7149_v41 = vmax.f32 %v6732_v32, 0.0 }
0x2740   : > { %v7150_v44 = vmax.f32 %v6733_v39, 0.0 }
0x2742   : > { %v7155_v19 = vpack.c.bf16 %v7150_v44, %v7149_v41 }
0x2744   : > { %8850 = vmatmul.mubr.msk.bf16.vlgmr.msra.gmra.mrb[64].mxu1 %vm1157_vm4, %v7155_v19 }
0x2745   : > { %8867 = vmatprep.mubr.msk.bf16.mxu1 %vm9569_vm1, %v9568_v3  ;;  %8866 = vmatpush3.bf16.msra.mxu1 %v7368_v46 }
0x2746   : > { %8871 = vmatprep.subr.bf16.mxu1 %v9568_v3 }
0x27c1   : > { %v7089_v49 = vpop.f32.mrb[88].mxu0 }
0x27c2   : > { %v7090_v47 = vadd.f32 %v7089_v49, %v7008_v2  ;;  %v8829_v48 = vpop.f32.mrb[89].mxu0 }
0x27c3   : > { %v7092_v4 = vpop.f32.mrb[90].mxu0 }
0x27c4   : > { %v7095_v53 = vmax.f32 %v7090_v47, 0.0  ;;  %v8830_v54 = vpop.f32.mrb[91].mxu0 }
0x27c6   : > { %v7277_v55 = vmax.f32 %v7095_v53, 0.0  ;;  %7097 = vst.msk [vmem:[%s10735_s5] sm:$0x1] %vm7096_vm15, %v7095_v53 }
0x27c8   : > { %v7285_v58 = vpack.c.bf16 %v7277_v55, %v7277_v55 }
0x27c9   : > { %v7143_v59 = vpop.f32.mrb[92].mxu0 }
0x27ca   : > { %v7144_v62 = vadd.f32 %v7143_v59, %v7101_v38  ;;  %v8835_v6 = vpop.f32.mrb[93].mxu0  ;;  %8862 = vmatmul.mubr.msk.bf16.vlgmr.msra.gmra.mrb[100].mxu0 %vm7307_vm0, %v7285_v58 }
0x27cb   : > { %v7146_v7 = vpop.f32.mrb[94].mxu0 }
0x27cc   : > { %v7361_v61 = vmax.f32 %v7144_v62, 0.0  ;;  %v8836_v12 = vpop.f32.mrb[95].mxu0 }
0x27ce   : > { %v7363_v8 = vpack.c.bf16 %v7361_v61, %v7361_v61 }
0x27d0   : > { %8868 = vmatmul.mubr.msk.bf16.vlgmr.msra.gmra.mrb[68].mxu1 %vm1179_vm2, %v7363_v8 }
0x27d1   : > { %v7211_v60 = vpop.f32.mrb[96].mxu0  ;;  %8875 = vmatprep.mubr.msk.bf16.mxu1 %vm9569_vm1, %v9568_v3  ;;  %8872 = vmatpush3.bf16.msra.mxu1 %v9317_v37 }
0x27d2   : > { %v8843_v14 = vpop.f32.mrb[97].mxu0  ;;  %v7220_v16 = vrot.slane %v7211_v60, %v10095_v45  ;;  %8873 = vmatprep.subr.bf16.mxu1 %v9568_v3 }
0x27d3   : > { %v7214_v42 = vpop.f32.mrb[98].mxu0 }
0x27d4   : > { %v8844_v15 = vpop.f32.mrb[99].mxu0 }
0x27d5   : > { %8874 = vmatpush3.bf16.msra.mxu1 %v9318_v25 }
0x2817   : > { %v7270_v20 = vpop.f32.mrb[64].mxu1 }
0x2818   : > { %v7271_v10 = vadd.f32 %v7270_v20, %v7220_v16  ;;  %v8851_v50 = vpop.f32.mrb[65].mxu1 }
0x2819   : > { %v7273_v27 = vpop.f32.mrb[66].mxu1 }
0x281a   : > { %v7274_v29 = vadd.f32 %v7273_v27, %v7220_v16  ;;  %v8852_v23 = vpop.f32.mrb[67].mxu1 }
0x289d   : > { %v7349_v36 = vpop.f32.mrb[100].mxu0 }
0x289e   : > { %v7358_v31 = vrot.slane %v7349_v36, %v10095_v45  ;;  %v8863_v56 = vpop.f32.mrb[101].mxu0 }
0x289f   : > { %v7352_v18 = vpop.f32.mrb[102].mxu0 }
0x28a0   : > { %v7359_v17 = vadd.f32 %v7358_v31, %v7271_v10  ;;  %v7360_v43 = vadd.f32 %v7358_v31, %v7274_v29  ;;  %v8864_v5 = vpop.f32.mrb[103].mxu0 }
0x28a3   : > { %v7404_v30 = vpop.f32.mrb[68].mxu1 }
0x28a4   : > { %v7413_v33 = vrot.slane %v7404_v30, %v10095_v45  ;;  %v8869_v63 = vpop.f32.mrb[69].mxu1 }
0x28a5   : > { %v7407_v3 = vpop.f32.mrb[70].mxu1 }
0x28a6   : > { %v7414_v51 = vadd.f32 %v7413_v33, %v7359_v17  ;;  %v7415_v24 = vadd.f32 %v7413_v33, %v7360_v43  ;;  %v8870_v52 = vpop.f32.mrb[71].mxu1 }
0x28a8   : > { %v7423_v57 = vadd.f32 %v8145_v34, %v7414_v51  ;;  %v7424_v13 = vadd.f32 %v8145_v34, %v7415_v24 }
0x28aa   : > { %v7425_v35 = vmax.f32 %v7423_v57, 0.0  ;;  %v7426_v0 = vmax.f32 %v7424_v13, 0.0 }
0x28ac   : > { %v7431_v1 = vpack.c.bf16 %v7426_v0, %v7425_v35 }
0x28ae   : > { %8876 = vmatmul.mubr.msk.bf16.vlgmr.msra.gmra.mrb[72].mxu1 %vm1157_vm4, %v7431_v1 }
0x28af   : > { %9484 = shalt.err (!%p9481_p3)
}
0x28b0   : > { %s9485_s9 = scalar_lea.hbm %s10753_s8, 16  ;;  %s9489_s13 = scalar_lea.hbm %s9745_s4, 32 }
0x28b1   : > { %p9486_p4 = scmp.ne.s32.totalorder %s10753_s8, %s9485_s9  ;;  %p9490_p9 = scmp.lt.u32.totalorder %s10753_s8, %s9745_s4 }
0x28b2   : > { %p9491_p10 = scmp.lt.u32.totalorder %s9489_s13, %s9485_s9  ;;  %p9493_p12 = scmp.lt.u32.totalorder %s9485_s9, %s10753_s8 }
0x28b3   : > { %p9487_p7 = pnand %p9486_p4, %p9785_p5 }
0x28b4   : > { %p9492_p11 = por %p9491_p10, %p9490_p9 }
0x28b5   : > { %p9488_p8 = pneg %p9487_p7 }
0x28b6   : > { %p9494_p0 = por %p9493_p12, %p9492_p11 }
0x28b8   : > { %p9495_p13 = pnand %p9494_p0, %p9488_p8 }
0x28ba   : > { %9498 = shalt.err (!%p9495_p13)
}
0x28bb   : > { %9079 = dma.vmem_to_hbm [thread:$0]  (%p9785_p5), %s7520_s3, 16, %s10753_s8, %s7504_s12   ;;  %v8146_v45 = vld [vmem:[#allocation2] ss:$0 sm:$0xff]  ;;  %vm7495_vm1 = vcmask 7168  }
0x28bc   : > { %s10864_s14 = sshll.u32 %s9808_s28, 4 }
0x28bd   : > { %s1068_s0 = scalar_lea.vmem %s9740_s27, %s10864_s14 }
0x2981   : > { %v7488_v40 = vpop.f32.mrb[72].mxu1 }
0x2982   : > { %v7489_v28 = vadd.f32 %v8146_v45, %v7488_v40  ;;  %v8877_v21 = vpop.f32.mrb[73].mxu1 }
0x2983   : > { %v7491_v32 = vpop.f32.mrb[74].mxu1 }
0x2984   : > { %7496 = vst.msk [vmem:[%s1068_s0] sm:$0xff] %vm7495_vm1, %v7489_v28  ;;  %v7492_v39 = vadd.f32 %v8146_v45, %v7491_v32  ;;  %v8878_v41 = vpop.f32.mrb[75].mxu1 }
0x2986   : > { %7497 = vst.msk [vmem:[%s1068_s0 + $0x8] sm:$0xff] %vm7495_vm1, %v7492_v39 }
0x2987 PF: > { %p9085_p1 = scmp.ge.s32.totalorder %s9533_s15, 2  ;;  %s7539_s26 = sand.u32 1, %s9521_s7  }
0x2988   : > { %s7540_s8 = scalar_lea.sflag [#allocation4], %s7539_s26 }
0x2989   : > { %p9082_p5 = pnand %p9085_p1, %p9789_p6 }
0x298b   : > { %9516 = dma.done.wait (!%p9082_p5), %s7540_s8, 16  }
0x298c   : > { %9518 = vsyncadd (!%p9082_p5), %s7540_s8, 4294967280  ;;  %p80_p2 = scmp.ge.s32.totalorder %s9772_s16, 4   ;;  %s10865_s7 = smov %s9525_s10 }
0x298d   : > { %s10866_s10 = smov %s9529_s11  ;;  %s10867_s11 = smov %s9783_s22 }
0x298e   : > { %s10868_s15 = smov %s9772_s16  ;;  %82 = sbr.rel (!%p80_p2) target bundleno = 68 (0x44), region = 281 }
0x2995   :  { %7544 = vsyncpa [#allocation4], 1 }
0x2996   :  { %7546 = vsyncpa [#allocation4 + $0x1], 1 }

</bundles_post_ra>
